<compile_context>
chip_gen: v7x
topology: tpu7x:2x2x1
jax: 0.10.0
libtpu: 0.0.40
codegen_flags: <defaults>
</compile_context>

<pallas_src>
import functools

import jax
import jax.numpy as jnp
import numpy as np
from jax.experimental import pallas as pl
from jax.experimental.pallas import tpu as pltpu

# ---- module configuration (small, consistent with SplitTModelV2.__init__) ----
NUM_NODES = 4
NUM_VALS = 4
NUM_PAIRS = 3
NUM_UNARY = NUM_NODES * NUM_VALS                 # 16
NUM_PAIRPOT = NUM_PAIRS * NUM_VALS * NUM_VALS    # 48
NUM_POTS = NUM_UNARY + NUM_PAIRPOT               # 64
HIDDEN = 32                                      # hidden width of each t_model MLP
H2 = 2 * HIDDEN                                  # fused hidden width (unary ++ pair)

TILE_B_MAX = 2048                                # f32 rows per grid step (>=1 MiB/step)


def _choose_tile_b(batch):
    """Large tiles to amortize per-step overhead; >=4 steps for v7x 2-TC balance."""
    if batch <= TILE_B_MAX:
        return batch                              # single resident tile
    tile = TILE_B_MAX
    while tile > 512 and pl.cdiv(batch, tile) < 4:
        tile //= 2
    return tile


def split_tmodel_kernel(beliefs_ref, pots_ref, wb_ref, wp_ref, b1_ref, w2_ref,
                        b2_ref, out_ref):
    """One tile_b-row batch tile, fully resident in VMEM.

    beliefs : (tile_b, NUM_POTS)
    pots    : (tile_b, NUM_POTS)
    wb      : (NUM_POTS, 2*HIDDEN)  block weights applied to beliefs
    wp      : (NUM_POTS, 2*HIDDEN)  block weights applied to pots
    b1      : (1, 2*HIDDEN)         [b1_unary ++ b1_pair]
    w2      : (1, 2*HIDDEN)         [w2_unary^T ++ w2_pair^T]   (row, VPU path)
    b2      : (1,) SMEM scalar      b2_unary + b2_pair
    out     : (tile_b, 1)
    """
    beliefs = beliefs_ref[...]
    pots = pots_ref[...]

    # --- fused unary/pair MLP, layer 1: two deep K=64 matmuls on the MXU ------
    h = (jnp.dot(beliefs, wb_ref[...], preferred_element_type=jnp.float32)
         + jnp.dot(pots, wp_ref[...], preferred_element_type=jnp.float32)
         + b1_ref[...])                                          # (TB, 2H)
    h = jnp.maximum(h, 0.0)

    # --- layer 2 of both MLPs (N=1) on the VPU, fused with the objective term -
    # obj + y_unary + y_pair = sum(beliefs*pots + relu(h) * w2_row, -1) + b2
    fused = beliefs * pots + h * w2_ref[...]                     # (TB, 64) VPU
    out_ref[...] = jnp.sum(fused, axis=-1, keepdims=True) + b2_ref[0]


def pack_split_tmodel_weights(w1u, b1u, w2u, b2u, w1p, b1p, w2p, b2p):
    """Pack the two concat-MLPs into block matrices (call ONCE per weight set).

      cat([b_u, p_u]) @ W1u == b_u @ W1u[:NU]  + p_u @ W1u[NU:]
      cat([b_p, p_p]) @ W1p == b_p @ W1p[:NP]  + p_p @ W1p[NP:]

    so layer 1 of both MLPs is beliefs @ wb + pots @ wp with zero-padded
    off-diagonal blocks, and layer 2 is a single (1, 2H) row.
    """
    wb = jnp.zeros((NUM_POTS, H2), jnp.float32)
    wb = wb.at[:NUM_UNARY, :HIDDEN].set(w1u[:NUM_UNARY])
    wb = wb.at[NUM_UNARY:, HIDDEN:].set(w1p[:NUM_PAIRPOT])
    wp = jnp.zeros((NUM_POTS, H2), jnp.float32)
    wp = wp.at[:NUM_UNARY, :HIDDEN].set(w1u[NUM_UNARY:])
    wp = wp.at[NUM_UNARY:, HIDDEN:].set(w1p[NUM_PAIRPOT:])
    b1c = jnp.concatenate([b1u, b1p]).reshape(1, H2)
    w2row = jnp.concatenate([w2u[:, 0], w2p[:, 0]]).reshape(1, H2)
    b2c = (b2u + b2p).reshape(1)                                 # 1-D SMEM scalar
    return wb, wp, b1c, w2row, b2c


@functools.partial(jax.jit, static_argnames=("tile_b",))
def split_tmodel_v2_forward(beliefs, pots, wb, wp, b1c, w2row, b2c, *,
                            tile_b=None):
    """SplitTModelV2.forward with use_unary=True, use_pair=True (packed weights)."""
    batch = beliefs.shape[0]
    if tile_b is None:
        tile_b = _choose_tile_b(batch)
    num_tiles = pl.cdiv(batch, tile_b)               # ragged tail handled by Pallas

    batch_spec = pl.BlockSpec((tile_b, NUM_POTS), lambda i: (i, 0))

    def const(shape):
        return pl.BlockSpec(shape, lambda i: (0, 0))  # VMEM-resident across grid

    out = pl.pallas_call(
        split_tmodel_kernel,
        out_shape=jax.ShapeDtypeStruct((batch, 1), jnp.float32),
        grid=(num_tiles,),
        in_specs=[
            batch_spec,                                          # beliefs
            batch_spec,                                          # pots
            const((NUM_POTS, H2)),                               # wb
            const((NUM_POTS, H2)),                               # wp
            const((1, H2)),                                      # b1
            const((1, H2)),                                      # w2 row
            pl.BlockSpec(memory_space=pltpu.MemorySpace.SMEM),   # b2 scalar
        ],
        out_specs=pl.BlockSpec((tile_b, 1), lambda i: (i, 0)),
        compiler_params=pltpu.CompilerParams(
            dimension_semantics=("parallel",)),
    )(beliefs, pots, wb, wp, b1c, w2row, b2c)

    return out[:, 0]                                             # .squeeze() -> (B,)


def reference_forward(beliefs, pots, w1u, b1u, w2u, b2u, w1p, b1p, w2p, b2p):
    """Pure-JAX mirror of the PyTorch SplitTModelV2.forward."""
    obj = jnp.sum(beliefs * pots, axis=1)
    unary_inp = jnp.concatenate(
        [beliefs[:, :NUM_UNARY], pots[:, :NUM_UNARY]], axis=1)
    hu = jnp.maximum(unary_inp @ w1u + b1u, 0.0)
    obj = obj + (hu @ w2u + b2u)[:, 0]
    pair_inp = jnp.concatenate(
        [beliefs[:, NUM_UNARY:], pots[:, NUM_UNARY:]], axis=1)
    hp = jnp.maximum(pair_inp @ w1p + b1p, 0.0)
    obj = obj + (hp @ w2p + b2p)[:, 0]
    return obj


if __name__ == "__main__":
    key = jax.random.PRNGKey(0)
    keys = jax.random.split(key, 10)

    # Deterministic synthetic t_model (2-layer MLP) parameters.
    w1u = jax.random.normal(keys[2], (2 * NUM_UNARY, HIDDEN), jnp.float32) * 0.1
    b1u = jax.random.normal(keys[3], (HIDDEN,), jnp.float32) * 0.1
    w2u = jax.random.normal(keys[4], (HIDDEN, 1), jnp.float32) * 0.1
    b2u = jax.random.normal(keys[5], (1,), jnp.float32) * 0.1
    w1p = jax.random.normal(keys[6], (2 * NUM_PAIRPOT, HIDDEN), jnp.float32) * 0.1
    b1p = jax.random.normal(keys[7], (HIDDEN,), jnp.float32) * 0.1
    w2p = jax.random.normal(keys[8], (HIDDEN, 1), jnp.float32) * 0.1
    b2p = jax.random.normal(keys[9], (1,), jnp.float32) * 0.1

    # Pack once (outside jit), reuse for every forward call.
    packed = pack_split_tmodel_weights(w1u, b1u, w2u, b2u, w1p, b1p, w2p, b2p)

    # Case 1: default tiling (whole batch in one resident tile).
    B1 = 1024
    beliefs = jax.random.normal(keys[0], (B1, NUM_POTS), dtype=jnp.float32)
    pots = jax.random.normal(keys[1], (B1, NUM_POTS), dtype=jnp.float32)
    out = jax.block_until_ready(split_tmodel_v2_forward(beliefs, pots, *packed))
    ref = reference_forward(beliefs, pots, w1u, b1u, w2u, b2u, w1p, b1p, w2p, b2p)
    np.testing.assert_allclose(np.asarray(out), np.asarray(ref),
                               rtol=1e-4, atol=1e-4)

    # Case 2: multi-tile grid with a ragged final block (no wrapper padding).
    B2 = 1000
    beliefs2 = beliefs[:B2]
    pots2 = pots[:B2]
    out2 = jax.block_until_ready(
        split_tmodel_v2_forward(beliefs2, pots2, *packed, tile_b=256))
    ref2 = reference_forward(beliefs2, pots2, w1u, b1u, w2u, b2u,
                             w1p, b1p, w2p, b2p)
    np.testing.assert_allclose(np.asarray(out2), np.asarray(ref2),
                               rtol=1e-4, atol=1e-4)

    print("KERNEL_OK")
</pallas_src>

<mosaic_0001>
module attributes {stable_mosaic.version = 11 : i64} {
  func.func @split_tmodel_kernel(%arg0: i32, %arg1: memref<1024x64xf32, #tpu.memory_space<vmem>>, %arg2: memref<1024x64xf32, #tpu.memory_space<vmem>>, %arg3: memref<64x64xf32, #tpu.memory_space<vmem>>, %arg4: memref<64x64xf32, #tpu.memory_space<vmem>>, %arg5: memref<1x64xf32, #tpu.memory_space<vmem>>, %arg6: memref<1x64xf32, #tpu.memory_space<vmem>>, %arg7: memref<1xf32, #tpu.memory_space<smem>>, %arg8: memref<1024x1xf32, #tpu.memory_space<vmem>>) attributes {dimension_semantics = [#tpu.dimension_semantics<parallel>], iteration_bounds = array<i64: 1>, scalar_prefetch = 0 : i64, scratch_operands = 0 : i64, tpu.core_type = #tpu.core_type<tc>, window_params = [{transform_indices = @transform_0, window_bounds = array<i64: 1024, 64>}, {transform_indices = @transform_1, window_bounds = array<i64: 1024, 64>}, {pipeline_mode = #tpu.pipeline_mode<synchronous>, transform_indices = @transform_2, window_bounds = array<i64: 64, 64>}, {pipeline_mode = #tpu.pipeline_mode<synchronous>, transform_indices = @transform_3, window_bounds = array<i64: 64, 64>}, {pipeline_mode = #tpu.pipeline_mode<synchronous>, transform_indices = @transform_4, window_bounds = array<i64: 1, 64>}, {pipeline_mode = #tpu.pipeline_mode<synchronous>, transform_indices = @transform_5, window_bounds = array<i64: 1, 64>}, {transform_indices = @transform_6, window_bounds = array<i64: 1>}, {transform_indices = @transform_7, window_bounds = array<i64: 1024, 1>}]} {
    %c0 = arith.constant 0 : index
    %c0_0 = arith.constant 0 : index
    %0 = vector.load %arg1[%c0, %c0_0] : memref<1024x64xf32, #tpu.memory_space<vmem>>, vector<1024x64xf32>
    %c0_1 = arith.constant 0 : index
    %c0_2 = arith.constant 0 : index
    %1 = vector.load %arg2[%c0_1, %c0_2] : memref<1024x64xf32, #tpu.memory_space<vmem>>, vector<1024x64xf32>
    %c0_3 = arith.constant 0 : index
    %c0_4 = arith.constant 0 : index
    %2 = vector.load %arg3[%c0_3, %c0_4] : memref<64x64xf32, #tpu.memory_space<vmem>>, vector<64x64xf32>
    %cst = arith.constant dense<0.000000e+00> : vector<1024x64xf32>
    %3 = tpu.matmul %0, %2, %cst {dimension_numbers = #tpu.dot_dimension_numbers<[1], [0], [0], [1], [0, 0, 1, 1], [], []>} : vector<1024x64xf32>, vector<64x64xf32>, vector<1024x64xf32> -> vector<1024x64xf32>
    %c0_5 = arith.constant 0 : index
    %c0_6 = arith.constant 0 : index
    %4 = vector.load %arg4[%c0_5, %c0_6] : memref<64x64xf32, #tpu.memory_space<vmem>>, vector<64x64xf32>
    %cst_7 = arith.constant dense<0.000000e+00> : vector<1024x64xf32>
    %5 = tpu.matmul %1, %4, %cst_7 {dimension_numbers = #tpu.dot_dimension_numbers<[1], [0], [0], [1], [0, 0, 1, 1], [], []>} : vector<1024x64xf32>, vector<64x64xf32>, vector<1024x64xf32> -> vector<1024x64xf32>
    %6 = arith.addf %3, %5 : vector<1024x64xf32>
    %c0_8 = arith.constant 0 : index
    %c0_9 = arith.constant 0 : index
    %7 = vector.load %arg5[%c0_8, %c0_9] : memref<1x64xf32, #tpu.memory_space<vmem>>, vector<1x64xf32>
    %8 = vector.broadcast %7 : vector<1x64xf32> to vector<1024x64xf32>
    %9 = arith.addf %6, %8 : vector<1024x64xf32>
    %cst_10 = arith.constant 0.000000e+00 : f32
    %10 = vector.broadcast %cst_10 : f32 to vector<1024x64xf32>
    %11 = arith.maximumf %9, %10 : vector<1024x64xf32>
    %12 = arith.mulf %0, %1 : vector<1024x64xf32>
    %c0_11 = arith.constant 0 : index
    %c0_12 = arith.constant 0 : index
    %13 = vector.load %arg6[%c0_11, %c0_12] : memref<1x64xf32, #tpu.memory_space<vmem>>, vector<1x64xf32>
    %14 = vector.broadcast %13 : vector<1x64xf32> to vector<1024x64xf32>
    %15 = arith.mulf %11, %14 : vector<1024x64xf32>
    %16 = arith.addf %12, %15 : vector<1024x64xf32>
    %cst_13 = arith.constant dense<0.000000e+00> : vector<1024xf32>
    %17 = vector.multi_reduction <add>, %16, %cst_13 [1] : vector<1024x64xf32> to vector<1024xf32>
    %18 = vector.shape_cast %17 : vector<1024xf32> to vector<1024x1xf32>
    %c0_14 = arith.constant 0 : index
    %19 = memref.load %arg7[%c0_14] : memref<1xf32, #tpu.memory_space<smem>>
    %20 = vector.broadcast %19 : f32 to vector<1024x1xf32>
    %21 = arith.addf %18, %20 : vector<1024x1xf32>
    %c0_15 = arith.constant 0 : index
    %c0_16 = arith.constant 0 : index
    %22 = vector.load %arg8[%c0_15, %c0_16] : memref<1024x1xf32, #tpu.memory_space<vmem>>, vector<1024x1xf32>
    tpu.vector_store %arg8[%c0_15, %c0_16], %21 {strides = array<i32>} : memref<1024x1xf32, #tpu.memory_space<vmem>>, vector<1024x1xf32>,
    return
  }
  func.func @transform_0(%arg0: i32) -> (i32, i32) {
    %c0_i32 = arith.constant 0 : i32
    %c0_i32_0 = arith.constant 0 : i32
    return %arg0, %c0_i32 : i32, i32
  }
  func.func @transform_1(%arg0: i32) -> (i32, i32) {
    %c0_i32 = arith.constant 0 : i32
    %c0_i32_0 = arith.constant 0 : i32
    return %arg0, %c0_i32 : i32, i32
  }
  func.func @transform_2(%arg0: i32) -> (i32, i32) {
    %c0_i32 = arith.constant 0 : i32
    %c0_i32_0 = arith.constant 0 : i32
    %c0_i32_1 = arith.constant 0 : i32
    return %c0_i32, %c0_i32_0 : i32, i32
  }
  func.func @transform_3(%arg0: i32) -> (i32, i32) {
    %c0_i32 = arith.constant 0 : i32
    %c0_i32_0 = arith.constant 0 : i32
    %c0_i32_1 = arith.constant 0 : i32
    return %c0_i32, %c0_i32_0 : i32, i32
  }
  func.func @transform_4(%arg0: i32) -> (i32, i32) {
    %c0_i32 = arith.constant 0 : i32
    %c0_i32_0 = arith.constant 0 : i32
    %c0_i32_1 = arith.constant 0 : i32
    return %c0_i32, %c0_i32_0 : i32, i32
  }
  func.func @transform_5(%arg0: i32) -> (i32, i32) {
    %c0_i32 = arith.constant 0 : i32
    %c0_i32_0 = arith.constant 0 : i32
    %c0_i32_1 = arith.constant 0 : i32
    return %c0_i32, %c0_i32_0 : i32, i32
  }
  func.func @transform_6(%arg0: i32) -> i32 {
    %c0_i32 = arith.constant 0 : i32
    %c0_i32_0 = arith.constant 0 : i32
    return %c0_i32 : i32
  }
  func.func @transform_7(%arg0: i32) -> (i32, i32) {
    %c0_i32 = arith.constant 0 : i32
    %c0_i32_0 = arith.constant 0 : i32
    return %arg0, %c0_i32 : i32, i32
  }
}

</mosaic_0001>

<bundles_post_ra>
// kernel: split_tmodel_v2_forward.1
= control target key start
LH: loop header
LB: loop body
LE: loop exit
PB: predicated region body
PF: predicated region fallthrough
CT: control target
= control target key end

     0   :  { %vm299_vm0 = vcmask 523264   ;;  %vm3646_vm1 = vcmask 7168   ;;  %s8088_s3 = inlined_call_operand.vmem [shape: f32[64,64], index: 3, kind: input, shape index: {}]   ;;  %s8089_s2 = inlined_call_operand.vmem [shape: f32[64,64], index: 2, kind: input, shape index: {}]   ;;  %s8090_s1 = inlined_call_operand.vmem [shape: f32[1024,64], index: 1, kind: input, shape index: {}]   ;;  %s8091_s0 = inlined_call_operand.vmem [shape: f32[1024,64], index: 0, kind: input, shape index: {}]   ;;  %s8092_s4 = inlined_call_operand.vmem [shape: f32[1,64], index: 4, kind: input, shape index: {}]   ;;  %s8093_s5 = inlined_call_operand.vmem [shape: f32[1,64], index: 5, kind: input, shape index: {}]   ;;  %s8094_s6 = inlined_call_operand.<no memory space> [shape: f32[1], index: 6, kind: input, shape index: {}]   ;;  %s8095_s7 = inlined_call_operand.vmem [shape: f32[1024,1], index: 7, kind: output, shape index: {}]  }
   0x1   :  { %v291_v0 = vld [vmem:[%s8088_s3] sm:$0xff]  ;;  %v292_v1 = vld [vmem:[%s8088_s3 + $0x8] sm:$0xff]  ;;  %v293_v5 = vld [vmem:[%s8088_s3 + $0x10] sm:$0xff] }
   0x2   :  { %v283_v2 = vld [vmem:[%s8089_s2] sm:$0xff]  ;;  %v4725_v3 = vpack.c.bf16 %v292_v1, %v291_v0  ;;  %v284_v4 = vld [vmem:[%s8089_s2 + $0x8] sm:$0xff]  ;;  %v294_v6 = vld [vmem:[%s8088_s3 + $0x18] sm:$0xff] }
   0x3   :  { %v4741_v7 = vpack.c.bf16 %v284_v4, %v283_v2  ;;  %v4729_v8 = vpack.c.bf16 %v294_v6, %v293_v5  ;;  %v285_v9 = vld [vmem:[%s8089_s2 + $0x10] sm:$0xff]  ;;  %v286_v10 = vld [vmem:[%s8089_s2 + $0x18] sm:$0xff]  ;;  %v295_v11 = vld [vmem:[%s8088_s3 + $0x20] sm:$0xff] }
   0x4   :  { %4726 = vmatprep.subr.bf16.mxu1 %v4725_v3  ;;  %v4745_v12 = vpack.c.bf16 %v286_v10, %v285_v9  ;;  %v296_v13 = vld [vmem:[%s8088_s3 + $0x28] sm:$0xff]  ;;  %v287_v14 = vld [vmem:[%s8089_s2 + $0x20] sm:$0xff]  ;;  %v297_v20 = vld [vmem:[%s8088_s3 + $0x30] sm:$0xff] }
   0x5   :  { %v288_v15 = vld [vmem:[%s8089_s2 + $0x28] sm:$0xff]  ;;  %4742 = vmatprep.subr.bf16.mxu0 %v4741_v7  ;;  %4728 = vmatpush3.bf16.msra.mxu1 %v4725_v3  ;;  %v4733_v16 = vpack.c.bf16 %v296_v13, %v295_v11  ;;  %v155_v17 = vld [vmem:[%s8090_s1] sm:$0xff]  ;;  %v298_v21 = vld [vmem:[%s8088_s3 + $0x38] sm:$0xff] }
   0x6   :  { %4744 = vmatpush3.bf16.msra.mxu0 %v4741_v7  ;;  %4730 = vmatprep.subr.bf16.mxu1 %v4729_v8  ;;  %v27_v18 = vld [vmem:[%s8091_s0] sm:$0xff]  ;;  %v4749_v19 = vpack.c.bf16 %v288_v15, %v287_v14  ;;  %v289_v23 = vld [vmem:[%s8089_s2 + $0x30] sm:$0xff]  ;;  %v290_v24 = vld [vmem:[%s8089_s2 + $0x38] sm:$0xff]  ;;  %v4737_v25 = vpack.c.bf16 %v298_v21, %v297_v20 }
   0x7   :  { %4746 = vmatprep.subr.bf16.mxu0 %v4745_v12  ;;  %4325 = vmatprep.mubr.msk.f32.mxu1 %vm299_vm0, %v155_v17  ;;  %v5220_v22 = vmul.f32 %v155_v17, %v27_v18  ;;  %v4753_v26 = vpack.c.bf16 %v290_v24, %v289_v23  ;;  %v5232_v27 = vld [vmem:[%s8090_s1 + $0x8] sm:$0xff]  ;;  %v5242_v29 = vld [vmem:[%s8090_s1 + $0x10] sm:$0xff]  ;;  %v5258_v31 = vld [vmem:[%s8090_s1 + $0x18] sm:$0xff] }
   0x8   :  { %4533 = vmatprep.mubr.msk.f32.mxu0 %vm299_vm0, %v27_v18  ;;  %v5237_v28 = vld [vmem:[%s8091_s0 + $0x8] sm:$0xff]  ;;  %v5247_v30 = vld [vmem:[%s8091_s0 + $0x10] sm:$0xff]  ;;  %v5265_v32 = vld [vmem:[%s8091_s0 + $0x18] sm:$0xff] }
   0x9   :  { %4732 = vmatpush3.bf16.msra.mxu1 %v4729_v8  ;;  %v5270_v33 = vld [vmem:[%s8090_s1 + $0x20] sm:$0xff]  ;;  %v5286_v35 = vld [vmem:[%s8090_s1 + $0x28] sm:$0xff]  ;;  %v161_v37 = vld [vmem:[%s8090_s1 + $0x30] sm:$0xff] }
   0xa   :  { %4748 = vmatpush3.bf16.msra.mxu0 %v4745_v12  ;;  %4734 = vmatprep.subr.bf16.mxu1 %v4733_v16  ;;  %v5275_v34 = vld [vmem:[%s8091_s0 + $0x20] sm:$0xff]  ;;  %v5293_v36 = vld [vmem:[%s8091_s0 + $0x28] sm:$0xff]  ;;  %v33_v38 = vld [vmem:[%s8091_s0 + $0x30] sm:$0xff] }
   0xb   :  { %4750 = vmatprep.subr.bf16.mxu0 %v4749_v19  ;;  %v5309_v39 = vld [vmem:[%s8090_s1 + $0x38] sm:$0xff]  ;;  %v163_v41 = vld [vmem:[%s8090_s1 + $0x40] sm:$0xff]  ;;  %v164_v43 = vld [vmem:[%s8090_s1 + $0x48] sm:$0xff] }
   0xc   :  { %v5315_v40 = vld [vmem:[%s8091_s0 + $0x38] sm:$0xff]  ;;  %v35_v42 = vld [vmem:[%s8091_s0 + $0x40] sm:$0xff]  ;;  %v36_v44 = vld [vmem:[%s8091_s0 + $0x48] sm:$0xff] }
   0xd   :  { %4736 = vmatpush3.bf16.msra.mxu1 %v4733_v16  ;;  %v165_v45 = vld [vmem:[%s8090_s1 + $0x50] sm:$0xff]  ;;  %v166_v47 = vld [vmem:[%s8090_s1 + $0x58] sm:$0xff]  ;;  %v167_v49 = vld [vmem:[%s8090_s1 + $0x60] sm:$0xff] }
   0xe   :  { %4752 = vmatpush3.bf16.msra.mxu0 %v4749_v19  ;;  %4738 = vmatprep.subr.bf16.mxu1 %v4737_v25  ;;  %v37_v46 = vld [vmem:[%s8091_s0 + $0x50] sm:$0xff]  ;;  %v38_v48 = vld [vmem:[%s8091_s0 + $0x58] sm:$0xff]  ;;  %v39_v50 = vld [vmem:[%s8091_s0 + $0x60] sm:$0xff] }
   0xf   :  { %4754 = vmatprep.subr.bf16.mxu0 %v4753_v26  ;;  %v168_v51 = vld [vmem:[%s8090_s1 + $0x68] sm:$0xff]  ;;  %v169_v53 = vld [vmem:[%s8090_s1 + $0x70] sm:$0xff]  ;;  %v170_v55 = vld [vmem:[%s8090_s1 + $0x78] sm:$0xff] }
  0x10   :  { %v40_v52 = vld [vmem:[%s8091_s0 + $0x68] sm:$0xff]  ;;  %v41_v54 = vld [vmem:[%s8091_s0 + $0x70] sm:$0xff]  ;;  %v42_v56 = vld [vmem:[%s8091_s0 + $0x78] sm:$0xff] }
  0x11   :  { %4740 = vmatpush3.bf16.msra.mxu1 %v4737_v25  ;;  %v171_v57 = vld [vmem:[%s8090_s1 + $0x80] sm:$0xff]  ;;  %v172_v59 = vld [vmem:[%s8090_s1 + $0x88] sm:$0xff]  ;;  %v173_v61 = vld [vmem:[%s8090_s1 + $0x90] sm:$0xff] }
  0x12   :  { %4756 = vmatpush3.bf16.msra.mxu0 %v4753_v26  ;;  %v43_v58 = vld [vmem:[%s8091_s0 + $0x80] sm:$0xff]  ;;  %v44_v60 = vld [vmem:[%s8091_s0 + $0x88] sm:$0xff]  ;;  %v45_v62 = vld [vmem:[%s8091_s0 + $0x90] sm:$0xff] }
  0x13   :  { %v174_v63 = vld [vmem:[%s8090_s1 + $0x98] sm:$0xff]  ;;  %v175_v1 = vld [vmem:[%s8090_s1 + $0xa0] sm:$0xff]  ;;  %v176_v3 = vld [vmem:[%s8090_s1 + $0xa8] sm:$0xff] }
  0x14   :  { %4326 = vmatmul.mubr.msk.f32.vlgmr.msra.gmra.mrb[0].mxu1 %vm299_vm0, %v5232_v27  ;;  %v46_v0 = vld [vmem:[%s8091_s0 + $0x98] sm:$0xff]  ;;  %v47_v2 = vld [vmem:[%s8091_s0 + $0xa0] sm:$0xff]  ;;  %v48_v4 = vld [vmem:[%s8091_s0 + $0xa8] sm:$0xff] }
  0x15   :  { %4534 = vmatmul.mubr.msk.f32.vlgmr.msra.gmra.mrb[0].mxu0 %vm299_vm0, %v5237_v28  ;;  %4328 = vmatprep.mubr.msk.f32.mxu1 %vm299_vm0, %v5242_v29  ;;  %v177_v5 = vld [vmem:[%s8090_s1 + $0xb0] sm:$0xff]  ;;  %v178_v7 = vld [vmem:[%s8090_s1 + $0xb8] sm:$0xff]  ;;  %v179_v9 = vld [vmem:[%s8090_s1 + $0xc0] sm:$0xff] }
  0x16   :  { %4536 = vmatprep.mubr.msk.f32.mxu0 %vm299_vm0, %v5247_v30  ;;  %v49_v6 = vld [vmem:[%s8091_s0 + $0xb0] sm:$0xff]  ;;  %v50_v8 = vld [vmem:[%s8091_s0 + $0xb8] sm:$0xff]  ;;  %v51_v10 = vld [vmem:[%s8091_s0 + $0xc0] sm:$0xff] }
  0x17   :  { %v180_v11 = vld [vmem:[%s8090_s1 + $0xc8] sm:$0xff]  ;;  %v181_v13 = vld [vmem:[%s8090_s1 + $0xd0] sm:$0xff]  ;;  %v182_v15 = vld [vmem:[%s8090_s1 + $0xd8] sm:$0xff] }
  0x18   :  { %4329 = vmatmul.mubr.msk.f32.gmra.mrb[2].mxu1 %vm299_vm0, %v5258_v31  ;;  %v52_v12 = vld [vmem:[%s8091_s0 + $0xc8] sm:$0xff]  ;;  %v53_v14 = vld [vmem:[%s8091_s0 + $0xd0] sm:$0xff]  ;;  %v54_v16 = vld [vmem:[%s8091_s0 + $0xd8] sm:$0xff] }
  0x19   :  { %4537 = vmatmul.mubr.msk.f32.gmra.mrb[2].mxu0 %vm299_vm0, %v5265_v32  ;;  %4331 = vmatprep.mubr.msk.f32.mxu1 %vm299_vm0, %v5270_v33  ;;  %v183_v17 = vld [vmem:[%s8090_s1 + $0xe0] sm:$0xff]  ;;  %v184_v19 = vld [vmem:[%s8090_s1 + $0xe8] sm:$0xff]  ;;  %v185_v21 = vld [vmem:[%s8090_s1 + $0xf0] sm:$0xff] }
  0x1a   :  { %4539 = vmatprep.mubr.msk.f32.mxu0 %vm299_vm0, %v5275_v34  ;;  %v55_v18 = vld [vmem:[%s8091_s0 + $0xe0] sm:$0xff]  ;;  %v56_v20 = vld [vmem:[%s8091_s0 + $0xe8] sm:$0xff]  ;;  %v57_v23 = vld [vmem:[%s8091_s0 + $0xf0] sm:$0xff] }
  0x1b   :  { %v186_v24 = vld [vmem:[%s8090_s1 + $0xf8] sm:$0xff]  ;;  %v187_v26 = vld [vmem:[%s8090_s1 + $0x100] sm:$0xff] }
  0x1c   :  { %4332 = vmatmul.mubr.msk.f32.gmra.mrb[4].mxu1 %vm299_vm0, %v5286_v35  ;;  %v58_v25 = vld [vmem:[%s8091_s0 + $0xf8] sm:$0xff] }
  0x1d   :  { %4540 = vmatmul.mubr.msk.f32.gmra.mrb[4].mxu0 %vm299_vm0, %v5293_v36  ;;  %4334 = vmatprep.mubr.msk.f32.mxu1 %vm299_vm0, %v161_v37  ;;  %v59_v37 = vld [vmem:[%s8091_s0 + $0x100] sm:$0xff] }
  0x1e   :  { %4542 = vmatprep.mubr.msk.f32.mxu0 %vm299_vm0, %v33_v38  ;;  %v188_v38 = vld [vmem:[%s8090_s1 + $0x108] sm:$0xff] }
  0x20   :  { %4335 = vmatmul.mubr.msk.f32.gmra.mrb[6].mxu1 %vm299_vm0, %v5309_v39 }
  0x21   :  { %4543 = vmatmul.mubr.msk.f32.gmra.mrb[6].mxu0 %vm299_vm0, %v5315_v40  ;;  %4337 = vmatprep.mubr.msk.f32.mxu1 %vm299_vm0, %v163_v41  ;;  %v60_v41 = vld [vmem:[%s8091_s0 + $0x108] sm:$0xff] }
  0x22   :  { %4545 = vmatprep.mubr.msk.f32.mxu0 %vm299_vm0, %v35_v42  ;;  %v189_v42 = vld [vmem:[%s8090_s1 + $0x110] sm:$0xff] }
  0x24   :  { %4338 = vmatmul.mubr.msk.f32.gmra.mrb[8].mxu1 %vm299_vm0, %v164_v43  ;;  %v61_v43 = vld [vmem:[%s8091_s0 + $0x110] sm:$0xff] }
  0x25   :  { %4546 = vmatmul.mubr.msk.f32.gmra.mrb[8].mxu0 %vm299_vm0, %v36_v44  ;;  %4340 = vmatprep.mubr.msk.f32.mxu1 %vm299_vm0, %v165_v45  ;;  %v190_v44 = vld [vmem:[%s8090_s1 + $0x118] sm:$0xff] }
  0x26   :  { %4548 = vmatprep.mubr.msk.f32.mxu0 %vm299_vm0, %v37_v46  ;;  %v62_v45 = vld [vmem:[%s8091_s0 + $0x118] sm:$0xff]  ;;  %v191_v46 = vld [vmem:[%s8090_s1 + $0x120] sm:$0xff] }
  0x28   :  { %4341 = vmatmul.mubr.msk.f32.gmra.mrb[10].mxu1 %vm299_vm0, %v166_v47  ;;  %v63_v47 = vld [vmem:[%s8091_s0 + $0x120] sm:$0xff] }
  0x29   :  { %4549 = vmatmul.mubr.msk.f32.gmra.mrb[10].mxu0 %vm299_vm0, %v38_v48  ;;  %4343 = vmatprep.mubr.msk.f32.mxu1 %vm299_vm0, %v167_v49  ;;  %v192_v48 = vld [vmem:[%s8090_s1 + $0x128] sm:$0xff] }
  0x2a   :  { %4551 = vmatprep.mubr.msk.f32.mxu0 %vm299_vm0, %v39_v50  ;;  %v64_v49 = vld [vmem:[%s8091_s0 + $0x128] sm:$0xff]  ;;  %v193_v50 = vld [vmem:[%s8090_s1 + $0x130] sm:$0xff] }
  0x2c   :  { %4344 = vmatmul.mubr.msk.f32.gmra.mrb[12].mxu1 %vm299_vm0, %v168_v51  ;;  %v65_v51 = vld [vmem:[%s8091_s0 + $0x130] sm:$0xff] }
  0x2d   :  { %4552 = vmatmul.mubr.msk.f32.gmra.mrb[12].mxu0 %vm299_vm0, %v40_v52  ;;  %4346 = vmatprep.mubr.msk.f32.mxu1 %vm299_vm0, %v169_v53  ;;  %v194_v52 = vld [vmem:[%s8090_s1 + $0x138] sm:$0xff] }
  0x2e   :  { %4554 = vmatprep.mubr.msk.f32.mxu0 %vm299_vm0, %v41_v54  ;;  %v66_v53 = vld [vmem:[%s8091_s0 + $0x138] sm:$0xff]  ;;  %v195_v54 = vld [vmem:[%s8090_s1 + $0x140] sm:$0xff] }
  0x30   :  { %4347 = vmatmul.mubr.msk.f32.gmra.mrb[14].mxu1 %vm299_vm0, %v170_v55  ;;  %v67_v55 = vld [vmem:[%s8091_s0 + $0x140] sm:$0xff] }
  0x31   :  { %4555 = vmatmul.mubr.msk.f32.gmra.mrb[14].mxu0 %vm299_vm0, %v42_v56  ;;  %4349 = vmatprep.mubr.msk.f32.mxu1 %vm299_vm0, %v171_v57  ;;  %v196_v56 = vld [vmem:[%s8090_s1 + $0x148] sm:$0xff] }
  0x32   :  { %4557 = vmatprep.mubr.msk.f32.mxu0 %vm299_vm0, %v43_v58  ;;  %v68_v57 = vld [vmem:[%s8091_s0 + $0x148] sm:$0xff]  ;;  %v197_v58 = vld [vmem:[%s8090_s1 + $0x150] sm:$0xff] }
  0x34   :  { %4350 = vmatmul.mubr.msk.f32.gmra.mrb[16].mxu1 %vm299_vm0, %v172_v59  ;;  %v69_v59 = vld [vmem:[%s8091_s0 + $0x150] sm:$0xff] }
  0x35   :  { %4558 = vmatmul.mubr.msk.f32.gmra.mrb[16].mxu0 %vm299_vm0, %v44_v60  ;;  %4352 = vmatprep.mubr.msk.f32.mxu1 %vm299_vm0, %v173_v61  ;;  %v198_v60 = vld [vmem:[%s8090_s1 + $0x158] sm:$0xff] }
  0x36   :  { %4560 = vmatprep.mubr.msk.f32.mxu0 %vm299_vm0, %v45_v62  ;;  %v70_v61 = vld [vmem:[%s8091_s0 + $0x158] sm:$0xff]  ;;  %v199_v62 = vld [vmem:[%s8090_s1 + $0x160] sm:$0xff] }
  0x38   :  { %4353 = vmatmul.mubr.msk.f32.gmra.mrb[18].mxu1 %vm299_vm0, %v174_v63  ;;  %v71_v63 = vld [vmem:[%s8091_s0 + $0x160] sm:$0xff] }
  0x39   :  { %4561 = vmatmul.mubr.msk.f32.gmra.mrb[18].mxu0 %vm299_vm0, %v46_v0  ;;  %4355 = vmatprep.mubr.msk.f32.mxu1 %vm299_vm0, %v175_v1  ;;  %v200_v0 = vld [vmem:[%s8090_s1 + $0x168] sm:$0xff] }
  0x3a   :  { %4563 = vmatprep.mubr.msk.f32.mxu0 %vm299_vm0, %v47_v2  ;;  %v72_v1 = vld [vmem:[%s8091_s0 + $0x168] sm:$0xff]  ;;  %v201_v2 = vld [vmem:[%s8090_s1 + $0x170] sm:$0xff] }
  0x3c   :  { %4356 = vmatmul.mubr.msk.f32.gmra.mrb[20].mxu1 %vm299_vm0, %v176_v3  ;;  %v73_v3 = vld [vmem:[%s8091_s0 + $0x170] sm:$0xff] }
  0x3d   :  { %4564 = vmatmul.mubr.msk.f32.gmra.mrb[20].mxu0 %vm299_vm0, %v48_v4  ;;  %4358 = vmatprep.mubr.msk.f32.mxu1 %vm299_vm0, %v177_v5  ;;  %v202_v4 = vld [vmem:[%s8090_s1 + $0x178] sm:$0xff] }
  0x3e   :  { %4566 = vmatprep.mubr.msk.f32.mxu0 %vm299_vm0, %v49_v6  ;;  %v74_v5 = vld [vmem:[%s8091_s0 + $0x178] sm:$0xff]  ;;  %v203_v6 = vld [vmem:[%s8090_s1 + $0x180] sm:$0xff] }
  0x40   :  { %4359 = vmatmul.mubr.msk.f32.gmra.mrb[22].mxu1 %vm299_vm0, %v178_v7  ;;  %v75_v7 = vld [vmem:[%s8091_s0 + $0x180] sm:$0xff] }
  0x41   :  { %4567 = vmatmul.mubr.msk.f32.gmra.mrb[22].mxu0 %vm299_vm0, %v50_v8  ;;  %4361 = vmatprep.mubr.msk.f32.mxu1 %vm299_vm0, %v179_v9  ;;  %v204_v8 = vld [vmem:[%s8090_s1 + $0x188] sm:$0xff] }
  0x42   :  { %4569 = vmatprep.mubr.msk.f32.mxu0 %vm299_vm0, %v51_v10  ;;  %v76_v9 = vld [vmem:[%s8091_s0 + $0x188] sm:$0xff]  ;;  %v205_v10 = vld [vmem:[%s8090_s1 + $0x190] sm:$0xff] }
  0x44   :  { %4362 = vmatmul.mubr.msk.f32.gmra.mrb[24].mxu1 %vm299_vm0, %v180_v11  ;;  %v77_v11 = vld [vmem:[%s8091_s0 + $0x190] sm:$0xff] }
  0x45   :  { %4570 = vmatmul.mubr.msk.f32.gmra.mrb[24].mxu0 %vm299_vm0, %v52_v12  ;;  %4364 = vmatprep.mubr.msk.f32.mxu1 %vm299_vm0, %v181_v13  ;;  %v206_v12 = vld [vmem:[%s8090_s1 + $0x198] sm:$0xff] }
  0x46   :  { %4572 = vmatprep.mubr.msk.f32.mxu0 %vm299_vm0, %v53_v14  ;;  %v78_v13 = vld [vmem:[%s8091_s0 + $0x198] sm:$0xff]  ;;  %v207_v14 = vld [vmem:[%s8090_s1 + $0x1a0] sm:$0xff] }
  0x48   :  { %4365 = vmatmul.mubr.msk.f32.gmra.mrb[26].mxu1 %vm299_vm0, %v182_v15  ;;  %v79_v15 = vld [vmem:[%s8091_s0 + $0x1a0] sm:$0xff] }
  0x49   :  { %4573 = vmatmul.mubr.msk.f32.gmra.mrb[26].mxu0 %vm299_vm0, %v54_v16  ;;  %4367 = vmatprep.mubr.msk.f32.mxu1 %vm299_vm0, %v183_v17  ;;  %v208_v16 = vld [vmem:[%s8090_s1 + $0x1a8] sm:$0xff] }
  0x4a   :  { %4575 = vmatprep.mubr.msk.f32.mxu0 %vm299_vm0, %v55_v18  ;;  %v80_v17 = vld [vmem:[%s8091_s0 + $0x1a8] sm:$0xff]  ;;  %v209_v18 = vld [vmem:[%s8090_s1 + $0x1b0] sm:$0xff] }
  0x4c   :  { %4368 = vmatmul.mubr.msk.f32.gmra.mrb[28].mxu1 %vm299_vm0, %v184_v19  ;;  %v81_v19 = vld [vmem:[%s8091_s0 + $0x1b0] sm:$0xff] }
  0x4d   :  { %4576 = vmatmul.mubr.msk.f32.gmra.mrb[28].mxu0 %vm299_vm0, %v56_v20  ;;  %4370 = vmatprep.mubr.msk.f32.mxu1 %vm299_vm0, %v185_v21  ;;  %v210_v20 = vld [vmem:[%s8090_s1 + $0x1b8] sm:$0xff] }
  0x4e   :  { %4578 = vmatprep.mubr.msk.f32.mxu0 %vm299_vm0, %v57_v23  ;;  %v82_v21 = vld [vmem:[%s8091_s0 + $0x1b8] sm:$0xff]  ;;  %v211_v23 = vld [vmem:[%s8090_s1 + $0x1c0] sm:$0xff] }
  0x50   :  { %4371 = vmatmul.mubr.msk.f32.gmra.mrb[30].mxu1 %vm299_vm0, %v186_v24  ;;  %v83_v24 = vld [vmem:[%s8091_s0 + $0x1c0] sm:$0xff] }
  0x51   :  { %4579 = vmatmul.mubr.msk.f32.gmra.mrb[30].mxu0 %vm299_vm0, %v58_v25  ;;  %4373 = vmatprep.mubr.msk.f32.mxu1 %vm299_vm0, %v187_v26  ;;  %v212_v25 = vld [vmem:[%s8090_s1 + $0x1c8] sm:$0xff] }
  0x52   :  { %4581 = vmatprep.mubr.msk.f32.mxu0 %vm299_vm0, %v59_v37  ;;  %v84_v26 = vld [vmem:[%s8091_s0 + $0x1c8] sm:$0xff]  ;;  %v213_v37 = vld [vmem:[%s8090_s1 + $0x1d0] sm:$0xff] }
  0x54   :  { %4374 = vmatmul.mubr.msk.f32.gmra.mrb[32].mxu1 %vm299_vm0, %v188_v38  ;;  %v85_v38 = vld [vmem:[%s8091_s0 + $0x1d0] sm:$0xff] }
  0x55   :  { %4582 = vmatmul.mubr.msk.f32.gmra.mrb[32].mxu0 %vm299_vm0, %v60_v41  ;;  %4376 = vmatprep.mubr.msk.f32.mxu1 %vm299_vm0, %v189_v42  ;;  %v214_v41 = vld [vmem:[%s8090_s1 + $0x1d8] sm:$0xff] }
  0x56   :  { %4584 = vmatprep.mubr.msk.f32.mxu0 %vm299_vm0, %v61_v43  ;;  %v86_v42 = vld [vmem:[%s8091_s0 + $0x1d8] sm:$0xff]  ;;  %v215_v43 = vld [vmem:[%s8090_s1 + $0x1e0] sm:$0xff] }
  0x58   :  { %4377 = vmatmul.mubr.msk.f32.gmra.mrb[34].mxu1 %vm299_vm0, %v190_v44  ;;  %v87_v44 = vld [vmem:[%s8091_s0 + $0x1e0] sm:$0xff] }
  0x59   :  { %4585 = vmatmul.mubr.msk.f32.gmra.mrb[34].mxu0 %vm299_vm0, %v62_v45  ;;  %4379 = vmatprep.mubr.msk.f32.mxu1 %vm299_vm0, %v191_v46  ;;  %v216_v45 = vld [vmem:[%s8090_s1 + $0x1e8] sm:$0xff] }
  0x5a   :  { %4587 = vmatprep.mubr.msk.f32.mxu0 %vm299_vm0, %v63_v47  ;;  %v88_v46 = vld [vmem:[%s8091_s0 + $0x1e8] sm:$0xff]  ;;  %v217_v47 = vld [vmem:[%s8090_s1 + $0x1f0] sm:$0xff] }
  0x5c   :  { %4380 = vmatmul.mubr.msk.f32.gmra.mrb[36].mxu1 %vm299_vm0, %v192_v48  ;;  %v89_v48 = vld [vmem:[%s8091_s0 + $0x1f0] sm:$0xff] }
  0x5d   :  { %4588 = vmatmul.mubr.msk.f32.gmra.mrb[36].mxu0 %vm299_vm0, %v64_v49  ;;  %4382 = vmatprep.mubr.msk.f32.mxu1 %vm299_vm0, %v193_v50  ;;  %v218_v49 = vld [vmem:[%s8090_s1 + $0x1f8] sm:$0xff] }
  0x5e   :  { %4590 = vmatprep.mubr.msk.f32.mxu0 %vm299_vm0, %v65_v51  ;;  %v90_v50 = vld [vmem:[%s8091_s0 + $0x1f8] sm:$0xff]  ;;  %v219_v51 = vld [vmem:[%s8090_s1 + $0x200] sm:$0xff] }
  0x60   :  { %4383 = vmatmul.mubr.msk.f32.gmra.mrb[38].mxu1 %vm299_vm0, %v194_v52  ;;  %v91_v52 = vld [vmem:[%s8091_s0 + $0x200] sm:$0xff] }
  0x61   :  { %4591 = vmatmul.mubr.msk.f32.gmra.mrb[38].mxu0 %vm299_vm0, %v66_v53  ;;  %4385 = vmatprep.mubr.msk.f32.mxu1 %vm299_vm0, %v195_v54  ;;  %v220_v53 = vld [vmem:[%s8090_s1 + $0x208] sm:$0xff] }
  0x62   :  { %4593 = vmatprep.mubr.msk.f32.mxu0 %vm299_vm0, %v67_v55  ;;  %v92_v54 = vld [vmem:[%s8091_s0 + $0x208] sm:$0xff]  ;;  %v221_v55 = vld [vmem:[%s8090_s1 + $0x210] sm:$0xff] }
  0x64   :  { %4386 = vmatmul.mubr.msk.f32.gmra.mrb[40].mxu1 %vm299_vm0, %v196_v56  ;;  %v93_v56 = vld [vmem:[%s8091_s0 + $0x210] sm:$0xff] }
  0x65   :  { %4594 = vmatmul.mubr.msk.f32.gmra.mrb[40].mxu0 %vm299_vm0, %v68_v57  ;;  %4388 = vmatprep.mubr.msk.f32.mxu1 %vm299_vm0, %v197_v58  ;;  %v222_v57 = vld [vmem:[%s8090_s1 + $0x218] sm:$0xff] }
  0x66   :  { %4596 = vmatprep.mubr.msk.f32.mxu0 %vm299_vm0, %v69_v59  ;;  %v94_v58 = vld [vmem:[%s8091_s0 + $0x218] sm:$0xff]  ;;  %v223_v59 = vld [vmem:[%s8090_s1 + $0x220] sm:$0xff] }
  0x68   :  { %4389 = vmatmul.mubr.msk.f32.gmra.mrb[42].mxu1 %vm299_vm0, %v198_v60  ;;  %v95_v60 = vld [vmem:[%s8091_s0 + $0x220] sm:$0xff] }
  0x69   :  { %4597 = vmatmul.mubr.msk.f32.gmra.mrb[42].mxu0 %vm299_vm0, %v70_v61  ;;  %4391 = vmatprep.mubr.msk.f32.mxu1 %vm299_vm0, %v199_v62  ;;  %v224_v61 = vld [vmem:[%s8090_s1 + $0x228] sm:$0xff] }
  0x6a   :  { %4599 = vmatprep.mubr.msk.f32.mxu0 %vm299_vm0, %v71_v63  ;;  %v96_v62 = vld [vmem:[%s8091_s0 + $0x228] sm:$0xff]  ;;  %v225_v63 = vld [vmem:[%s8090_s1 + $0x230] sm:$0xff] }
  0x6c   :  { %4392 = vmatmul.mubr.msk.f32.gmra.mrb[44].mxu1 %vm299_vm0, %v200_v0  ;;  %v97_v0 = vld [vmem:[%s8091_s0 + $0x230] sm:$0xff] }
  0x6d   :  { %4600 = vmatmul.mubr.msk.f32.gmra.mrb[44].mxu0 %vm299_vm0, %v72_v1  ;;  %4394 = vmatprep.mubr.msk.f32.mxu1 %vm299_vm0, %v201_v2  ;;  %v226_v1 = vld [vmem:[%s8090_s1 + $0x238] sm:$0xff] }
  0x6e   :  { %4602 = vmatprep.mubr.msk.f32.mxu0 %vm299_vm0, %v73_v3  ;;  %v98_v2 = vld [vmem:[%s8091_s0 + $0x238] sm:$0xff]  ;;  %v227_v3 = vld [vmem:[%s8090_s1 + $0x240] sm:$0xff] }
  0x70   :  { %4395 = vmatmul.mubr.msk.f32.gmra.mrb[46].mxu1 %vm299_vm0, %v202_v4  ;;  %v99_v4 = vld [vmem:[%s8091_s0 + $0x240] sm:$0xff] }
  0x71   :  { %4603 = vmatmul.mubr.msk.f32.gmra.mrb[46].mxu0 %vm299_vm0, %v74_v5  ;;  %4397 = vmatprep.mubr.msk.f32.mxu1 %vm299_vm0, %v203_v6  ;;  %v228_v5 = vld [vmem:[%s8090_s1 + $0x248] sm:$0xff] }
  0x72   :  { %4605 = vmatprep.mubr.msk.f32.mxu0 %vm299_vm0, %v75_v7  ;;  %v100_v6 = vld [vmem:[%s8091_s0 + $0x248] sm:$0xff]  ;;  %v229_v7 = vld [vmem:[%s8090_s1 + $0x250] sm:$0xff] }
  0x74   :  { %4398 = vmatmul.mubr.msk.f32.gmra.mrb[48].mxu1 %vm299_vm0, %v204_v8  ;;  %v101_v8 = vld [vmem:[%s8091_s0 + $0x250] sm:$0xff] }
  0x75   :  { %4606 = vmatmul.mubr.msk.f32.gmra.mrb[48].mxu0 %vm299_vm0, %v76_v9  ;;  %4400 = vmatprep.mubr.msk.f32.mxu1 %vm299_vm0, %v205_v10  ;;  %v230_v9 = vld [vmem:[%s8090_s1 + $0x258] sm:$0xff] }
  0x76   :  { %4608 = vmatprep.mubr.msk.f32.mxu0 %vm299_vm0, %v77_v11  ;;  %v102_v10 = vld [vmem:[%s8091_s0 + $0x258] sm:$0xff]  ;;  %v231_v11 = vld [vmem:[%s8090_s1 + $0x260] sm:$0xff] }
  0x78   :  { %4401 = vmatmul.mubr.msk.f32.gmra.mrb[50].mxu1 %vm299_vm0, %v206_v12  ;;  %v103_v12 = vld [vmem:[%s8091_s0 + $0x260] sm:$0xff] }
  0x79   :  { %4609 = vmatmul.mubr.msk.f32.gmra.mrb[50].mxu0 %vm299_vm0, %v78_v13  ;;  %4403 = vmatprep.mubr.msk.f32.mxu1 %vm299_vm0, %v207_v14  ;;  %v232_v13 = vld [vmem:[%s8090_s1 + $0x268] sm:$0xff] }
  0x7a   :  { %4611 = vmatprep.mubr.msk.f32.mxu0 %vm299_vm0, %v79_v15  ;;  %v104_v14 = vld [vmem:[%s8091_s0 + $0x268] sm:$0xff]  ;;  %v233_v15 = vld [vmem:[%s8090_s1 + $0x270] sm:$0xff] }
  0x7c   :  { %4404 = vmatmul.mubr.msk.f32.gmra.mrb[52].mxu1 %vm299_vm0, %v208_v16  ;;  %v105_v16 = vld [vmem:[%s8091_s0 + $0x270] sm:$0xff] }
  0x7d   :  { %4612 = vmatmul.mubr.msk.f32.gmra.mrb[52].mxu0 %vm299_vm0, %v80_v17  ;;  %4406 = vmatprep.mubr.msk.f32.mxu1 %vm299_vm0, %v209_v18  ;;  %v234_v17 = vld [vmem:[%s8090_s1 + $0x278] sm:$0xff] }
  0x7e   :  { %4614 = vmatprep.mubr.msk.f32.mxu0 %vm299_vm0, %v81_v19  ;;  %v106_v18 = vld [vmem:[%s8091_s0 + $0x278] sm:$0xff]  ;;  %v235_v19 = vld [vmem:[%s8090_s1 + $0x280] sm:$0xff] }
  0x80   :  { %4407 = vmatmul.mubr.msk.f32.gmra.mrb[54].mxu1 %vm299_vm0, %v210_v20  ;;  %v107_v20 = vld [vmem:[%s8091_s0 + $0x280] sm:$0xff] }
  0x81   :  { %4615 = vmatmul.mubr.msk.f32.gmra.mrb[54].mxu0 %vm299_vm0, %v82_v21  ;;  %4409 = vmatprep.mubr.msk.f32.mxu1 %vm299_vm0, %v211_v23  ;;  %v236_v21 = vld [vmem:[%s8090_s1 + $0x288] sm:$0xff] }
  0x82   :  { %4617 = vmatprep.mubr.msk.f32.mxu0 %vm299_vm0, %v83_v24  ;;  %v108_v23 = vld [vmem:[%s8091_s0 + $0x288] sm:$0xff]  ;;  %v237_v24 = vld [vmem:[%s8090_s1 + $0x290] sm:$0xff] }
  0x84   :  { %4410 = vmatmul.mubr.msk.f32.gmra.mrb[56].mxu1 %vm299_vm0, %v212_v25  ;;  %v109_v25 = vld [vmem:[%s8091_s0 + $0x290] sm:$0xff] }
  0x85   :  { %4618 = vmatmul.mubr.msk.f32.gmra.mrb[56].mxu0 %vm299_vm0, %v84_v26  ;;  %4412 = vmatprep.mubr.msk.f32.mxu1 %vm299_vm0, %v213_v37  ;;  %v238_v26 = vld [vmem:[%s8090_s1 + $0x298] sm:$0xff] }
  0x86   :  { %4620 = vmatprep.mubr.msk.f32.mxu0 %vm299_vm0, %v85_v38  ;;  %v110_v37 = vld [vmem:[%s8091_s0 + $0x298] sm:$0xff]  ;;  %v239_v38 = vld [vmem:[%s8090_s1 + $0x2a0] sm:$0xff] }
  0x88   :  { %4413 = vmatmul.mubr.msk.f32.gmra.mrb[58].mxu1 %vm299_vm0, %v214_v41  ;;  %v111_v41 = vld [vmem:[%s8091_s0 + $0x2a0] sm:$0xff] }
  0x89   :  { %4621 = vmatmul.mubr.msk.f32.gmra.mrb[58].mxu0 %vm299_vm0, %v86_v42  ;;  %4415 = vmatprep.mubr.msk.f32.mxu1 %vm299_vm0, %v215_v43  ;;  %v240_v42 = vld [vmem:[%s8090_s1 + $0x2a8] sm:$0xff] }
  0x8a   :  { %4623 = vmatprep.mubr.msk.f32.mxu0 %vm299_vm0, %v87_v44  ;;  %v112_v43 = vld [vmem:[%s8091_s0 + $0x2a8] sm:$0xff]  ;;  %v241_v44 = vld [vmem:[%s8090_s1 + $0x2b0] sm:$0xff] }
  0x8c   :  { %4416 = vmatmul.mubr.msk.f32.gmra.mrb[60].mxu1 %vm299_vm0, %v216_v45  ;;  %v113_v45 = vld [vmem:[%s8091_s0 + $0x2b0] sm:$0xff] }
  0x8d   :  { %4624 = vmatmul.mubr.msk.f32.gmra.mrb[60].mxu0 %vm299_vm0, %v88_v46  ;;  %4418 = vmatprep.mubr.msk.f32.mxu1 %vm299_vm0, %v217_v47  ;;  %v242_v46 = vld [vmem:[%s8090_s1 + $0x2b8] sm:$0xff] }
  0x8e   :  { %4626 = vmatprep.mubr.msk.f32.mxu0 %vm299_vm0, %v89_v48  ;;  %v114_v47 = vld [vmem:[%s8091_s0 + $0x2b8] sm:$0xff]  ;;  %v243_v48 = vld [vmem:[%s8090_s1 + $0x2c0] sm:$0xff] }
  0x90   :  { %4419 = vmatmul.mubr.msk.f32.gmra.mrb[62].mxu1 %vm299_vm0, %v218_v49  ;;  %v115_v49 = vld [vmem:[%s8091_s0 + $0x2c0] sm:$0xff] }
  0x91   :  { %4627 = vmatmul.mubr.msk.f32.gmra.mrb[62].mxu0 %vm299_vm0, %v90_v50  ;;  %4421 = vmatprep.mubr.msk.f32.mxu1 %vm299_vm0, %v219_v51  ;;  %v244_v50 = vld [vmem:[%s8090_s1 + $0x2c8] sm:$0xff] }
  0x92   :  { %4629 = vmatprep.mubr.msk.f32.mxu0 %vm299_vm0, %v91_v52  ;;  %v116_v51 = vld [vmem:[%s8091_s0 + $0x2c8] sm:$0xff]  ;;  %v245_v52 = vld [vmem:[%s8090_s1 + $0x2d0] sm:$0xff] }
  0x94   :  { %4422 = vmatmul.mubr.msk.f32.gmra.mrb[64].mxu1 %vm299_vm0, %v220_v53  ;;  %v117_v53 = vld [vmem:[%s8091_s0 + $0x2d0] sm:$0xff] }
  0x95   :  { %4630 = vmatmul.mubr.msk.f32.gmra.mrb[64].mxu0 %vm299_vm0, %v92_v54  ;;  %4424 = vmatprep.mubr.msk.f32.mxu1 %vm299_vm0, %v221_v55  ;;  %v246_v54 = vld [vmem:[%s8090_s1 + $0x2d8] sm:$0xff] }
  0x96   :  { %4632 = vmatprep.mubr.msk.f32.mxu0 %vm299_vm0, %v93_v56  ;;  %v118_v55 = vld [vmem:[%s8091_s0 + $0x2d8] sm:$0xff]  ;;  %v247_v56 = vld [vmem:[%s8090_s1 + $0x2e0] sm:$0xff] }
  0x98   :  { %4425 = vmatmul.mubr.msk.f32.gmra.mrb[66].mxu1 %vm299_vm0, %v222_v57  ;;  %v119_v57 = vld [vmem:[%s8091_s0 + $0x2e0] sm:$0xff] }
  0x99   :  { %4633 = vmatmul.mubr.msk.f32.gmra.mrb[66].mxu0 %vm299_vm0, %v94_v58  ;;  %4427 = vmatprep.mubr.msk.f32.mxu1 %vm299_vm0, %v223_v59  ;;  %v248_v58 = vld [vmem:[%s8090_s1 + $0x2e8] sm:$0xff] }
  0x9a   :  { %4635 = vmatprep.mubr.msk.f32.mxu0 %vm299_vm0, %v95_v60  ;;  %v120_v59 = vld [vmem:[%s8091_s0 + $0x2e8] sm:$0xff]  ;;  %v249_v60 = vld [vmem:[%s8090_s1 + $0x2f0] sm:$0xff] }
  0x9c   :  { %4428 = vmatmul.mubr.msk.f32.gmra.mrb[68].mxu1 %vm299_vm0, %v224_v61  ;;  %v121_v61 = vld [vmem:[%s8091_s0 + $0x2f0] sm:$0xff] }
  0x9d   :  { %4636 = vmatmul.mubr.msk.f32.gmra.mrb[68].mxu0 %vm299_vm0, %v96_v62  ;;  %4430 = vmatprep.mubr.msk.f32.mxu1 %vm299_vm0, %v225_v63  ;;  %v250_v62 = vld [vmem:[%s8090_s1 + $0x2f8] sm:$0xff] }
  0x9e   :  { %4638 = vmatprep.mubr.msk.f32.mxu0 %vm299_vm0, %v97_v0  ;;  %v122_v63 = vld [vmem:[%s8091_s0 + $0x2f8] sm:$0xff]  ;;  %v251_v0 = vld [vmem:[%s8090_s1 + $0x300] sm:$0xff] }
  0xa0   :  { %4431 = vmatmul.mubr.msk.f32.gmra.mrb[70].mxu1 %vm299_vm0, %v226_v1  ;;  %v123_v1 = vld [vmem:[%s8091_s0 + $0x300] sm:$0xff] }
  0xa1   :  { %4639 = vmatmul.mubr.msk.f32.gmra.mrb[70].mxu0 %vm299_vm0, %v98_v2  ;;  %4433 = vmatprep.mubr.msk.f32.mxu1 %vm299_vm0, %v227_v3  ;;  %v252_v2 = vld [vmem:[%s8090_s1 + $0x308] sm:$0xff] }
  0xa2   :  { %4641 = vmatprep.mubr.msk.f32.mxu0 %vm299_vm0, %v99_v4  ;;  %v124_v3 = vld [vmem:[%s8091_s0 + $0x308] sm:$0xff]  ;;  %v253_v4 = vld [vmem:[%s8090_s1 + $0x310] sm:$0xff] }
  0xa4   :  { %4434 = vmatmul.mubr.msk.f32.gmra.mrb[72].mxu1 %vm299_vm0, %v228_v5  ;;  %v125_v5 = vld [vmem:[%s8091_s0 + $0x310] sm:$0xff] }
  0xa5   :  { %4642 = vmatmul.mubr.msk.f32.gmra.mrb[72].mxu0 %vm299_vm0, %v100_v6  ;;  %4436 = vmatprep.mubr.msk.f32.mxu1 %vm299_vm0, %v229_v7  ;;  %v254_v6 = vld [vmem:[%s8090_s1 + $0x318] sm:$0xff] }
  0xa6   :  { %4644 = vmatprep.mubr.msk.f32.mxu0 %vm299_vm0, %v101_v8  ;;  %v126_v7 = vld [vmem:[%s8091_s0 + $0x318] sm:$0xff]  ;;  %v255_v8 = vld [vmem:[%s8090_s1 + $0x320] sm:$0xff] }
  0xa8   :  { %4437 = vmatmul.mubr.msk.f32.gmra.mrb[74].mxu1 %vm299_vm0, %v230_v9  ;;  %v127_v9 = vld [vmem:[%s8091_s0 + $0x320] sm:$0xff] }
  0xa9   :  { %4645 = vmatmul.mubr.msk.f32.gmra.mrb[74].mxu0 %vm299_vm0, %v102_v10  ;;  %4439 = vmatprep.mubr.msk.f32.mxu1 %vm299_vm0, %v231_v11  ;;  %v256_v10 = vld [vmem:[%s8090_s1 + $0x328] sm:$0xff] }
  0xaa   :  { %4647 = vmatprep.mubr.msk.f32.mxu0 %vm299_vm0, %v103_v12  ;;  %v128_v11 = vld [vmem:[%s8091_s0 + $0x328] sm:$0xff]  ;;  %v257_v12 = vld [vmem:[%s8090_s1 + $0x330] sm:$0xff] }
  0xac   :  { %4440 = vmatmul.mubr.msk.f32.gmra.mrb[76].mxu1 %vm299_vm0, %v232_v13  ;;  %v129_v13 = vld [vmem:[%s8091_s0 + $0x330] sm:$0xff] }
  0xad   :  { %4648 = vmatmul.mubr.msk.f32.gmra.mrb[76].mxu0 %vm299_vm0, %v104_v14  ;;  %4442 = vmatprep.mubr.msk.f32.mxu1 %vm299_vm0, %v233_v15  ;;  %v258_v14 = vld [vmem:[%s8090_s1 + $0x338] sm:$0xff] }
  0xae   :  { %4650 = vmatprep.mubr.msk.f32.mxu0 %vm299_vm0, %v105_v16  ;;  %v130_v15 = vld [vmem:[%s8091_s0 + $0x338] sm:$0xff]  ;;  %v259_v16 = vld [vmem:[%s8090_s1 + $0x340] sm:$0xff] }
  0xb0   :  { %4443 = vmatmul.mubr.msk.f32.gmra.mrb[78].mxu1 %vm299_vm0, %v234_v17  ;;  %v131_v17 = vld [vmem:[%s8091_s0 + $0x340] sm:$0xff] }
  0xb1   :  { %4651 = vmatmul.mubr.msk.f32.gmra.mrb[78].mxu0 %vm299_vm0, %v106_v18  ;;  %4445 = vmatprep.mubr.msk.f32.mxu1 %vm299_vm0, %v235_v19  ;;  %v260_v18 = vld [vmem:[%s8090_s1 + $0x348] sm:$0xff] }
  0xb2   :  { %4653 = vmatprep.mubr.msk.f32.mxu0 %vm299_vm0, %v107_v20  ;;  %v132_v19 = vld [vmem:[%s8091_s0 + $0x348] sm:$0xff]  ;;  %v261_v20 = vld [vmem:[%s8090_s1 + $0x350] sm:$0xff] }
  0xb4   :  { %4446 = vmatmul.mubr.msk.f32.gmra.mrb[80].mxu1 %vm299_vm0, %v236_v21  ;;  %v133_v21 = vld [vmem:[%s8091_s0 + $0x350] sm:$0xff] }
  0xb5   :  { %4654 = vmatmul.mubr.msk.f32.gmra.mrb[80].mxu0 %vm299_vm0, %v108_v23  ;;  %4448 = vmatprep.mubr.msk.f32.mxu1 %vm299_vm0, %v237_v24  ;;  %v262_v23 = vld [vmem:[%s8090_s1 + $0x358] sm:$0xff] }
  0xb6   :  { %4656 = vmatprep.mubr.msk.f32.mxu0 %vm299_vm0, %v109_v25  ;;  %v134_v24 = vld [vmem:[%s8091_s0 + $0x358] sm:$0xff]  ;;  %v263_v25 = vld [vmem:[%s8090_s1 + $0x360] sm:$0xff] }
  0xb8   :  { %4449 = vmatmul.mubr.msk.f32.gmra.mrb[82].mxu1 %vm299_vm0, %v238_v26 }
  0xb9   :  { %4657 = vmatmul.mubr.msk.f32.gmra.mrb[82].mxu0 %vm299_vm0, %v110_v37  ;;  %4451 = vmatprep.mubr.msk.f32.mxu1 %vm299_vm0, %v239_v38  ;;  %v135_v37 = vld [vmem:[%s8091_s0 + $0x360] sm:$0xff] }
  0xba   :  { %4659 = vmatprep.mubr.msk.f32.mxu0 %vm299_vm0, %v111_v41  ;;  %v6128_v41 = vld [vmem:[%s8092_s4] ss:$0 sm:$0xff] }
  0xbc   :  { %4452 = vmatmul.mubr.msk.f32.gmra.mrb[84].mxu1 %vm299_vm0, %v240_v42 }
  0xbd   :  { %4660 = vmatmul.mubr.msk.f32.gmra.mrb[84].mxu0 %vm299_vm0, %v112_v43  ;;  %4454 = vmatprep.mubr.msk.f32.mxu1 %vm299_vm0, %v241_v44 }
  0xbe   :  { %4662 = vmatprep.mubr.msk.f32.mxu0 %vm299_vm0, %v113_v45  ;;  %v264_v45 = vld [vmem:[%s8090_s1 + $0x368] sm:$0xff] }
  0xc0   :  { %4455 = vmatmul.mubr.msk.f32.gmra.mrb[86].mxu1 %vm299_vm0, %v242_v46 }
  0xc1   :  { %4663 = vmatmul.mubr.msk.f32.gmra.mrb[86].mxu0 %vm299_vm0, %v114_v47  ;;  %4457 = vmatprep.mubr.msk.f32.mxu1 %vm299_vm0, %v243_v48  ;;  %v136_v47 = vld [vmem:[%s8091_s0 + $0x368] sm:$0xff]  ;;  %v265_v48 = vld [vmem:[%s8090_s1 + $0x370] sm:$0xff] }
  0xc2   :  { %4665 = vmatprep.mubr.msk.f32.mxu0 %vm299_vm0, %v115_v49 }
  0xc4   :  { %4458 = vmatmul.mubr.msk.f32.gmra.mrb[88].mxu1 %vm299_vm0, %v244_v50 }
  0xc5   :  { %4666 = vmatmul.mubr.msk.f32.gmra.mrb[88].mxu0 %vm299_vm0, %v116_v51  ;;  %4460 = vmatprep.mubr.msk.f32.mxu1 %vm299_vm0, %v245_v52  ;;  %v137_v51 = vld [vmem:[%s8091_s0 + $0x370] sm:$0xff] }
  0xc6   :  { %4668 = vmatprep.mubr.msk.f32.mxu0 %vm299_vm0, %v117_v53 }
  0xc8   :  { %4461 = vmatmul.mubr.msk.f32.gmra.mrb[90].mxu1 %vm299_vm0, %v246_v54 }
  0xc9   :  { %4669 = vmatmul.mubr.msk.f32.gmra.mrb[90].mxu0 %vm299_vm0, %v118_v55  ;;  %4463 = vmatprep.mubr.msk.f32.mxu1 %vm299_vm0, %v247_v56  ;;  %v6152_v55 = vld [vmem:[%s8093_s5] ss:$0 sm:$0xff] }
  0xca   :  { %4671 = vmatprep.mubr.msk.f32.mxu0 %vm299_vm0, %v119_v57 }
  0xcc   :  { %4464 = vmatmul.mubr.msk.f32.gmra.mrb[92].mxu1 %vm299_vm0, %v248_v58 }
  0xcd   :  { %4672 = vmatmul.mubr.msk.f32.gmra.mrb[92].mxu0 %vm299_vm0, %v120_v59  ;;  %4466 = vmatprep.mubr.msk.f32.mxu1 %vm299_vm0, %v249_v60  ;;  %v266_v59 = vld [vmem:[%s8090_s1 + $0x378] sm:$0xff]  ;;  %v2742_v60 = vmul.f32 %v5232_v27, %v5237_v28  ;;  %v139_v27 = vld [vmem:[%s8091_s0 + $0x380] sm:$0xff] }
  0xce   :  { %4674 = vmatprep.mubr.msk.f32.mxu0 %vm299_vm0, %v121_v61 }
  0xd0   :  { %4467 = vmatmul.mubr.msk.f32.gmra.mrb[94].mxu1 %vm299_vm0, %v250_v62 }
  0xd1   :  { %4675 = vmatmul.mubr.msk.f32.gmra.mrb[94].mxu0 %vm299_vm0, %v122_v63  ;;  %4469 = vmatprep.mubr.msk.f32.mxu1 %vm299_vm0, %v251_v0  ;;  %v138_v63 = vld [vmem:[%s8091_s0 + $0x378] sm:$0xff]  ;;  %v267_v0 = vld [vmem:[%s8090_s1 + $0x380] sm:$0xff] }
  0xd2   :  { %4677 = vmatprep.mubr.msk.f32.mxu0 %vm299_vm0, %v123_v1 }
  0xd4   :  { %4470 = vmatmul.mubr.msk.f32.gmra.mrb[96].mxu1 %vm299_vm0, %v252_v2 }
  0xd5   :  { %4678 = vmatmul.mubr.msk.f32.gmra.mrb[96].mxu0 %vm299_vm0, %v124_v3  ;;  %4472 = vmatprep.mubr.msk.f32.mxu1 %vm299_vm0, %v253_v4 }
  0xd6   :  { %4680 = vmatprep.mubr.msk.f32.mxu0 %vm299_vm0, %v125_v5 }
  0xd8   :  { %4473 = vmatmul.mubr.msk.f32.gmra.mrb[98].mxu1 %vm299_vm0, %v254_v6 }
  0xd9   :  { %4681 = vmatmul.mubr.msk.f32.gmra.mrb[98].mxu0 %vm299_vm0, %v126_v7  ;;  %4475 = vmatprep.mubr.msk.f32.mxu1 %vm299_vm0, %v255_v8 }
  0xda   :  { %4683 = vmatprep.mubr.msk.f32.mxu0 %vm299_vm0, %v127_v9 }
  0xdc   :  { %4476 = vmatmul.mubr.msk.f32.gmra.mrb[100].mxu1 %vm299_vm0, %v256_v10 }
  0xdd   :  { %4684 = vmatmul.mubr.msk.f32.gmra.mrb[100].mxu0 %vm299_vm0, %v128_v11  ;;  %4478 = vmatprep.mubr.msk.f32.mxu1 %vm299_vm0, %v257_v12  ;;  %v268_v11 = vld [vmem:[%s8090_s1 + $0x388] sm:$0xff]  ;;  %v2744_v12 = vmul.f32 %v5258_v31, %v5265_v32  ;;  %v141_v32 = vld [vmem:[%s8091_s0 + $0x390] sm:$0xff] }
  0xde   :  { %4686 = vmatprep.mubr.msk.f32.mxu0 %vm299_vm0, %v129_v13 }
  0xe0   :  { %4479 = vmatmul.mubr.msk.f32.gmra.mrb[102].mxu1 %vm299_vm0, %v258_v14 }
  0xe1   :  { %4687 = vmatmul.mubr.msk.f32.gmra.mrb[102].mxu0 %vm299_vm0, %v130_v15  ;;  %4481 = vmatprep.mubr.msk.f32.mxu1 %vm299_vm0, %v259_v16  ;;  %v140_v15 = vld [vmem:[%s8091_s0 + $0x388] sm:$0xff] }
  0xe2   :  { %4689 = vmatprep.mubr.msk.f32.mxu0 %vm299_vm0, %v131_v17  ;;  %v269_v17 = vld [vmem:[%s8090_s1 + $0x390] sm:$0xff] }
  0xe4   :  { %4482 = vmatmul.mubr.msk.f32.gmra.mrb[104].mxu1 %vm299_vm0, %v260_v18 }
  0xe5   :  { %4690 = vmatmul.mubr.msk.f32.gmra.mrb[104].mxu0 %vm299_vm0, %v132_v19  ;;  %4484 = vmatprep.mubr.msk.f32.mxu1 %vm299_vm0, %v261_v20 }
  0xe6   :  { %4692 = vmatprep.mubr.msk.f32.mxu0 %vm299_vm0, %v133_v21  ;;  %v2743_v21 = vmul.f32 %v5242_v29, %v5247_v30  ;;  %v2746_v29 = vmul.f32 %v5286_v35, %v5293_v36 }
  0xe7   :  { %v4327_v26 = vpop.f32.mrb[0].mxu1 }
  0xe8   :  { %v4535_v38 = vpop.f32.mrb[0].mxu0  ;;  %v750_v42 = vpop.f32.mrb[1].mxu1  ;;  %4485 = vmatmul.mubr.msk.f32.gmra.mrb[106].mxu1 %vm299_vm0, %v262_v23 }
  0xe9   :  { %v1845_v43 = vadd.f32 %v4535_v38, %v4327_v26  ;;  %v1839_v44 = vpop.f32.mrb[1].mxu0  ;;  %4693 = vmatmul.mubr.msk.f32.gmra.mrb[106].mxu0 %vm299_vm0, %v134_v24  ;;  %4487 = vmatprep.mubr.msk.f32.mxu1 %vm299_vm0, %v263_v25 }
  0xea   :  { %v1840_v46 = vadd.f32 %v1839_v44, %v750_v42  ;;  %4695 = vmatprep.mubr.msk.f32.mxu0 %vm299_vm0, %v135_v37 }
  0xeb   :  { %v2486_v49 = vadd.f32 %v6128_v41, %v1845_v43  ;;  %v4330_v50 = vpop.f32.mrb[2].mxu1 }
  0xec   :  { %v2485_v52 = vadd.f32 %v6128_v41, %v1840_v46  ;;  %v4538_v53 = vpop.f32.mrb[2].mxu0  ;;  %v760_v54 = vpop.f32.mrb[3].mxu1  ;;  %4488 = vmatmul.mubr.msk.f32.gmra.mrb[108].mxu1 %vm299_vm0, %v264_v45  ;;  %v270_v45 = vld [vmem:[%s8090_s1 + $0x398] sm:$0xff] }
  0xed   :  { %v2614_v56 = vmax.f32 %v2486_v49, 0.0  ;;  %v1855_v57 = vadd.f32 %v4538_v53, %v4330_v50  ;;  %v1849_v58 = vpop.f32.mrb[3].mxu0  ;;  %4696 = vmatmul.mubr.msk.f32.gmra.mrb[108].mxu0 %vm299_vm0, %v136_v47  ;;  %4490 = vmatprep.mubr.msk.f32.mxu1 %vm299_vm0, %v265_v48  ;;  %v142_v46 = vld [vmem:[%s8091_s0 + $0x398] sm:$0xff]  ;;  %v2745_v47 = vmul.f32 %v5270_v33, %v5275_v34  ;;  %v271_v50 = vld [vmem:[%s8090_s1 + $0x3a0] sm:$0xff] }
  0xee   :  { %v2613_v61 = vmax.f32 %v2485_v52, 0.0  ;;  %v1850_v62 = vadd.f32 %v1849_v58, %v760_v54  ;;  %4698 = vmatprep.mubr.msk.f32.mxu0 %vm299_vm0, %v137_v51  ;;  %v143_v51 = vld [vmem:[%s8091_s0 + $0x3a0] sm:$0xff] }
  0xef   :  { %v2488_v1 = vadd.f32 %v6128_v41, %v1855_v57  ;;  %v4333_v2 = vpop.f32.mrb[4].mxu1  ;;  %v2877_v3 = vmul.f32 %v6152_v55, %v2614_v56 }
  0xf0   :  { %v2487_v28 = vadd.f32 %v6128_v41, %v1850_v62  ;;  %v4541_v4 = vpop.f32.mrb[4].mxu0  ;;  %v770_v5 = vpop.f32.mrb[5].mxu1  ;;  %4491 = vmatmul.mubr.msk.f32.gmra.mrb[110].mxu1 %vm299_vm0, %v266_v59  ;;  %v2876_v6 = vmul.f32 %v6152_v55, %v2613_v61 }
  0xf1   :  { %v2616_v7 = vmax.f32 %v2488_v1, 0.0  ;;  %v1865_v8 = vadd.f32 %v4541_v4, %v4333_v2  ;;  %v1859_v9 = vpop.f32.mrb[5].mxu0  ;;  %4699 = vmatmul.mubr.msk.f32.gmra.mrb[110].mxu0 %vm299_vm0, %v138_v63  ;;  %v3005_v10 = vadd.f32 %v2877_v3, %v2742_v60  ;;  %4493 = vmatprep.mubr.msk.f32.mxu1 %vm299_vm0, %v267_v0  ;;  %v2748_v60 = vmul.f32 %v5309_v39, %v5315_v40  ;;  %v272_v63 = vld [vmem:[%s8090_s1 + $0x3a8] sm:$0xff]  ;;  %v4885_v2 = vld [vmem:[%s8090_s1 + $0x30] sm:$0xff] }
  0xf2   :  { %v2615_v13 = vmax.f32 %v2487_v28, 0.0  ;;  %v1860_v14 = vadd.f32 %v1859_v9, %v770_v5  ;;  %4701 = vmatprep.mubr.msk.f32.mxu0 %vm299_vm0, %v139_v27  ;;  %v3004_v16 = vadd.f32 %v2876_v6, %v5220_v22  ;;  %v144_v0 = vld [vmem:[%s8091_s0 + $0x3a8] sm:$0xff]  ;;  %v4886_v39 = vld [vmem:[%s8091_s0 + $0x30] sm:$0xff] }
  0xf3   :  { %v2490_v18 = vadd.f32 %v6128_v41, %v1865_v8  ;;  %v3135_v19 = vsel %vm299_vm0, %v3005_v10, 0.0  ;;  %v4336_v20 = vpop.f32.mrb[6].mxu1  ;;  %v2879_v31 = vmul.f32 %v6152_v55, %v2616_v7  ;;  %v2747_v40 = vmul.f32 %v4886_v39, %v4885_v2  ;;  %v273_v4 = vld [vmem:[%s8090_s1 + $0x3b0] sm:$0xff] }
  0xf4   :  { %v2489_v22 = vadd.f32 %v6128_v41, %v1860_v14  ;;  %3136 = vadd.xlane.f32.xlu0 %v3135_v19  ;;  %v4544_v23 = vpop.f32.mrb[6].mxu0  ;;  %v780_v24 = vpop.f32.mrb[7].mxu1  ;;  %4494 = vmatmul.mubr.msk.f32.gmra.mrb[112].mxu1 %vm299_vm0, %v268_v11  ;;  %v2878_v25 = vmul.f32 %v6152_v55, %v2615_v13  ;;  %v3132_v44 = vsel %vm299_vm0, %v3004_v16, 0.0  ;;  %v145_v10 = vld [vmem:[%s8091_s0 + $0x3b0] sm:$0xff]  ;;  %v4888_v13 = vld [vmem:[%s8091_s0 + $0x48] sm:$0xff] }
  0xf5   :  { %v2618_v26 = vmax.f32 %v2490_v18, 0.0  ;;  %v1875_v37 = vadd.f32 %v4544_v23, %v4336_v20  ;;  %v1869_v38 = vpop.f32.mrb[7].mxu0  ;;  %4702 = vmatmul.mubr.msk.f32.gmra.mrb[112].mxu0 %vm299_vm0, %v140_v15  ;;  %v3007_v42 = vadd.f32 %v2879_v31, %v2744_v12  ;;  %4496 = vmatprep.mubr.msk.f32.mxu1 %vm299_vm0, %v269_v17  ;;  %v4887_v12 = vld [vmem:[%s8090_s1 + $0x48] sm:$0xff]  ;;  %v4889_v23 = vld [vmem:[%s8090_s1 + $0x40] sm:$0xff] }
  0xf6   :  { %v2617_v30 = vmax.f32 %v2489_v22, 0.0  ;;  %v1870_v43 = vadd.f32 %v1869_v38, %v780_v24  ;;  %4704 = vmatprep.mubr.msk.f32.mxu0 %vm299_vm0, %v141_v32  ;;  %v3006_v49 = vadd.f32 %v2878_v25, %v2743_v21  ;;  %v2750_v14 = vmul.f32 %v4888_v13, %v4887_v12  ;;  %v274_v32 = vld [vmem:[%s8090_s1 + $0x3b8] sm:$0xff]  ;;  %v4890_v24 = vld [vmem:[%s8091_s0 + $0x40] sm:$0xff] }
  0xf7   :  { %v2492_v48 = vadd.f32 %v6128_v41, %v1875_v37  ;;  %v3141_v35 = vsel %vm299_vm0, %v3007_v42, 0.0  ;;  %v4339_v36 = vpop.f32.mrb[8].mxu1  ;;  %v2881_v52 = vmul.f32 %v6152_v55, %v2618_v26  ;;  %v146_v21 = vld [vmem:[%s8091_s0 + $0x3b8] sm:$0xff]  ;;  %v2749_v25 = vmul.f32 %v4890_v24, %v4889_v23  ;;  %v275_v38 = vld [vmem:[%s8090_s1 + $0x3c0] sm:$0xff] }
  0xf8   :  { %v2491_v53 = vadd.f32 %v6128_v41, %v1870_v43  ;;  %3142 = vadd.xlane.f32.xlu1 %v3141_v35  ;;  %3133 = vadd.xlane.f32.xlu0 %v3132_v44  ;;  %v4547_v33 = vpop.f32.mrb[8].mxu0  ;;  %v790_v34 = vpop.f32.mrb[9].mxu1  ;;  %v2880_v54 = vmul.f32 %v6152_v55, %v2617_v30  ;;  %v3138_v27 = vsel %vm299_vm0, %v3006_v49, 0.0  ;;  %v278_v12 = vld [vmem:[%s8090_s1 + $0x3d8] sm:$0xff]  ;;  %v151_v24 = vld [vmem:[%s8091_s0 + $0x3e0] sm:$0xff] }
  0xf9   :  { %v2620_v56 = vmax.f32 %v2492_v48, 0.0  ;;  %v1885_v57 = vadd.f32 %v4547_v33, %v4339_v36  ;;  %4497 = vmatmul.mubr.msk.f32.gmra.mrb[114].mxu1 %vm299_vm0, %v270_v45  ;;  %v1879_v58 = vpop.f32.mrb[9].mxu0  ;;  %4705 = vmatmul.mubr.msk.f32.gmra.mrb[114].mxu0 %vm299_vm0, %v142_v46  ;;  %v3009_v59 = vadd.f32 %v2881_v52, %v2746_v29  ;;  %v147_v45 = vld [vmem:[%s8091_s0 + $0x3c0] sm:$0xff]  ;;  %v4892_v48 = vld [vmem:[%s8091_s0 + $0x58] sm:$0xff] }
  0xfa   :  { %v2619_v61 = vmax.f32 %v2491_v53, 0.0  ;;  %v1880_v62 = vadd.f32 %v1879_v58, %v790_v34  ;;  %4499 = vmatprep.mubr.msk.f32.mxu1 %vm299_vm0, %v271_v50  ;;  %4707 = vmatprep.mubr.msk.f32.mxu0 %vm299_vm0, %v143_v51  ;;  %v3008_v1 = vadd.f32 %v2880_v54, %v2745_v47  ;;  %v4891_v47 = vld [vmem:[%s8090_s1 + $0x58] sm:$0xff]  ;;  %v276_v34 = vld [vmem:[%s8090_s1 + $0x3c8] sm:$0xff]  ;;  %v4894_v58 = vld [vmem:[%s8091_s0 + $0x50] sm:$0xff] }
  0xfb   :  { %v2494_v3 = vadd.f32 %v6128_v41, %v1885_v57  ;;  %v4342_v28 = vpop.f32.mrb[10].mxu1  ;;  %v2883_v5 = vmul.f32 %v6152_v55, %v2620_v56  ;;  %v3147_v18 = vsel %vm299_vm0, %v3009_v59, 0.0  ;;  %v2752_v35 = vmul.f32 %v4892_v48, %v4891_v47  ;;  %v148_v54 = vld [vmem:[%s8091_s0 + $0x3c8] sm:$0xff]  ;;  %v4893_v57 = vld [vmem:[%s8090_s1 + $0x50] sm:$0xff]  ;;  %v150_v13 = vld [vmem:[%s8091_s0 + $0x3d8] sm:$0xff] }
  0xfc   :  { %v2493_v6 = vadd.f32 %v6128_v41, %v1880_v62  ;;  %3139 = vadd.xlane.f32.xlu1 %v3138_v27  ;;  %v4550_v7 = vpop.f32.mrb[10].mxu0  ;;  %v800_v8 = vpop.f32.mrb[11].mxu1  ;;  %v3144_v9 = vsel %vm299_vm0, %v3008_v1, 0.0  ;;  %v2882_v11 = vmul.f32 %v6152_v55, %v2619_v61  ;;  %v2751_v59 = vmul.f32 %v4894_v58, %v4893_v57  ;;  %v277_v62 = vld [vmem:[%s8090_s1 + $0x3d0] sm:$0xff]  ;;  %v4895_v27 = vld [vmem:[%s8090_s1 + $0x68] sm:$0xff] }
  0xfd   :  { %v2622_v15 = vmax.f32 %v2494_v3, 0.0  ;;  %v1895_v16 = vadd.f32 %v4550_v7, %v4342_v28  ;;  %4500 = vmatmul.mubr.msk.f32.gmra.mrb[116].mxu1 %vm299_vm0, %v272_v63  ;;  %v1889_v17 = vpop.f32.mrb[11].mxu0  ;;  %4708 = vmatmul.mubr.msk.f32.gmra.mrb[116].mxu0 %vm299_vm0, %v144_v0  ;;  %v3011_v19 = vadd.f32 %v2883_v5, %v2748_v60  ;;  %v4896_v28 = vld [vmem:[%s8091_s0 + $0x68] sm:$0xff]  ;;  %v153_v58 = vld [vmem:[%s8091_s0 + $0x3f0] sm:$0xff] }
  0xfe   :  { %v2621_v20 = vmax.f32 %v2493_v6, 0.0  ;;  %v1890_v31 = vadd.f32 %v1889_v17, %v800_v8  ;;  %3145 = vadd.xlane.f32.xlu0 %v3144_v9  ;;  %4502 = vmatprep.mubr.msk.f32.mxu1 %vm299_vm0, %v273_v4  ;;  %v3010_v22 = vadd.f32 %v2882_v11, %v2747_v40  ;;  %v149_v40 = vld [vmem:[%s8091_s0 + $0x3d0] sm:$0xff]  ;;  %v2754_v4 = vmul.f32 %v4896_v28, %v4895_v27  ;;  %v280_v47 = vld [vmem:[%s8090_s1 + $0x3e8] sm:$0xff]  ;;  %v282_v27 = vld [vmem:[%s8090_s1 + $0x3f8] sm:$0xff] }
  0xff   :  { %v2496_v26 = vadd.f32 %v6128_v41, %v1895_v16  ;;  %v4345_v37 = vpop.f32.mrb[12].mxu1  ;;  %4710 = vmatprep.mubr.msk.f32.mxu0 %vm299_vm0, %v145_v10  ;;  %v2885_v42 = vmul.f32 %v6152_v55, %v2622_v15  ;;  %v3153_v51 = vsel %vm299_vm0, %v3011_v19, 0.0  ;;  %v4897_v15 = vld [vmem:[%s8090_s1 + $0x60] sm:$0xff]  ;;  %v152_v48 = vld [vmem:[%s8091_s0 + $0x3e8] sm:$0xff]  ;;  %v154_v28 = vld [vmem:[%s8091_s0 + $0x3f8] sm:$0xff] }
 0x100   :  { %v2495_v29 = vadd.f32 %v6128_v41, %v1890_v31  ;;  %3148 = vadd.xlane.f32.xlu1 %v3147_v18  ;;  %v4553_v30 = vpop.f32.mrb[12].mxu0  ;;  %v810_v43 = vpop.f32.mrb[13].mxu1  ;;  %v3150_v44 = vsel %vm299_vm0, %v3010_v22, 0.0  ;;  %v2884_v46 = vmul.f32 %v6152_v55, %v2621_v20  ;;  %v4898_v16 = vld [vmem:[%s8091_s0 + $0x60] sm:$0xff] }
 0x101   :  { %v2624_v36 = vmax.f32 %v2496_v26, 0.0  ;;  %v1905_v49 = vadd.f32 %v4553_v30, %v4345_v37  ;;  %4503 = vmatmul.mubr.msk.f32.gmra.mrb[118].mxu1 %vm299_vm0, %v274_v32  ;;  %v1899_v50 = vpop.f32.mrb[13].mxu0  ;;  %4711 = vmatmul.mubr.msk.f32.gmra.mrb[118].mxu0 %vm299_vm0, %v146_v21  ;;  %v3013_v52 = vadd.f32 %v2885_v42, %v2750_v14  ;;  %v2753_v17 = vmul.f32 %v4898_v16, %v4897_v15  ;;  %v279_v20 = vld [vmem:[%s8090_s1 + $0x3e0] sm:$0xff]  ;;  %v4899_v26 = vld [vmem:[%s8090_s1 + $0x78] sm:$0xff] }
 0x102   :  { %v2623_v53 = vmax.f32 %v2495_v29, 0.0  ;;  %v1900_v33 = vadd.f32 %v1899_v50, %v810_v43  ;;  %3151 = vadd.xlane.f32.xlu0 %v3150_v44  ;;  %4505 = vmatprep.mubr.msk.f32.mxu1 %vm299_vm0, %v275_v38  ;;  %v3012_v56 = vadd.f32 %v2884_v46, %v2749_v25  ;;  %v4900_v37 = vld [vmem:[%s8091_s0 + $0x78] sm:$0xff] }
 0x103   :  { %v2498_v60 = vadd.f32 %v6128_v41, %v1905_v49  ;;  %v4348_v61 = vpop.f32.mrb[14].mxu1  ;;  %4713 = vmatprep.mubr.msk.f32.mxu0 %vm299_vm0, %v147_v45  ;;  %v2887_v63 = vmul.f32 %v6152_v55, %v2624_v36  ;;  %v3159_v8 = vsel %vm299_vm0, %v3013_v52, 0.0  ;;  %v2756_v38 = vmul.f32 %v4900_v37, %v4899_v26  ;;  %v4901_v36 = vld [vmem:[%s8090_s1 + $0x70] sm:$0xff]  ;;  %v4907_v16 = vld [vmem:[%s8090_s1 + $0x98] sm:$0xff] }
 0x104   :  { %v2497_v0 = vadd.f32 %v6128_v41, %v1900_v33  ;;  %3154 = vadd.xlane.f32.xlu1 %v3153_v51  ;;  %v4556_v1 = vpop.f32.mrb[14].mxu0  ;;  %v820_v2 = vpop.f32.mrb[15].mxu1  ;;  %v3156_v39 = vsel %vm299_vm0, %v3012_v56, 0.0  ;;  %v2886_v3 = vmul.f32 %v6152_v55, %v2623_v53  ;;  %v4902_v49 = vld [vmem:[%s8091_s0 + $0x70] sm:$0xff] }
 0x105   :  { %v2626_v5 = vmax.f32 %v2498_v60, 0.0  ;;  %v1915_v6 = vadd.f32 %v4556_v1, %v4348_v61  ;;  %4506 = vmatmul.mubr.msk.f32.gmra.mrb[120].mxu1 %vm299_vm0, %v276_v34  ;;  %v1909_v7 = vpop.f32.mrb[15].mxu0  ;;  %4714 = vmatmul.mubr.msk.f32.gmra.mrb[120].mxu0 %vm299_vm0, %v148_v54  ;;  %v3015_v9 = vadd.f32 %v2887_v63, %v2752_v35  ;;  %v2755_v50 = vmul.f32 %v4902_v49, %v4901_v36  ;;  %v281_v53 = vld [vmem:[%s8090_s1 + $0x3f0] sm:$0xff]  ;;  %v4903_v60 = vld [vmem:[%s8090_s1 + $0x88] sm:$0xff] }
 0x106   :  { %v2625_v10 = vmax.f32 %v2497_v0, 0.0  ;;  %v1910_v11 = vadd.f32 %v1909_v7, %v820_v2  ;;  %3157 = vadd.xlane.f32.xlu0 %v3156_v39  ;;  %4508 = vmatprep.mubr.msk.f32.mxu1 %vm299_vm0, %v277_v62  ;;  %v3014_v14 = vadd.f32 %v2886_v3, %v2751_v59  ;;  %v4904_v61 = vld [vmem:[%s8091_s0 + $0x88] sm:$0xff]  ;;  %v4910_v26 = vld [vmem:[%s8091_s0 + $0x90] sm:$0xff] }
 0x107   :  { %v2500_v18 = vadd.f32 %v6128_v41, %v1915_v6  ;;  %v4351_v19 = vpop.f32.mrb[16].mxu1  ;;  %4716 = vmatprep.mubr.msk.f32.mxu0 %vm299_vm0, %v149_v40  ;;  %v2889_v31 = vmul.f32 %v6152_v55, %v2626_v5  ;;  %v3165_v43 = vsel %vm299_vm0, %v3015_v9, 0.0  ;;  %v2758_v62 = vmul.f32 %v4904_v61, %v4903_v60  ;;  %v4905_v5 = vld [vmem:[%s8090_s1 + $0x80] sm:$0xff] }
 0x108   :  { %v2499_v32 = vadd.f32 %v6128_v41, %v1910_v11  ;;  %3160 = vadd.xlane.f32.xlu1 %v3159_v8  ;;  %v4559_v21 = vpop.f32.mrb[16].mxu0  ;;  %v830_v22 = vpop.f32.mrb[17].mxu1  ;;  %v3162_v23 = vsel %vm299_vm0, %v3014_v14, 0.0  ;;  %v2888_v25 = vmul.f32 %v6152_v55, %v2625_v10  ;;  %v4906_v6 = vld [vmem:[%s8091_s0 + $0x80] sm:$0xff] }
 0x109   :  { %v2628_v42 = vmax.f32 %v2500_v18, 0.0  ;;  %v1925_v29 = vadd.f32 %v4559_v21, %v4351_v19  ;;  %4509 = vmatmul.mubr.msk.f32.gmra.mrb[122].mxu1 %vm299_vm0, %v278_v12  ;;  %v1919_v30 = vpop.f32.mrb[17].mxu0  ;;  %4717 = vmatmul.mubr.msk.f32.gmra.mrb[122].mxu0 %vm299_vm0, %v150_v13  ;;  %v3017_v44 = vadd.f32 %v2889_v31, %v2754_v4  ;;  %v2757_v7 = vmul.f32 %v4906_v6, %v4905_v5 }
 0x10a   :  { %v2627_v45 = vmax.f32 %v2499_v32, 0.0  ;;  %v1920_v46 = vadd.f32 %v1919_v30, %v830_v22  ;;  %3163 = vadd.xlane.f32.xlu0 %v3162_v23  ;;  %4511 = vmatprep.mubr.msk.f32.mxu1 %vm299_vm0, %v279_v20  ;;  %v3016_v35 = vadd.f32 %v2888_v25, %v2753_v17  ;;  %v4908_v17 = vld [vmem:[%s8091_s0 + $0x98] sm:$0xff]  ;;  %v4909_v25 = vld [vmem:[%s8090_s1 + $0x90] sm:$0xff] }
 0x10b   :  { %v2502_v51 = vadd.f32 %v6128_v41, %v1925_v29  ;;  %v4354_v52 = vpop.f32.mrb[18].mxu1  ;;  %4719 = vmatprep.mubr.msk.f32.mxu0 %vm299_vm0, %v151_v24  ;;  %v2891_v33 = vmul.f32 %v6152_v55, %v2628_v42  ;;  %v3171_v2 = vsel %vm299_vm0, %v3017_v44, 0.0  ;;  %v2760_v18 = vmul.f32 %v4908_v17, %v4907_v16 }
 0x10c   :  { %v2501_v34 = vadd.f32 %v6128_v41, %v1920_v46  ;;  %3166 = vadd.xlane.f32.xlu1 %v3165_v43  ;;  %v4562_v54 = vpop.f32.mrb[18].mxu0  ;;  %v840_v56 = vpop.f32.mrb[19].mxu1  ;;  %v3168_v57 = vsel %vm299_vm0, %v3016_v35, 0.0  ;;  %v2890_v59 = vmul.f32 %v6152_v55, %v2627_v45  ;;  %v2759_v37 = vmul.f32 %v4910_v26, %v4909_v25 }
 0x10d   :  { %v2630_v63 = vmax.f32 %v2502_v51, 0.0  ;;  %v1935_v0 = vadd.f32 %v4562_v54, %v4354_v52  ;;  %4512 = vmatmul.mubr.msk.f32.gmra.mrb[124].mxu1 %vm299_vm0, %v280_v47  ;;  %v1929_v1 = vpop.f32.mrb[19].mxu0  ;;  %4720 = vmatmul.mubr.msk.f32.gmra.mrb[124].mxu0 %vm299_vm0, %v152_v48  ;;  %v3019_v39 = vadd.f32 %v2891_v33, %v2756_v38  ;;  %v4911_v47 = vld [vmem:[%s8090_s1 + $0xa8] sm:$0xff]  ;;  %v4913_v54 = vld [vmem:[%s8090_s1 + $0xa0] sm:$0xff] }
 0x10e   :  { %v2629_v40 = vmax.f32 %v2501_v34, 0.0  ;;  %v1930_v3 = vadd.f32 %v1929_v1, %v840_v56  ;;  %3169 = vadd.xlane.f32.xlu0 %v3168_v57  ;;  %4514 = vmatprep.mubr.msk.f32.mxu1 %vm299_vm0, %v281_v53  ;;  %v3018_v4 = vadd.f32 %v2890_v59, %v2755_v50  ;;  %v4912_v48 = vld [vmem:[%s8091_s0 + $0xa8] sm:$0xff]  ;;  %v4914_v56 = vld [vmem:[%s8091_s0 + $0xa0] sm:$0xff] }
 0x10f   :  { %v2504_v8 = vadd.f32 %v6128_v41, %v1935_v0  ;;  %v4357_v9 = vpop.f32.mrb[20].mxu1  ;;  %4722 = vmatprep.mubr.msk.f32.mxu0 %vm299_vm0, %v153_v58  ;;  %v2893_v10 = vmul.f32 %v6152_v55, %v2630_v63  ;;  %v3177_v32 = vsel %vm299_vm0, %v3019_v39, 0.0  ;;  %v2762_v35 = vmul.f32 %v4912_v48, %v4911_v47  ;;  %v4916_v39 = vld [vmem:[%s8091_s0 + $0xb8] sm:$0xff] }
 0x110   :  { %v2503_v11 = vadd.f32 %v6128_v41, %v1930_v3  ;;  %3172 = vadd.xlane.f32.xlu1 %v3171_v2  ;;  %v4565_v12 = vpop.f32.mrb[20].mxu0  ;;  %v850_v13 = vpop.f32.mrb[21].mxu1  ;;  %v3174_v14 = vsel %vm299_vm0, %v3018_v4, 0.0  ;;  %v2892_v15 = vmul.f32 %v6152_v55, %v2629_v40  ;;  %v2761_v57 = vmul.f32 %v4914_v56, %v4913_v54  ;;  %v4915_v2 = vld [vmem:[%s8090_s1 + $0xb8] sm:$0xff] }
 0x111   :  { %v2632_v19 = vmax.f32 %v2504_v8, 0.0  ;;  %v1945_v20 = vadd.f32 %v4565_v12, %v4357_v9  ;;  %4515 = vmatmul.mubr.msk.f32.gmra.mrb[126].mxu1 %vm299_vm0, %v282_v27  ;;  %v1939_v31 = vpop.f32.mrb[21].mxu0  ;;  %4723 = vmatmul.mubr.msk.f32.gmra.mrb[126].mxu0 %vm299_vm0, %v154_v28  ;;  %v3021_v21 = vadd.f32 %v2893_v10, %v2758_v62  ;;  %v2764_v40 = vmul.f32 %v4916_v39, %v4915_v2  ;;  %v4917_v9 = vld [vmem:[%s8090_s1 + $0xb0] sm:$0xff] }
 0x112   :  { %v2631_v22 = vmax.f32 %v2503_v11, 0.0  ;;  %v1940_v23 = vadd.f32 %v1939_v31, %v850_v13  ;;  %3175 = vadd.xlane.f32.xlu0 %v3174_v14  ;;  %v3020_v24 = vadd.f32 %v2892_v15, %v2757_v7  ;;  %v4918_v10 = vld [vmem:[%s8091_s0 + $0xb0] sm:$0xff]  ;;  %v4920_v31 = vld [vmem:[%s8091_s0 + $0xc8] sm:$0xff] }
 0x113   :  { %v2506_v38 = vadd.f32 %v6128_v41, %v1945_v20  ;;  %v4360_v42 = vpop.f32.mrb[22].mxu1  ;;  %v2895_v29 = vmul.f32 %v6152_v55, %v2632_v19  ;;  %v3183_v51 = vsel %vm299_vm0, %v3021_v21, 0.0  ;;  %v2763_v11 = vmul.f32 %v4918_v10, %v4917_v9  ;;  %v4919_v20 = vld [vmem:[%s8090_s1 + $0xc8] sm:$0xff] }
 0x114   :  { %v2505_v30 = vadd.f32 %v6128_v41, %v1940_v23  ;;  %3178 = vadd.xlane.f32.xlu1 %v3177_v32  ;;  %v4568_v43 = vpop.f32.mrb[22].mxu0  ;;  %v860_v44 = vpop.f32.mrb[23].mxu1  ;;  %v3180_v45 = vsel %vm299_vm0, %v3020_v24, 0.0  ;;  %v2894_v46 = vmul.f32 %v6152_v55, %v2631_v22  ;;  %v2766_v32 = vmul.f32 %v4920_v31, %v4919_v20 }
 0x115   :  { %v2634_v36 = vmax.f32 %v2506_v38, 0.0  ;;  %v1955_v49 = vadd.f32 %v4568_v43, %v4360_v42  ;;  %v1949_v50 = vpop.f32.mrb[23].mxu0  ;;  %v3023_v52 = vadd.f32 %v2895_v29, %v2760_v18  ;;  %v4921_v42 = vld [vmem:[%s8090_s1 + $0xc0] sm:$0xff] }
 0x116   :  { %v2633_v53 = vmax.f32 %v2505_v30, 0.0  ;;  %v1950_v33 = vadd.f32 %v1949_v50, %v860_v44  ;;  %3181 = vadd.xlane.f32.xlu0 %v3180_v45  ;;  %v3022_v34 = vadd.f32 %v2894_v46, %v2759_v37  ;;  %v4922_v29 = vld [vmem:[%s8091_s0 + $0xc0] sm:$0xff]  ;;  %v4924_v50 = vld [vmem:[%s8091_s0 + $0xd8] sm:$0xff] }
 0x117   :  { %v2508_v58 = vadd.f32 %v6128_v41, %v1955_v49  ;;  %v4363_v59 = vpop.f32.mrb[24].mxu1  ;;  %v2897_v60 = vmul.f32 %v6152_v55, %v2634_v36  ;;  %v3189_v4 = vsel %vm299_vm0, %v3023_v52, 0.0  ;;  %v2765_v30 = vmul.f32 %v4922_v29, %v4921_v42  ;;  %v4923_v49 = vld [vmem:[%s8090_s1 + $0xd8] sm:$0xff] }
 0x118   :  { %v2507_v61 = vadd.f32 %v6128_v41, %v1950_v33  ;;  %3184 = vadd.xlane.f32.xlu1 %v3183_v51  ;;  %v4571_v62 = vpop.f32.mrb[24].mxu0  ;;  %v870_v63 = vpop.f32.mrb[25].mxu1  ;;  %v3186_v0 = vsel %vm299_vm0, %v3022_v34, 0.0  ;;  %v2896_v1 = vmul.f32 %v6152_v55, %v2633_v53  ;;  %v2768_v51 = vmul.f32 %v4924_v50, %v4923_v49 }
 0x119   :  { %v2636_v3 = vmax.f32 %v2508_v58, 0.0  ;;  %v1965_v27 = vadd.f32 %v4571_v62, %v4363_v59  ;;  %v1959_v28 = vpop.f32.mrb[25].mxu0  ;;  %v3025_v5 = vadd.f32 %v2897_v60, %v2762_v35  ;;  %v4925_v59 = vld [vmem:[%s8090_s1 + $0xd0] sm:$0xff] }
 0x11a   :  { %v2635_v6 = vmax.f32 %v2507_v61, 0.0  ;;  %v1960_v7 = vadd.f32 %v1959_v28, %v870_v63  ;;  %3187 = vadd.xlane.f32.xlu0 %v3186_v0  ;;  %v3024_v8 = vadd.f32 %v2896_v1, %v2761_v57  ;;  %v4926_v60 = vld [vmem:[%s8091_s0 + $0xd0] sm:$0xff]  ;;  %v4928_v28 = vld [vmem:[%s8091_s0 + $0xe8] sm:$0xff] }
 0x11b   :  { %v2510_v12 = vadd.f32 %v6128_v41, %v1965_v27  ;;  %v4366_v13 = vpop.f32.mrb[26].mxu1  ;;  %v2899_v14 = vmul.f32 %v6152_v55, %v2636_v3  ;;  %v3195_v24 = vsel %vm299_vm0, %v3025_v5, 0.0  ;;  %v2767_v61 = vmul.f32 %v4926_v60, %v4925_v59  ;;  %v4927_v27 = vld [vmem:[%s8090_s1 + $0xe8] sm:$0xff] }
 0x11c   :  { %v2509_v15 = vadd.f32 %v6128_v41, %v1960_v7  ;;  %3190 = vadd.xlane.f32.xlu1 %v3189_v4  ;;  %v4574_v16 = vpop.f32.mrb[26].mxu0  ;;  %v880_v17 = vpop.f32.mrb[27].mxu1  ;;  %v3192_v18 = vsel %vm299_vm0, %v3024_v8, 0.0  ;;  %v2898_v19 = vmul.f32 %v6152_v55, %v2635_v6  ;;  %v2770_v4 = vmul.f32 %v4928_v28, %v4927_v27 }
 0x11d   :  { %v2638_v21 = vmax.f32 %v2510_v12, 0.0  ;;  %v1975_v22 = vadd.f32 %v4574_v16, %v4366_v13  ;;  %v1969_v23 = vpop.f32.mrb[27].mxu0  ;;  %v3027_v25 = vadd.f32 %v2899_v14, %v2764_v40  ;;  %v4929_v13 = vld [vmem:[%s8090_s1 + $0xe0] sm:$0xff] }
 0x11e   :  { %v2637_v26 = vmax.f32 %v2509_v15, 0.0  ;;  %v1970_v37 = vadd.f32 %v1969_v23, %v880_v17  ;;  %3193 = vadd.xlane.f32.xlu0 %v3192_v18  ;;  %v3026_v38 = vadd.f32 %v2898_v19, %v2763_v11  ;;  %v4930_v14 = vld [vmem:[%s8091_s0 + $0xe0] sm:$0xff]  ;;  %v4932_v23 = vld [vmem:[%s8091_s0 + $0xf8] sm:$0xff] }
 0x11f   :  { %v2512_v43 = vadd.f32 %v6128_v41, %v1975_v22  ;;  %v4369_v44 = vpop.f32.mrb[28].mxu1  ;;  %v2901_v45 = vmul.f32 %v6152_v55, %v2638_v21  ;;  %v3201_v34 = vsel %vm299_vm0, %v3027_v25, 0.0  ;;  %v2769_v15 = vmul.f32 %v4930_v14, %v4929_v13  ;;  %v4931_v22 = vld [vmem:[%s8090_s1 + $0xf8] sm:$0xff] }
 0x120   :  { %v2511_v46 = vadd.f32 %v6128_v41, %v1970_v37  ;;  %3196 = vadd.xlane.f32.xlu1 %v3195_v24  ;;  %v4577_v47 = vpop.f32.mrb[28].mxu0  ;;  %v890_v48 = vpop.f32.mrb[29].mxu1  ;;  %v3198_v35 = vsel %vm299_vm0, %v3026_v38, 0.0  ;;  %v2900_v36 = vmul.f32 %v6152_v55, %v2637_v26  ;;  %v2772_v24 = vmul.f32 %v4932_v23, %v4931_v22 }
 0x121   :  { %v2640_v52 = vmax.f32 %v2512_v43, 0.0  ;;  %v1985_v53 = vadd.f32 %v4577_v47, %v4369_v44  ;;  %v1979_v33 = vpop.f32.mrb[29].mxu0  ;;  %v3029_v54 = vadd.f32 %v2901_v45, %v2766_v32  ;;  %v4933_v44 = vld [vmem:[%s8090_s1 + $0xf0] sm:$0xff] }
 0x122   :  { %v2639_v56 = vmax.f32 %v2511_v46, 0.0  ;;  %v1980_v57 = vadd.f32 %v1979_v33, %v890_v48  ;;  %3199 = vadd.xlane.f32.xlu0 %v3198_v35  ;;  %v3028_v58 = vadd.f32 %v2900_v36, %v2765_v30  ;;  %v4934_v45 = vld [vmem:[%s8091_s0 + $0xf0] sm:$0xff]  ;;  %v4936_v33 = vld [vmem:[%s8091_s0 + $0x108] sm:$0xff] }
 0x123   :  { %v2514_v62 = vadd.f32 %v6128_v41, %v1985_v53  ;;  %v4372_v63 = vpop.f32.mrb[30].mxu1  ;;  %v2903_v0 = vmul.f32 %v6152_v55, %v2640_v52  ;;  %v3207_v8 = vsel %vm299_vm0, %v3029_v54, 0.0  ;;  %v2771_v46 = vmul.f32 %v4934_v45, %v4933_v44  ;;  %v4935_v53 = vld [vmem:[%s8090_s1 + $0x108] sm:$0xff] }
 0x124   :  { %v2513_v1 = vadd.f32 %v6128_v41, %v1980_v57  ;;  %3202 = vadd.xlane.f32.xlu1 %v3201_v34  ;;  %v4580_v2 = vpop.f32.mrb[30].mxu0  ;;  %v900_v39 = vpop.f32.mrb[31].mxu1  ;;  %v3204_v40 = vsel %vm299_vm0, %v3028_v58, 0.0  ;;  %v2902_v3 = vmul.f32 %v6152_v55, %v2639_v56  ;;  %v2774_v34 = vmul.f32 %v4936_v33, %v4935_v53 }
 0x125   :  { %v2642_v5 = vmax.f32 %v2514_v62, 0.0  ;;  %v1995_v6 = vadd.f32 %v4580_v2, %v4372_v63  ;;  %v1989_v7 = vpop.f32.mrb[31].mxu0  ;;  %v3031_v9 = vadd.f32 %v2903_v0, %v2768_v51  ;;  %v4937_v63 = vld [vmem:[%s8090_s1 + $0x100] sm:$0xff] }
 0x126   :  { %v2641_v10 = vmax.f32 %v2513_v1, 0.0  ;;  %v1990_v11 = vadd.f32 %v1989_v7, %v900_v39  ;;  %3205 = vadd.xlane.f32.xlu0 %v3204_v40  ;;  %v3030_v12 = vadd.f32 %v2902_v3, %v2767_v61  ;;  %v4938_v0 = vld [vmem:[%s8091_s0 + $0x100] sm:$0xff]  ;;  %v4940_v7 = vld [vmem:[%s8091_s0 + $0x118] sm:$0xff] }
 0x127   :  { %v2516_v16 = vadd.f32 %v6128_v41, %v1995_v6  ;;  %v4375_v17 = vpop.f32.mrb[32].mxu1  ;;  %v2905_v18 = vmul.f32 %v6152_v55, %v2642_v5  ;;  %v3213_v38 = vsel %vm299_vm0, %v3031_v9, 0.0  ;;  %v2773_v1 = vmul.f32 %v4938_v0, %v4937_v63  ;;  %v4939_v6 = vld [vmem:[%s8090_s1 + $0x118] sm:$0xff] }
 0x128   :  { %v2515_v19 = vadd.f32 %v6128_v41, %v1990_v11  ;;  %3208 = vadd.xlane.f32.xlu1 %v3207_v8  ;;  %v4583_v20 = vpop.f32.mrb[32].mxu0  ;;  %v910_v31 = vpop.f32.mrb[33].mxu1  ;;  %v3210_v32 = vsel %vm299_vm0, %v3030_v12, 0.0  ;;  %v2904_v21 = vmul.f32 %v6152_v55, %v2641_v10  ;;  %v2776_v8 = vmul.f32 %v4940_v7, %v4939_v6 }
 0x129   :  { %v2644_v25 = vmax.f32 %v2516_v16, 0.0  ;;  %v2005_v26 = vadd.f32 %v4583_v20, %v4375_v17  ;;  %v1999_v37 = vpop.f32.mrb[33].mxu0  ;;  %v3033_v42 = vadd.f32 %v2905_v18, %v2770_v4  ;;  %v4941_v17 = vld [vmem:[%s8090_s1 + $0x110] sm:$0xff] }
 0x12a   :  { %v2643_v29 = vmax.f32 %v2515_v19, 0.0  ;;  %v2000_v30 = vadd.f32 %v1999_v37, %v910_v31  ;;  %3211 = vadd.xlane.f32.xlu0 %v3210_v32  ;;  %v3032_v43 = vadd.f32 %v2904_v21, %v2769_v15  ;;  %v4942_v18 = vld [vmem:[%s8091_s0 + $0x110] sm:$0xff]  ;;  %v4944_v37 = vld [vmem:[%s8091_s0 + $0x128] sm:$0xff] }
 0x12b   :  { %v2518_v47 = vadd.f32 %v6128_v41, %v2005_v26  ;;  %v4378_v48 = vpop.f32.mrb[34].mxu1  ;;  %v2907_v35 = vmul.f32 %v6152_v55, %v2644_v25  ;;  %v3219_v58 = vsel %vm299_vm0, %v3033_v42, 0.0  ;;  %v2775_v19 = vmul.f32 %v4942_v18, %v4941_v17  ;;  %v4943_v26 = vld [vmem:[%s8090_s1 + $0x128] sm:$0xff] }
 0x12c   :  { %v2517_v36 = vadd.f32 %v6128_v41, %v2000_v30  ;;  %3214 = vadd.xlane.f32.xlu1 %v3213_v38  ;;  %v4586_v49 = vpop.f32.mrb[34].mxu0  ;;  %v920_v50 = vpop.f32.mrb[35].mxu1  ;;  %v3216_v51 = vsel %vm299_vm0, %v3032_v43, 0.0  ;;  %v2906_v52 = vmul.f32 %v6152_v55, %v2643_v29  ;;  %v2778_v38 = vmul.f32 %v4944_v37, %v4943_v26 }
 0x12d   :  { %v2646_v54 = vmax.f32 %v2518_v47, 0.0  ;;  %v2015_v56 = vadd.f32 %v4586_v49, %v4378_v48  ;;  %v2009_v57 = vpop.f32.mrb[35].mxu0  ;;  %v3035_v59 = vadd.f32 %v2907_v35, %v2772_v24  ;;  %v4945_v48 = vld [vmem:[%s8090_s1 + $0x120] sm:$0xff] }
 0x12e   :  { %v2645_v60 = vmax.f32 %v2517_v36, 0.0  ;;  %v2010_v61 = vadd.f32 %v2009_v57, %v920_v50  ;;  %3217 = vadd.xlane.f32.xlu0 %v3216_v51  ;;  %v3034_v62 = vadd.f32 %v2906_v52, %v2771_v46  ;;  %v4946_v35 = vld [vmem:[%s8091_s0 + $0x120] sm:$0xff]  ;;  %v4948_v57 = vld [vmem:[%s8091_s0 + $0x138] sm:$0xff] }
 0x12f   :  { %v2520_v2 = vadd.f32 %v6128_v41, %v2015_v56  ;;  %v4381_v39 = vpop.f32.mrb[36].mxu1  ;;  %v2909_v40 = vmul.f32 %v6152_v55, %v2646_v54  ;;  %v3225_v12 = vsel %vm299_vm0, %v3035_v59, 0.0  ;;  %v2777_v36 = vmul.f32 %v4946_v35, %v4945_v48  ;;  %v4947_v56 = vld [vmem:[%s8090_s1 + $0x138] sm:$0xff] }
 0x130   :  { %v2519_v3 = vadd.f32 %v6128_v41, %v2010_v61  ;;  %3220 = vadd.xlane.f32.xlu1 %v3219_v58  ;;  %v4589_v27 = vpop.f32.mrb[36].mxu0  ;;  %v930_v28 = vpop.f32.mrb[37].mxu1  ;;  %v3222_v4 = vsel %vm299_vm0, %v3034_v62, 0.0  ;;  %v2908_v5 = vmul.f32 %v6152_v55, %v2645_v60  ;;  %v2780_v58 = vmul.f32 %v4948_v57, %v4947_v56 }
 0x131   :  { %v2648_v9 = vmax.f32 %v2520_v2, 0.0  ;;  %v2025_v10 = vadd.f32 %v4589_v27, %v4381_v39  ;;  %v2019_v11 = vpop.f32.mrb[37].mxu0  ;;  %v3037_v13 = vadd.f32 %v2909_v40, %v2774_v34  ;;  %v4949_v39 = vld [vmem:[%s8090_s1 + $0x130] sm:$0xff] }
 0x132   :  { %v2647_v14 = vmax.f32 %v2519_v3, 0.0  ;;  %v2020_v15 = vadd.f32 %v2019_v11, %v930_v28  ;;  %3223 = vadd.xlane.f32.xlu0 %v3222_v4  ;;  %v3036_v16 = vadd.f32 %v2908_v5, %v2773_v1  ;;  %v4950_v40 = vld [vmem:[%s8091_s0 + $0x130] sm:$0xff]  ;;  %v4952_v11 = vld [vmem:[%s8091_s0 + $0x148] sm:$0xff] }
 0x133   :  { %v2522_v20 = vadd.f32 %v6128_v41, %v2025_v10  ;;  %v4384_v31 = vpop.f32.mrb[38].mxu1  ;;  %v2911_v32 = vmul.f32 %v6152_v55, %v2648_v9  ;;  %v3231_v43 = vsel %vm299_vm0, %v3037_v13, 0.0  ;;  %v2779_v3 = vmul.f32 %v4950_v40, %v4949_v39  ;;  %v4951_v10 = vld [vmem:[%s8090_s1 + $0x148] sm:$0xff] }
 0x134   :  { %v2521_v21 = vadd.f32 %v6128_v41, %v2020_v15  ;;  %3226 = vadd.xlane.f32.xlu1 %v3225_v12  ;;  %v4592_v22 = vpop.f32.mrb[38].mxu0  ;;  %v940_v23 = vpop.f32.mrb[39].mxu1  ;;  %v3228_v24 = vsel %vm299_vm0, %v3036_v16, 0.0  ;;  %v2910_v25 = vmul.f32 %v6152_v55, %v2647_v14  ;;  %v2782_v12 = vmul.f32 %v4952_v11, %v4951_v10 }
 0x135   :  { %v2650_v42 = vmax.f32 %v2522_v20, 0.0  ;;  %v2035_v29 = vadd.f32 %v4592_v22, %v4384_v31  ;;  %v2029_v30 = vpop.f32.mrb[39].mxu0  ;;  %v3039_v44 = vadd.f32 %v2911_v32, %v2776_v8  ;;  %v4953_v31 = vld [vmem:[%s8090_s1 + $0x140] sm:$0xff] }
 0x136   :  { %v2649_v45 = vmax.f32 %v2521_v21, 0.0  ;;  %v2030_v46 = vadd.f32 %v2029_v30, %v940_v23  ;;  %3229 = vadd.xlane.f32.xlu0 %v3228_v24  ;;  %v3038_v47 = vadd.f32 %v2910_v25, %v2775_v19  ;;  %v4954_v32 = vld [vmem:[%s8091_s0 + $0x140] sm:$0xff]  ;;  %v4956_v30 = vld [vmem:[%s8091_s0 + $0x158] sm:$0xff] }
 0x137   :  { %v2524_v49 = vadd.f32 %v6128_v41, %v2035_v29  ;;  %v4387_v50 = vpop.f32.mrb[40].mxu1  ;;  %v2913_v51 = vmul.f32 %v6152_v55, %v2650_v42  ;;  %v3237_v62 = vsel %vm299_vm0, %v3039_v44, 0.0  ;;  %v2781_v21 = vmul.f32 %v4954_v32, %v4953_v31  ;;  %v4955_v29 = vld [vmem:[%s8090_s1 + $0x158] sm:$0xff] }
 0x138   :  { %v2523_v52 = vadd.f32 %v6128_v41, %v2030_v46  ;;  %3232 = vadd.xlane.f32.xlu1 %v3231_v43  ;;  %v4595_v53 = vpop.f32.mrb[40].mxu0  ;;  %v950_v33 = vpop.f32.mrb[41].mxu1  ;;  %v3234_v34 = vsel %vm299_vm0, %v3038_v47, 0.0  ;;  %v2912_v54 = vmul.f32 %v6152_v55, %v2649_v45  ;;  %v2784_v43 = vmul.f32 %v4956_v30, %v4955_v29 }
 0x139   :  { %v2652_v59 = vmax.f32 %v2524_v49, 0.0  ;;  %v2045_v60 = vadd.f32 %v4595_v53, %v4387_v50  ;;  %v2039_v61 = vpop.f32.mrb[41].mxu0  ;;  %v3041_v63 = vadd.f32 %v2913_v51, %v2778_v38  ;;  %v4957_v49 = vld [vmem:[%s8090_s1 + $0x150] sm:$0xff] }
 0x13a   :  { %v2651_v0 = vmax.f32 %v2523_v52, 0.0  ;;  %v2040_v1 = vadd.f32 %v2039_v61, %v950_v33  ;;  %3235 = vadd.xlane.f32.xlu0 %v3234_v34  ;;  %v3040_v2 = vadd.f32 %v2912_v54, %v2777_v36  ;;  %v4958_v50 = vld [vmem:[%s8091_s0 + $0x150] sm:$0xff]  ;;  %v6655_v52 = vld [vmem:[%s8092_s4] ss:$0 sm:$0xff]  ;;  %v4961_v61 = vld [vmem:[%s8091_s0 + $0x168] sm:$0xff] }
 0x13b   :  { %v2526_v27 = vadd.f32 %v6128_v41, %v2045_v60  ;;  %v4390_v28 = vpop.f32.mrb[42].mxu1  ;;  %v2915_v4 = vmul.f32 %v6152_v55, %v2652_v59  ;;  %v3243_v16 = vsel %vm299_vm0, %v3041_v63, 0.0  ;;  %v2783_v51 = vmul.f32 %v4958_v50, %v4957_v49  ;;  %v4960_v60 = vld [vmem:[%s8090_s1 + $0x168] sm:$0xff] }
 0x13c   :  { %v2525_v5 = vadd.f32 %v6128_v41, %v2040_v1  ;;  %3238 = vadd.xlane.f32.xlu1 %v3237_v62  ;;  %v4598_v6 = vpop.f32.mrb[42].mxu0  ;;  %v960_v7 = vpop.f32.mrb[43].mxu1  ;;  %v3240_v8 = vsel %vm299_vm0, %v3040_v2, 0.0  ;;  %v2914_v9 = vmul.f32 %v6152_v55, %v2651_v0  ;;  %v2786_v62 = vmul.f32 %v4961_v61, %v4960_v60 }
 0x13d   :  { %v2654_v13 = vmax.f32 %v2526_v27, 0.0  ;;  %v2055_v14 = vadd.f32 %v4598_v6, %v4390_v28  ;;  %v2049_v15 = vpop.f32.mrb[43].mxu0  ;;  %v3043_v17 = vadd.f32 %v2915_v4, %v2780_v58  ;;  %v4963_v28 = vld [vmem:[%s8091_s0 + $0x160] sm:$0xff] }
 0x13e   :  { %v2653_v18 = vmax.f32 %v2525_v5, 0.0  ;;  %v2050_v19 = vadd.f32 %v2049_v15, %v960_v7  ;;  %3241 = vadd.xlane.f32.xlu0 %v3240_v8  ;;  %v3042_v20 = vadd.f32 %v2914_v9, %v2779_v3  ;;  %v6679_v7 = vld [vmem:[%s8093_s5] ss:$0 sm:$0xff]  ;;  %v4966_v15 = vld [vmem:[%s8091_s0 + $0x178] sm:$0xff] }
 0x13f   :  { %v2528_v22 = vadd.f32 %v6128_v41, %v2055_v14  ;;  %v4393_v23 = vpop.f32.mrb[44].mxu1  ;;  %v2917_v24 = vmul.f32 %v6152_v55, %v2654_v13  ;;  %v4965_v14 = vld [vmem:[%s8090_s1 + $0x178] sm:$0xff] }
 0x140   :  { %v2527_v25 = vadd.f32 %v6128_v41, %v2050_v19  ;;  %3244 = vadd.xlane.f32.xlu1 %v3243_v16  ;;  %v4601_v26 = vpop.f32.mrb[44].mxu0  ;;  %v970_v37 = vpop.f32.mrb[45].mxu1  ;;  %v3246_v38 = vsel %vm299_vm0, %v3042_v20, 0.0  ;;  %v2916_v42 = vmul.f32 %v6152_v55, %v2653_v18  ;;  %v3249_v41 = vsel %vm299_vm0, %v3043_v17, 0.0 }
 0x141   :  { %v2656_v44 = vmax.f32 %v2528_v22, 0.0  ;;  %v2065_v45 = vadd.f32 %v4601_v26, %v4393_v23  ;;  %v2059_v46 = vpop.f32.mrb[45].mxu0  ;;  %v3045_v47 = vadd.f32 %v2917_v24, %v2782_v12  ;;  %v2788_v16 = vmul.f32 %v4966_v15, %v4965_v14  ;;  %v4967_v23 = vld [vmem:[%s8090_s1 + $0x170] sm:$0xff] }
 0x142   :  { %v2655_v48 = vmax.f32 %v2527_v25, 0.0  ;;  %v2060_v35 = vadd.f32 %v2059_v46, %v970_v37  ;;  %3247 = vadd.xlane.f32.xlu0 %v3246_v38  ;;  %v3044_v36 = vadd.f32 %v2916_v42, %v2781_v21  ;;  %v4968_v24 = vld [vmem:[%s8091_s0 + $0x170] sm:$0xff]  ;;  %v4970_v46 = vld [vmem:[%s8091_s0 + $0x188] sm:$0xff] }
 0x143   :  { %v2530_v53 = vadd.f32 %v6655_v52, %v2065_v45  ;;  %v4396_v33 = vpop.f32.mrb[46].mxu1  ;;  %v2919_v34 = vmul.f32 %v6152_v55, %v2656_v44  ;;  %v3255_v2 = vsel %vm299_vm0, %v3045_v47, 0.0  ;;  %v2787_v25 = vmul.f32 %v4968_v24, %v4967_v23  ;;  %v4969_v45 = vld [vmem:[%s8090_s1 + $0x188] sm:$0xff] }
 0x144   :  { %v2529_v54 = vadd.f32 %v6655_v52, %v2060_v35  ;;  %3250 = vadd.xlane.f32.xlu1 %v3249_v41  ;;  %v4604_v56 = vpop.f32.mrb[46].mxu0  ;;  %v980_v57 = vpop.f32.mrb[47].mxu1  ;;  %v3252_v58 = vsel %vm299_vm0, %v3044_v36, 0.0  ;;  %v2918_v59 = vmul.f32 %v6152_v55, %v2655_v48  ;;  %v4962_v55 = vld [vmem:[%s8090_s1 + $0x160] sm:$0xff]  ;;  %v2790_v41 = vmul.f32 %v4970_v46, %v4969_v45 }
 0x145   :  { %v2658_v63 = vmax.f32 %v2530_v53, 0.0  ;;  %v2075_v0 = vadd.f32 %v4604_v56, %v4396_v33  ;;  %v2069_v1 = vpop.f32.mrb[47].mxu0  ;;  %v3047_v39 = vadd.f32 %v2919_v34, %v2784_v43  ;;  %v2785_v4 = vmul.f32 %v4963_v28, %v4962_v55  ;;  %v4971_v33 = vld [vmem:[%s8090_s1 + $0x180] sm:$0xff] }
 0x146   :  { %v2657_v40 = vmax.f32 %v2529_v54, 0.0  ;;  %v2070_v3 = vadd.f32 %v2069_v1, %v980_v57  ;;  %3253 = vadd.xlane.f32.xlu0 %v3252_v58  ;;  %v3046_v27 = vadd.f32 %v2918_v59, %v2783_v51  ;;  %v4972_v34 = vld [vmem:[%s8091_s0 + $0x180] sm:$0xff]  ;;  %v4974_v1 = vld [vmem:[%s8091_s0 + $0x198] sm:$0xff] }
 0x147   :  { %v2532_v5 = vadd.f32 %v6655_v52, %v2075_v0  ;;  %v4399_v6 = vpop.f32.mrb[48].mxu1  ;;  %v2921_v8 = vmul.f32 %v6679_v7, %v2658_v63  ;;  %v3261_v20 = vsel %vm299_vm0, %v3047_v39, 0.0  ;;  %v2789_v54 = vmul.f32 %v4972_v34, %v4971_v33  ;;  %v4973_v0 = vld [vmem:[%s8090_s1 + $0x198] sm:$0xff] }
 0x148   :  { %v2531_v9 = vadd.f32 %v6655_v52, %v2070_v3  ;;  %3256 = vadd.xlane.f32.xlu1 %v3255_v2  ;;  %v4607_v10 = vpop.f32.mrb[48].mxu0  ;;  %v990_v11 = vpop.f32.mrb[49].mxu1  ;;  %v3258_v12 = vsel %vm299_vm0, %v3046_v27, 0.0  ;;  %v2920_v13 = vmul.f32 %v6679_v7, %v2657_v40  ;;  %v2792_v2 = vmul.f32 %v4974_v1, %v4973_v0 }
 0x149   :  { %v2660_v17 = vmax.f32 %v2532_v5, 0.0  ;;  %v2085_v18 = vadd.f32 %v4607_v10, %v4399_v6  ;;  %v2079_v19 = vpop.f32.mrb[49].mxu0  ;;  %v3049_v31 = vadd.f32 %v2921_v8, %v2786_v62  ;;  %v4975_v6 = vld [vmem:[%s8090_s1 + $0x190] sm:$0xff] }
 0x14a   :  { %v2659_v32 = vmax.f32 %v2531_v9, 0.0  ;;  %v2080_v21 = vadd.f32 %v2079_v19, %v990_v11  ;;  %3259 = vadd.xlane.f32.xlu0 %v3258_v12  ;;  %v3048_v22 = vadd.f32 %v2920_v13, %v2785_v4  ;;  %v4976_v8 = vld [vmem:[%s8091_s0 + $0x190] sm:$0xff]  ;;  %v4978_v19 = vld [vmem:[%s8091_s0 + $0x1a8] sm:$0xff] }
 0x14b   :  { %v2534_v26 = vadd.f32 %v6655_v52, %v2085_v18  ;;  %v4402_v37 = vpop.f32.mrb[50].mxu1  ;;  %v2923_v38 = vmul.f32 %v6679_v7, %v2660_v17  ;;  %v3267_v36 = vsel %vm299_vm0, %v3049_v31, 0.0  ;;  %v2791_v9 = vmul.f32 %v4976_v8, %v4975_v6  ;;  %v4977_v18 = vld [vmem:[%s8090_s1 + $0x1a8] sm:$0xff] }
 0x14c   :  { %v2533_v42 = vadd.f32 %v6655_v52, %v2080_v21  ;;  %3262 = vadd.xlane.f32.xlu1 %v3261_v20  ;;  %v4610_v29 = vpop.f32.mrb[50].mxu0  ;;  %v1000_v30 = vpop.f32.mrb[51].mxu1  ;;  %v3264_v43 = vsel %vm299_vm0, %v3048_v22, 0.0  ;;  %v2922_v44 = vmul.f32 %v6679_v7, %v2659_v32  ;;  %v2794_v20 = vmul.f32 %v4978_v19, %v4977_v18 }
 0x14d   :  { %v2662_v47 = vmax.f32 %v2534_v26, 0.0  ;;  %v2095_v48 = vadd.f32 %v4610_v29, %v4402_v37  ;;  %v2089_v35 = vpop.f32.mrb[51].mxu0  ;;  %v3051_v49 = vadd.f32 %v2923_v38, %v2788_v16  ;;  %v4979_v37 = vld [vmem:[%s8090_s1 + $0x1a0] sm:$0xff] }
 0x14e   :  { %v2661_v50 = vmax.f32 %v2533_v42, 0.0  ;;  %v2090_v51 = vadd.f32 %v2089_v35, %v1000_v30  ;;  %3265 = vadd.xlane.f32.xlu0 %v3264_v43  ;;  %v3050_v53 = vadd.f32 %v2922_v44, %v2787_v25  ;;  %v4980_v38 = vld [vmem:[%s8091_s0 + $0x1a0] sm:$0xff]  ;;  %v4982_v35 = vld [vmem:[%s8091_s0 + $0x1b8] sm:$0xff] }
 0x14f   :  { %v2536_v56 = vadd.f32 %v6655_v52, %v2095_v48  ;;  %v4405_v57 = vpop.f32.mrb[52].mxu1  ;;  %v2925_v58 = vmul.f32 %v6679_v7, %v2662_v47  ;;  %v3273_v27 = vsel %vm299_vm0, %v3051_v49, 0.0  ;;  %v2793_v42 = vmul.f32 %v4980_v38, %v4979_v37  ;;  %v4981_v48 = vld [vmem:[%s8090_s1 + $0x1b8] sm:$0xff] }
 0x150   :  { %v2535_v59 = vadd.f32 %v6655_v52, %v2090_v51  ;;  %3268 = vadd.xlane.f32.xlu1 %v3267_v36  ;;  %v4613_v60 = vpop.f32.mrb[52].mxu0  ;;  %v1010_v61 = vpop.f32.mrb[53].mxu1  ;;  %v3270_v62 = vsel %vm299_vm0, %v3050_v53, 0.0  ;;  %v2924_v63 = vmul.f32 %v6679_v7, %v2661_v50  ;;  %v2796_v36 = vmul.f32 %v4982_v35, %v4981_v48 }
 0x151   :  { %v2664_v39 = vmax.f32 %v2536_v56, 0.0  ;;  %v2105_v40 = vadd.f32 %v4613_v60, %v4405_v57  ;;  %v2099_v3 = vpop.f32.mrb[53].mxu0  ;;  %v3053_v55 = vadd.f32 %v2925_v58, %v2790_v41  ;;  %v4983_v57 = vld [vmem:[%s8090_s1 + $0x1b0] sm:$0xff] }
 0x152   :  { %v2663_v28 = vmax.f32 %v2535_v59, 0.0  ;;  %v2100_v4 = vadd.f32 %v2099_v3, %v1010_v61  ;;  %3271 = vadd.xlane.f32.xlu0 %v3270_v62  ;;  %v3052_v5 = vadd.f32 %v2924_v63, %v2789_v54  ;;  %v4984_v58 = vld [vmem:[%s8091_s0 + $0x1b0] sm:$0xff]  ;;  %v4986_v3 = vld [vmem:[%s8091_s0 + $0x1c8] sm:$0xff] }
 0x153   :  { %v2538_v10 = vadd.f32 %v6655_v52, %v2105_v40  ;;  %v4408_v11 = vpop.f32.mrb[54].mxu1  ;;  %v2927_v12 = vmul.f32 %v6679_v7, %v2664_v39  ;;  %v3279_v22 = vsel %vm299_vm0, %v3053_v55, 0.0  ;;  %v2795_v59 = vmul.f32 %v4984_v58, %v4983_v57  ;;  %v4985_v40 = vld [vmem:[%s8090_s1 + $0x1c8] sm:$0xff] }
 0x154   :  { %v2537_v13 = vadd.f32 %v6655_v52, %v2100_v4  ;;  %3274 = vadd.xlane.f32.xlu1 %v3273_v27  ;;  %v4616_v14 = vpop.f32.mrb[54].mxu0  ;;  %v1020_v15 = vpop.f32.mrb[55].mxu1  ;;  %v3276_v16 = vsel %vm299_vm0, %v3052_v5, 0.0  ;;  %v2926_v17 = vmul.f32 %v6679_v7, %v2663_v28  ;;  %v2798_v27 = vmul.f32 %v4986_v3, %v4985_v40 }
 0x155   :  { %v2666_v31 = vmax.f32 %v2538_v10, 0.0  ;;  %v2115_v32 = vadd.f32 %v4616_v14, %v4408_v11  ;;  %v2109_v21 = vpop.f32.mrb[55].mxu0  ;;  %v3055_v23 = vadd.f32 %v2927_v12, %v2792_v2  ;;  %v4987_v11 = vld [vmem:[%s8090_s1 + $0x1c0] sm:$0xff] }
 0x156   :  { %v2665_v24 = vmax.f32 %v2537_v13, 0.0  ;;  %v2110_v25 = vadd.f32 %v2109_v21, %v1020_v15  ;;  %3277 = vadd.xlane.f32.xlu0 %v3276_v16  ;;  %v3054_v26 = vadd.f32 %v2926_v17, %v2791_v9  ;;  %v4988_v12 = vld [vmem:[%s8091_s0 + $0x1c0] sm:$0xff]  ;;  %v4990_v21 = vld [vmem:[%s8091_s0 + $0x1d8] sm:$0xff] }
 0x157   :  { %v2540_v29 = vadd.f32 %v6655_v52, %v2115_v32  ;;  %v4411_v30 = vpop.f32.mrb[56].mxu1  ;;  %v2929_v43 = vmul.f32 %v6679_v7, %v2666_v31  ;;  %v3285_v53 = vsel %vm299_vm0, %v3055_v23, 0.0  ;;  %v2797_v13 = vmul.f32 %v4988_v12, %v4987_v11  ;;  %v4989_v32 = vld [vmem:[%s8090_s1 + $0x1d8] sm:$0xff] }
 0x158   :  { %v2539_v44 = vadd.f32 %v6655_v52, %v2110_v25  ;;  %3280 = vadd.xlane.f32.xlu1 %v3279_v22  ;;  %v4619_v45 = vpop.f32.mrb[56].mxu0  ;;  %v1030_v46 = vpop.f32.mrb[57].mxu1  ;;  %v3282_v41 = vsel %vm299_vm0, %v3054_v26, 0.0  ;;  %v2928_v47 = vmul.f32 %v6679_v7, %v2665_v24  ;;  %v2800_v22 = vmul.f32 %v4990_v21, %v4989_v32 }
 0x159   :  { %v2668_v49 = vmax.f32 %v2540_v29, 0.0  ;;  %v2125_v50 = vadd.f32 %v4619_v45, %v4411_v30  ;;  %v2119_v51 = vpop.f32.mrb[57].mxu0  ;;  %v3057_v33 = vadd.f32 %v2929_v43, %v2794_v20  ;;  %v4991_v30 = vld [vmem:[%s8090_s1 + $0x1d0] sm:$0xff] }
 0x15a   :  { %v2667_v34 = vmax.f32 %v2539_v44, 0.0  ;;  %v2120_v54 = vadd.f32 %v2119_v51, %v1030_v46  ;;  %3283 = vadd.xlane.f32.xlu0 %v3282_v41  ;;  %v3056_v56 = vadd.f32 %v2928_v47, %v2793_v42  ;;  %v4992_v43 = vld [vmem:[%s8091_s0 + $0x1d0] sm:$0xff]  ;;  %v4994_v51 = vld [vmem:[%s8091_s0 + $0x1e8] sm:$0xff] }
 0x15b   :  { %v2542_v60 = vadd.f32 %v6655_v52, %v2125_v50  ;;  %v4414_v61 = vpop.f32.mrb[58].mxu1  ;;  %v2931_v62 = vmul.f32 %v6679_v7, %v2668_v49  ;;  %v3291_v5 = vsel %vm299_vm0, %v3057_v33, 0.0  ;;  %v2799_v44 = vmul.f32 %v4992_v43, %v4991_v30  ;;  %v4993_v50 = vld [vmem:[%s8090_s1 + $0x1e8] sm:$0xff] }
 0x15c   :  { %v2541_v63 = vadd.f32 %v6655_v52, %v2120_v54  ;;  %3286 = vadd.xlane.f32.xlu1 %v3285_v53  ;;  %v4622_v0 = vpop.f32.mrb[58].mxu0  ;;  %v1040_v1 = vpop.f32.mrb[59].mxu1  ;;  %v3288_v2 = vsel %vm299_vm0, %v3056_v56, 0.0  ;;  %v2930_v39 = vmul.f32 %v6679_v7, %v2667_v34  ;;  %v2802_v53 = vmul.f32 %v4994_v51, %v4993_v50 }
 0x15d   :  { %v2670_v55 = vmax.f32 %v2542_v60, 0.0  ;;  %v2135_v28 = vadd.f32 %v4622_v0, %v4414_v61  ;;  %v2129_v4 = vpop.f32.mrb[59].mxu0  ;;  %v3059_v6 = vadd.f32 %v2931_v62, %v2796_v36  ;;  %v4995_v61 = vld [vmem:[%s8090_s1 + $0x1e0] sm:$0xff] }
 0x15e   :  { %v2669_v8 = vmax.f32 %v2541_v63, 0.0  ;;  %v2130_v9 = vadd.f32 %v2129_v4, %v1040_v1  ;;  %3289 = vadd.xlane.f32.xlu0 %v3288_v2  ;;  %v3058_v10 = vadd.f32 %v2930_v39, %v2795_v59  ;;  %v4996_v62 = vld [vmem:[%s8091_s0 + $0x1e0] sm:$0xff]  ;;  %v4998_v4 = vld [vmem:[%s8091_s0 + $0x1f8] sm:$0xff] }
 0x15f   :  { %v2544_v14 = vadd.f32 %v6655_v52, %v2135_v28  ;;  %v4417_v15 = vpop.f32.mrb[60].mxu1  ;;  %v2933_v16 = vmul.f32 %v6679_v7, %v2670_v55  ;;  %v3297_v26 = vsel %vm299_vm0, %v3059_v6, 0.0  ;;  %v2801_v63 = vmul.f32 %v4996_v62, %v4995_v61  ;;  %v4997_v28 = vld [vmem:[%s8090_s1 + $0x1f8] sm:$0xff] }
 0x160   :  { %v2543_v17 = vadd.f32 %v6655_v52, %v2130_v9  ;;  %3292 = vadd.xlane.f32.xlu1 %v3291_v5  ;;  %v4625_v18 = vpop.f32.mrb[60].mxu0  ;;  %v1050_v19 = vpop.f32.mrb[61].mxu1  ;;  %v3294_v20 = vsel %vm299_vm0, %v3058_v10, 0.0  ;;  %v2932_v31 = vmul.f32 %v6679_v7, %v2669_v8  ;;  %v2804_v5 = vmul.f32 %v4998_v4, %v4997_v28 }
 0x161   :  { %v2672_v23 = vmax.f32 %v2544_v14, 0.0  ;;  %v2145_v24 = vadd.f32 %v4625_v18, %v4417_v15  ;;  %v2139_v25 = vpop.f32.mrb[61].mxu0  ;;  %v3061_v37 = vadd.f32 %v2933_v16, %v2798_v27  ;;  %v4999_v15 = vld [vmem:[%s8090_s1 + $0x1f0] sm:$0xff] }
 0x162   :  { %v2671_v38 = vmax.f32 %v2543_v17, 0.0  ;;  %v2140_v42 = vadd.f32 %v2139_v25, %v1050_v19  ;;  %3295 = vadd.xlane.f32.xlu0 %v3294_v20  ;;  %v3060_v29 = vadd.f32 %v2932_v31, %v2797_v13  ;;  %v5000_v16 = vld [vmem:[%s8091_s0 + $0x1f0] sm:$0xff]  ;;  %v5002_v25 = vld [vmem:[%s8091_s0 + $0x208] sm:$0xff] }
 0x163   :  { %v2546_v45 = vadd.f32 %v6655_v52, %v2145_v24  ;;  %v4420_v46 = vpop.f32.mrb[62].mxu1  ;;  %v2935_v41 = vmul.f32 %v6679_v7, %v2672_v23  ;;  %v3303_v56 = vsel %vm299_vm0, %v3061_v37, 0.0  ;;  %v2803_v17 = vmul.f32 %v5000_v16, %v4999_v15  ;;  %v5001_v24 = vld [vmem:[%s8090_s1 + $0x208] sm:$0xff] }
 0x164   :  { %v2545_v47 = vadd.f32 %v6655_v52, %v2140_v42  ;;  %3298 = vadd.xlane.f32.xlu1 %v3297_v26  ;;  %v4628_v48 = vpop.f32.mrb[62].mxu0  ;;  %v1060_v35 = vpop.f32.mrb[63].mxu1  ;;  %v3300_v36 = vsel %vm299_vm0, %v3060_v29, 0.0  ;;  %v2934_v49 = vmul.f32 %v6679_v7, %v2671_v38  ;;  %v2806_v26 = vmul.f32 %v5002_v25, %v5001_v24 }
 0x165   :  { %v2674_v33 = vmax.f32 %v2546_v45, 0.0  ;;  %v2155_v34 = vadd.f32 %v4628_v48, %v4420_v46  ;;  %v2149_v54 = vpop.f32.mrb[63].mxu0  ;;  %v3063_v57 = vadd.f32 %v2935_v41, %v2800_v22  ;;  %v5003_v46 = vld [vmem:[%s8090_s1 + $0x200] sm:$0xff] }
 0x166   :  { %v2673_v58 = vmax.f32 %v2545_v47, 0.0  ;;  %v2150_v59 = vadd.f32 %v2149_v54, %v1060_v35  ;;  %3301 = vadd.xlane.f32.xlu0 %v3300_v36  ;;  %v3062_v60 = vadd.f32 %v2934_v49, %v2799_v44  ;;  %v5004_v41 = vld [vmem:[%s8091_s0 + $0x200] sm:$0xff]  ;;  %v5006_v54 = vld [vmem:[%s8091_s0 + $0x218] sm:$0xff] }
 0x167   :  { %v2548_v0 = vadd.f32 %v6655_v52, %v2155_v34  ;;  %v4423_v1 = vpop.f32.mrb[64].mxu1  ;;  %v2937_v2 = vmul.f32 %v6679_v7, %v2674_v33  ;;  %v3309_v10 = vsel %vm299_vm0, %v3063_v57, 0.0  ;;  %v2805_v47 = vmul.f32 %v5004_v41, %v5003_v46  ;;  %v5005_v34 = vld [vmem:[%s8090_s1 + $0x218] sm:$0xff] }
 0x168   :  { %v2547_v39 = vadd.f32 %v6655_v52, %v2150_v59  ;;  %3304 = vadd.xlane.f32.xlu1 %v3303_v56  ;;  %v4631_v40 = vpop.f32.mrb[64].mxu0  ;;  %v1070_v3 = vpop.f32.mrb[65].mxu1  ;;  %v3306_v27 = vsel %vm299_vm0, %v3062_v60, 0.0  ;;  %v2936_v55 = vmul.f32 %v6679_v7, %v2673_v58  ;;  %v2808_v56 = vmul.f32 %v5006_v54, %v5005_v34 }
 0x169   :  { %v2676_v6 = vmax.f32 %v2548_v0, 0.0  ;;  %v2165_v8 = vadd.f32 %v4631_v40, %v4423_v1  ;;  %v2159_v9 = vpop.f32.mrb[65].mxu0  ;;  %v3065_v11 = vadd.f32 %v2937_v2, %v2802_v53  ;;  %v5007_v1 = vld [vmem:[%s8090_s1 + $0x210] sm:$0xff] }
 0x16a   :  { %v2675_v12 = vmax.f32 %v2547_v39, 0.0  ;;  %v2160_v13 = vadd.f32 %v2159_v9, %v1070_v3  ;;  %3307 = vadd.xlane.f32.xlu0 %v3306_v27  ;;  %v3064_v14 = vadd.f32 %v2936_v55, %v2801_v63  ;;  %v5008_v2 = vld [vmem:[%s8091_s0 + $0x210] sm:$0xff]  ;;  %v5010_v9 = vld [vmem:[%s8091_s0 + $0x228] sm:$0xff] }
 0x16b   :  { %v2550_v18 = vadd.f32 %v6655_v52, %v2165_v8  ;;  %v4426_v19 = vpop.f32.mrb[66].mxu1  ;;  %v2939_v20 = vmul.f32 %v6679_v7, %v2676_v6  ;;  %v3315_v29 = vsel %vm299_vm0, %v3065_v11, 0.0  ;;  %v2807_v39 = vmul.f32 %v5008_v2, %v5007_v1  ;;  %v5009_v8 = vld [vmem:[%s8090_s1 + $0x228] sm:$0xff] }
 0x16c   :  { %v2549_v31 = vadd.f32 %v6655_v52, %v2160_v13  ;;  %3310 = vadd.xlane.f32.xlu1 %v3309_v10  ;;  %v4634_v32 = vpop.f32.mrb[66].mxu0  ;;  %v1080_v21 = vpop.f32.mrb[67].mxu1  ;;  %v3312_v22 = vsel %vm299_vm0, %v3064_v14, 0.0  ;;  %v2938_v23 = vmul.f32 %v6679_v7, %v2675_v12  ;;  %v2810_v10 = vmul.f32 %v5010_v9, %v5009_v8  ;;  %v5021_v8 = vld [vmem:[%s8090_s1 + $0x250] sm:$0xff] }
 0x16d   :  { %v2678_v37 = vmax.f32 %v2550_v18, 0.0  ;;  %v2175_v38 = vadd.f32 %v4634_v32, %v4426_v19  ;;  %v2169_v42 = vpop.f32.mrb[67].mxu0  ;;  %v3067_v30 = vadd.f32 %v2939_v20, %v2804_v5  ;;  %v5011_v19 = vld [vmem:[%s8090_s1 + $0x220] sm:$0xff]  ;;  %v5022_v9 = vld [vmem:[%s8091_s0 + $0x250] sm:$0xff] }
 0x16e   :  { %v2677_v43 = vmax.f32 %v2549_v31, 0.0  ;;  %v2170_v44 = vadd.f32 %v2169_v42, %v1080_v21  ;;  %3313 = vadd.xlane.f32.xlu0 %v3312_v22  ;;  %v3066_v45 = vadd.f32 %v2938_v23, %v2803_v17  ;;  %v5012_v20 = vld [vmem:[%s8091_s0 + $0x220] sm:$0xff]  ;;  %v5014_v42 = vld [vmem:[%s8091_s0 + $0x238] sm:$0xff] }
 0x16f   :  { %v2552_v48 = vadd.f32 %v6655_v52, %v2175_v38  ;;  %v4429_v35 = vpop.f32.mrb[68].mxu1  ;;  %v2941_v36 = vmul.f32 %v6679_v7, %v2678_v37  ;;  %v3321_v60 = vsel %vm299_vm0, %v3067_v30, 0.0  ;;  %v2809_v31 = vmul.f32 %v5012_v20, %v5011_v19  ;;  %v5013_v38 = vld [vmem:[%s8090_s1 + $0x238] sm:$0xff] }
 0x170   :  { %v2551_v49 = vadd.f32 %v6655_v52, %v2170_v44  ;;  %3316 = vadd.xlane.f32.xlu1 %v3315_v29  ;;  %v4637_v50 = vpop.f32.mrb[68].mxu0  ;;  %v1090_v51 = vpop.f32.mrb[69].mxu1  ;;  %v3318_v53 = vsel %vm299_vm0, %v3066_v45, 0.0  ;;  %v2940_v33 = vmul.f32 %v6679_v7, %v2677_v43  ;;  %v2812_v29 = vmul.f32 %v5014_v42, %v5013_v38 }
 0x171   :  { %v2680_v57 = vmax.f32 %v2552_v48, 0.0  ;;  %v2185_v58 = vadd.f32 %v4637_v50, %v4429_v35  ;;  %v2179_v59 = vpop.f32.mrb[69].mxu0  ;;  %v3069_v61 = vadd.f32 %v2941_v36, %v2806_v26  ;;  %v5015_v35 = vld [vmem:[%s8090_s1 + $0x230] sm:$0xff] }
 0x172   :  { %v2679_v62 = vmax.f32 %v2551_v49, 0.0  ;;  %v2180_v63 = vadd.f32 %v2179_v59, %v1090_v51  ;;  %3319 = vadd.xlane.f32.xlu0 %v3318_v53  ;;  %v3068_v0 = vadd.f32 %v2940_v33, %v2805_v47  ;;  %v5016_v36 = vld [vmem:[%s8091_s0 + $0x230] sm:$0xff]  ;;  %v6918_v53 = vstv %s8094_s6  ;;  %v5017_v59 = vld [vmem:[%s8090_s1 + $0x248] sm:$0xff] }
 0x173   :  { %v2554_v40 = vadd.f32 %v6655_v52, %v2185_v58  ;;  %v4432_v3 = vpop.f32.mrb[70].mxu1  ;;  %v2943_v27 = vmul.f32 %v6679_v7, %v2680_v57  ;;  %v3327_v14 = vsel %vm299_vm0, %v3069_v61, 0.0  ;;  %v2811_v49 = vmul.f32 %v5016_v36, %v5015_v35  ;;  %v5028_v35 = vld [vmem:[%s8091_s0 + $0x268] sm:$0xff] }
 0x174   :  { %v2553_v55 = vadd.f32 %v6655_v52, %v2180_v63  ;;  %3322 = vadd.xlane.f32.xlu1 %v3321_v60  ;;  %v4640_v28 = vpop.f32.mrb[70].mxu0  ;;  %v1100_v4 = vpop.f32.mrb[71].mxu1  ;;  %v3324_v5 = vsel %vm299_vm0, %v3068_v0, 0.0  ;;  %v2942_v6 = vmul.f32 %v6679_v7, %v2679_v62  ;;  %v5018_v60 = vld [vmem:[%s8091_s0 + $0x248] sm:$0xff] }
 0x175   :  { %v2682_v11 = vmax.f32 %v2554_v40, 0.0  ;;  %v2195_v12 = vadd.f32 %v4640_v28, %v4432_v3  ;;  %v2189_v13 = vpop.f32.mrb[71].mxu0  ;;  %v3071_v15 = vadd.f32 %v2943_v27, %v2808_v56  ;;  %v2814_v61 = vmul.f32 %v5018_v60, %v5017_v59  ;;  %v5019_v27 = vld [vmem:[%s8090_s1 + $0x240] sm:$0xff] }
 0x176   :  { %v2681_v16 = vmax.f32 %v2553_v55, 0.0  ;;  %v2190_v17 = vadd.f32 %v2189_v13, %v1100_v4  ;;  %3325 = vadd.xlane.f32.xlu0 %v3324_v5  ;;  %v3070_v18 = vadd.f32 %v2942_v6, %v2807_v39  ;;  %v5020_v55 = vld [vmem:[%s8091_s0 + $0x240] sm:$0xff] }
 0x177   :  { %v2556_v32 = vadd.f32 %v6655_v52, %v2195_v12  ;;  %v4435_v21 = vpop.f32.mrb[72].mxu1  ;;  %v2945_v22 = vmul.f32 %v6679_v7, %v2682_v11  ;;  %v3333_v45 = vsel %vm299_vm0, %v3071_v15, 0.0  ;;  %v2813_v28 = vmul.f32 %v5020_v55, %v5019_v27 }
 0x178   :  { %v2555_v23 = vadd.f32 %v6655_v52, %v2190_v17  ;;  %3328 = vadd.xlane.f32.xlu1 %v3327_v14  ;;  %v4643_v24 = vpop.f32.mrb[72].mxu0  ;;  %v1110_v25 = vpop.f32.mrb[73].mxu1  ;;  %v3330_v26 = vsel %vm299_vm0, %v3070_v18, 0.0  ;;  %v2944_v37 = vmul.f32 %v6679_v7, %v2681_v16  ;;  %v5023_v16 = vld [vmem:[%s8090_s1 + $0x258] sm:$0xff] }
 0x179   :  { %v2684_v30 = vmax.f32 %v2556_v32, 0.0  ;;  %v2205_v43 = vadd.f32 %v4643_v24, %v4435_v21  ;;  %v2199_v44 = vpop.f32.mrb[73].mxu0  ;;  %v3073_v46 = vadd.f32 %v2945_v22, %v2810_v10  ;;  %v2815_v10 = vmul.f32 %v5022_v9, %v5021_v8  ;;  %v5024_v17 = vld [vmem:[%s8091_s0 + $0x258] sm:$0xff] }
 0x17a   :  { %v2683_v41 = vmax.f32 %v2555_v23, 0.0  ;;  %v2200_v47 = vadd.f32 %v2199_v44, %v1110_v25  ;;  %3331 = vadd.xlane.f32.xlu0 %v3330_v26  ;;  %v3072_v48 = vadd.f32 %v2944_v37, %v2809_v31  ;;  %v2816_v18 = vmul.f32 %v5024_v17, %v5023_v16  ;;  %v5033_v17 = vld [vmem:[%s8090_s1 + $0x280] sm:$0xff] }
 0x17b   :  { %v2558_v50 = vadd.f32 %v6655_v52, %v2205_v43  ;;  %v4438_v51 = vpop.f32.mrb[74].mxu1  ;;  %v2947_v33 = vmul.f32 %v6679_v7, %v2684_v30  ;;  %v3339_v1 = vsel %vm299_vm0, %v3073_v46, 0.0  ;;  %v5026_v30 = vld [vmem:[%s8091_s0 + $0x260] sm:$0xff] }
 0x17c   :  { %v2557_v34 = vadd.f32 %v6655_v52, %v2200_v47  ;;  %3334 = vadd.xlane.f32.xlu1 %v3333_v45  ;;  %v4646_v54 = vpop.f32.mrb[74].mxu0  ;;  %v1120_v56 = vpop.f32.mrb[75].mxu1  ;;  %v3336_v57 = vsel %vm299_vm0, %v3072_v48, 0.0  ;;  %v2946_v58 = vmul.f32 %v6679_v7, %v2683_v41  ;;  %v5027_v48 = vld [vmem:[%s8090_s1 + $0x268] sm:$0xff] }
 0x17d   :  { %v2686_v62 = vmax.f32 %v2558_v50, 0.0  ;;  %v2215_v63 = vadd.f32 %v4646_v54, %v4438_v51  ;;  %v2209_v0 = vpop.f32.mrb[75].mxu0  ;;  %v3075_v2 = vadd.f32 %v2947_v33, %v2812_v29  ;;  %v5025_v29 = vld [vmem:[%s8090_s1 + $0x260] sm:$0xff]  ;;  %v2818_v36 = vmul.f32 %v5028_v35, %v5027_v48 }
 0x17e   :  { %v2685_v39 = vmax.f32 %v2557_v34, 0.0  ;;  %v2210_v40 = vadd.f32 %v2209_v0, %v1120_v56  ;;  %3337 = vadd.xlane.f32.xlu0 %v3336_v57  ;;  %v3074_v3 = vadd.f32 %v2946_v58, %v2811_v49  ;;  %v2817_v43 = vmul.f32 %v5026_v30, %v5025_v29 }
 0x17f   :  { %v2560_v4 = vadd.f32 %v6655_v52, %v2215_v63  ;;  %v4441_v5 = vpop.f32.mrb[76].mxu1  ;;  %v2949_v6 = vmul.f32 %v6679_v7, %v2686_v62  ;;  %v3345_v21 = vsel %vm299_vm0, %v3075_v2, 0.0  ;;  %v5030_v2 = vld [vmem:[%s8091_s0 + $0x270] sm:$0xff] }
 0x180   :  { %v2559_v11 = vadd.f32 %v6655_v52, %v2210_v40  ;;  %3340 = vadd.xlane.f32.xlu1 %v3339_v1  ;;  %v4649_v12 = vpop.f32.mrb[76].mxu0  ;;  %v1130_v13 = vpop.f32.mrb[77].mxu1  ;;  %v3342_v14 = vsel %vm299_vm0, %v3074_v3, 0.0  ;;  %v2948_v15 = vmul.f32 %v6679_v7, %v2685_v39  ;;  %v5029_v1 = vld [vmem:[%s8090_s1 + $0x270] sm:$0xff] }
 0x181   :  { %v2688_v19 = vmax.f32 %v2560_v4, 0.0  ;;  %v3137_v20 = vpop.xlane.xlu0 %3136  ;;  %v2225_v31 = vadd.f32 %v4649_v12, %v4441_v5  ;;  %v2219_v32 = vpop.f32.mrb[77].mxu0  ;;  %v3077_v22 = vadd.f32 %v2949_v6, %v2814_v61  ;;  %v2819_v39 = vmul.f32 %v5030_v2, %v5029_v1  ;;  %v5031_v4 = vld [vmem:[%s8090_s1 + $0x278] sm:$0xff] }
 0x182   :  { %v2687_v23 = vmax.f32 %v2559_v11, 0.0  ;;  %v3519_v24 = vadd.f32 %v6918_v53, %v3137_v20  ;;  %v2220_v25 = vadd.f32 %v2219_v32, %v1130_v13  ;;  %3343 = vadd.xlane.f32.xlu0 %v3342_v14  ;;  %v3076_v26 = vadd.f32 %v2948_v15, %v2813_v28  ;;  %v5032_v5 = vld [vmem:[%s8091_s0 + $0x278] sm:$0xff] }
 0x183   :  { %v2562_v37 = vadd.f32 %v6655_v52, %v2225_v31  ;;  %v4444_v38 = vpop.f32.mrb[78].mxu1  ;;  %v2951_v42 = vmul.f32 %v6679_v7, %v2688_v19  ;;  %v3351_v34 = vsel %vm299_vm0, %v3077_v22, 0.0  ;;  %v2820_v6 = vmul.f32 %v5032_v5, %v5031_v4 }
 0x184   :  { %3648 = vst.msk [vmem:[%s8095_s7 + $0x8] sm:$0xff] %vm3646_vm1, %v3519_v24  ;;  %v2561_v44 = vadd.f32 %v6655_v52, %v2220_v25  ;;  %3346 = vadd.xlane.f32.xlu1 %v3345_v21  ;;  %v4652_v45 = vpop.f32.mrb[78].mxu0  ;;  %v1140_v46 = vpop.f32.mrb[79].mxu1  ;;  %v3348_v41 = vsel %vm299_vm0, %v3076_v26, 0.0  ;;  %v2950_v47 = vmul.f32 %v6679_v7, %v2687_v23  ;;  %v5035_v23 = vld [vmem:[%s8090_s1 + $0x288] sm:$0xff] }
 0x185   :  { %v2690_v49 = vmax.f32 %v2562_v37, 0.0  ;;  %v3143_v50 = vpop.xlane.xlu1 %3142  ;;  %v3134_v51 = vpop.xlane.xlu0 %3133  ;;  %v2235_v33 = vadd.f32 %v4652_v45, %v4444_v38  ;;  %v3079_v54 = vadd.f32 %v2951_v42, %v2816_v18  ;;  %v5034_v18 = vld [vmem:[%s8091_s0 + $0x280] sm:$0xff]  ;;  %v5036_v24 = vld [vmem:[%s8091_s0 + $0x288] sm:$0xff] }
 0x186   :  { %v2689_v56 = vmax.f32 %v2561_v44, 0.0  ;;  %v3521_v57 = vadd.f32 %v6918_v53, %v3143_v50  ;;  %v3518_v58 = vadd.f32 %v6918_v53, %v3134_v51  ;;  %v2229_v59 = vpop.f32.mrb[79].mxu0  ;;  %3349 = vadd.xlane.f32.xlu0 %v3348_v41  ;;  %v3078_v60 = vadd.f32 %v2950_v47, %v2815_v10  ;;  %v5038_v50 = vld [vmem:[%s8091_s0 + $0x290] sm:$0xff] }
 0x187   :  { %v2564_v61 = vadd.f32 %v6655_v52, %v2235_v33  ;;  %v2230_v62 = vadd.f32 %v2229_v59, %v1140_v46  ;;  %v4447_v63 = vpop.f32.mrb[80].mxu1  ;;  %v2953_v0 = vmul.f32 %v6679_v7, %v2690_v49  ;;  %v3357_v55 = vsel %vm299_vm0, %v3079_v54, 0.0  ;;  %v5037_v49 = vld [vmem:[%s8090_s1 + $0x290] sm:$0xff]  ;;  %v5040_v59 = vld [vmem:[%s8091_s0 + $0x298] sm:$0xff] }
 0x188   :  { %3650 = vst.msk [vmem:[%s8095_s7 + $0x18] sm:$0xff] %vm3646_vm1, %v3521_v57  ;;  %3647 = vst.msk [vmem:[%s8095_s7] sm:$0xff] %vm3646_vm1, %v3518_v58  ;;  %3352 = vadd.xlane.f32.xlu1 %v3351_v34  ;;  %v4655_v40 = vpop.f32.mrb[80].mxu0  ;;  %v1150_v3 = vpop.f32.mrb[81].mxu1  ;;  %v3354_v27 = vsel %vm299_vm0, %v3078_v60, 0.0  ;;  %v2952_v28 = vmul.f32 %v6679_v7, %v2689_v56  ;;  %v2821_v19 = vmul.f32 %v5034_v18, %v5033_v17  ;;  %v5039_v58 = vld [vmem:[%s8090_s1 + $0x298] sm:$0xff] }
 0x189   :  { %v2692_v8 = vmax.f32 %v2564_v61, 0.0  ;;  %v2563_v9 = vadd.f32 %v6655_v52, %v2230_v62  ;;  %v3140_v10 = vpop.xlane.xlu1 %3139  ;;  %v2245_v11 = vadd.f32 %v4655_v40, %v4447_v63  ;;  %v2239_v12 = vpop.f32.mrb[81].mxu0  ;;  %v3081_v13 = vadd.f32 %v2953_v0, %v2818_v36  ;;  %v5044_v17 = vld [vmem:[%s8091_s0 + $0x2a8] sm:$0xff] }
 0x18a   :  { %v3520_v14 = vadd.f32 %v6918_v53, %v3140_v10  ;;  %v2240_v15 = vadd.f32 %v2239_v12, %v1150_v3  ;;  %3355 = vadd.xlane.f32.xlu0 %v3354_v27  ;;  %v3080_v16 = vadd.f32 %v2952_v28, %v2817_v43  ;;  %v2822_v25 = vmul.f32 %v5036_v24, %v5035_v23 }
 0x18b   :  { %v2691_v20 = vmax.f32 %v2563_v9, 0.0  ;;  %v2566_v31 = vadd.f32 %v6655_v52, %v2245_v11  ;;  %v3146_v32 = vpop.xlane.xlu0 %3145  ;;  %v4450_v21 = vpop.f32.mrb[82].mxu1  ;;  %v2955_v22 = vmul.f32 %v6679_v7, %v2692_v8  ;;  %v3363_v30 = vsel %vm299_vm0, %v3081_v13, 0.0  ;;  %v5041_v13 = vld [vmem:[%s8090_s1 + $0x2a0] sm:$0xff] }
 0x18c   :  { %3649 = vst.msk [vmem:[%s8095_s7 + $0x10] sm:$0xff] %vm3646_vm1, %v3520_v14  ;;  %v2565_v26 = vadd.f32 %v6655_v52, %v2240_v15  ;;  %3358 = vadd.xlane.f32.xlu1 %v3357_v55  ;;  %v3522_v37 = vadd.f32 %v6918_v53, %v3146_v32  ;;  %v4658_v38 = vpop.f32.mrb[82].mxu0  ;;  %v1160_v42 = vpop.f32.mrb[83].mxu1  ;;  %v3360_v29 = vsel %vm299_vm0, %v3080_v16, 0.0  ;;  %v2823_v51 = vmul.f32 %v5038_v50, %v5037_v49  ;;  %v5042_v14 = vld [vmem:[%s8091_s0 + $0x2a0] sm:$0xff]  ;;  %v5043_v16 = vld [vmem:[%s8090_s1 + $0x2a8] sm:$0xff] }
 0x18d   :  { %v2694_v43 = vmax.f32 %v2566_v31, 0.0  ;;  %v3149_v44 = vpop.xlane.xlu1 %3148  ;;  %v2255_v45 = vadd.f32 %v4658_v38, %v4450_v21  ;;  %v2249_v46 = vpop.f32.mrb[83].mxu0  ;;  %v2954_v41 = vmul.f32 %v6679_v7, %v2691_v20  ;;  %v3083_v47 = vadd.f32 %v2955_v22, %v2820_v6  ;;  %v5048_v49 = vld [vmem:[%s8091_s0 + $0x2b8] sm:$0xff] }
 0x18e   :  { %v2693_v48 = vmax.f32 %v2565_v26, 0.0  ;;  %3651 = vst.msk [vmem:[%s8095_s7 + $0x20] sm:$0xff] %vm3646_vm1, %v3522_v37  ;;  %v3523_v35 = vadd.f32 %v6918_v53, %v3149_v44  ;;  %v2250_v36 = vadd.f32 %v2249_v46, %v1160_v42  ;;  %3361 = vadd.xlane.f32.xlu0 %v3360_v29  ;;  %v2824_v60 = vmul.f32 %v5040_v59, %v5039_v58 }
 0x18f   :  { %v2568_v33 = vadd.f32 %v6655_v52, %v2255_v45  ;;  %v3152_v34 = vpop.xlane.xlu0 %3151  ;;  %v4453_v54 = vpop.f32.mrb[84].mxu1  ;;  %v3082_v56 = vadd.f32 %v2954_v41, %v2819_v39  ;;  %v2957_v57 = vmul.f32 %v6679_v7, %v2694_v43  ;;  %v3369_v1 = vsel %vm299_vm0, %v3083_v47, 0.0  ;;  %v5045_v47 = vld [vmem:[%s8090_s1 + $0x2b0] sm:$0xff] }
 0x190   :  { %3652 = vst.msk [vmem:[%s8095_s7 + $0x28] sm:$0xff] %vm3646_vm1, %v3523_v35  ;;  %v2567_v61 = vadd.f32 %v6655_v52, %v2250_v36  ;;  %3364 = vadd.xlane.f32.xlu1 %v3363_v30  ;;  %v3524_v62 = vadd.f32 %v6918_v53, %v3152_v34  ;;  %v4661_v63 = vpop.f32.mrb[84].mxu0  ;;  %v1170_v0 = vpop.f32.mrb[85].mxu1  ;;  %v2956_v2 = vmul.f32 %v6679_v7, %v2693_v48  ;;  %v5046_v48 = vld [vmem:[%s8091_s0 + $0x2b0] sm:$0xff]  ;;  %v5047_v36 = vld [vmem:[%s8090_s1 + $0x2b8] sm:$0xff] }
 0x191   :  { %v2696_v39 = vmax.f32 %v2568_v33, 0.0  ;;  %v3155_v40 = vpop.xlane.xlu1 %3154  ;;  %v2265_v3 = vadd.f32 %v4661_v63, %v4453_v54  ;;  %v2259_v27 = vpop.f32.mrb[85].mxu0  ;;  %v3366_v55 = vsel %vm299_vm0, %v3082_v56, 0.0  ;;  %v3085_v28 = vadd.f32 %v2957_v57, %v2822_v25 }
 0x192   :  { %v2695_v4 = vmax.f32 %v2567_v61, 0.0  ;;  %3653 = vst.msk [vmem:[%s8095_s7 + $0x30] sm:$0xff] %vm3646_vm1, %v3524_v62  ;;  %v3525_v5 = vadd.f32 %v6918_v53, %v3155_v40  ;;  %v2260_v6 = vadd.f32 %v2259_v27, %v1170_v0  ;;  %3367 = vadd.xlane.f32.xlu0 %v3366_v55  ;;  %v3084_v8 = vadd.f32 %v2956_v2, %v2821_v19 }
 0x193   :  { %v2570_v9 = vadd.f32 %v6655_v52, %v2265_v3  ;;  %v3158_v10 = vpop.xlane.xlu0 %3157  ;;  %v4456_v11 = vpop.f32.mrb[86].mxu1  ;;  %v2959_v12 = vmul.f32 %v6679_v7, %v2696_v39  ;;  %v2825_v15 = vmul.f32 %v5042_v14, %v5041_v13  ;;  %v2826_v18 = vmul.f32 %v5044_v17, %v5043_v16 }
 0x194   :  { %3654 = vst.msk [vmem:[%s8095_s7 + $0x38] sm:$0xff] %vm3646_vm1, %v3525_v5  ;;  %v2569_v19 = vadd.f32 %v6655_v52, %v2260_v6  ;;  %3370 = vadd.xlane.f32.xlu1 %v3369_v1  ;;  %v3526_v20 = vadd.f32 %v6918_v53, %v3158_v10  ;;  %v4664_v31 = vpop.f32.mrb[86].mxu0  ;;  %v1180_v32 = vpop.f32.mrb[87].mxu1  ;;  %v3372_v21 = vsel %vm299_vm0, %v3084_v8, 0.0  ;;  %v2958_v22 = vmul.f32 %v6679_v7, %v2695_v4  ;;  %v5050_v4 = vld [vmem:[%s8091_s0 + $0x2c0] sm:$0xff]  ;;  %v5051_v6 = vld [vmem:[%s8090_s1 + $0x2c8] sm:$0xff] }
 0x195   :  { %v2698_v23 = vmax.f32 %v2570_v9, 0.0  ;;  %v3161_v24 = vpop.xlane.xlu1 %3160  ;;  %v2275_v25 = vadd.f32 %v4664_v31, %v4456_v11  ;;  %v2269_v26 = vpop.f32.mrb[87].mxu0  ;;  %v3375_v37 = vsel %vm299_vm0, %v3085_v28, 0.0  ;;  %v3087_v38 = vadd.f32 %v2959_v12, %v2824_v60  ;;  %v5049_v28 = vld [vmem:[%s8090_s1 + $0x2c0] sm:$0xff]  ;;  %v5052_v8 = vld [vmem:[%s8091_s0 + $0x2c8] sm:$0xff] }
 0x196   :  { %v2697_v42 = vmax.f32 %v2569_v19, 0.0  ;;  %3655 = vst.msk [vmem:[%s8095_s7 + $0x40] sm:$0xff] %vm3646_vm1, %v3526_v20  ;;  %v3527_v29 = vadd.f32 %v6918_v53, %v3161_v24  ;;  %v2270_v30 = vadd.f32 %v2269_v26, %v1180_v32  ;;  %3373 = vadd.xlane.f32.xlu0 %v3372_v21  ;;  %v3086_v43 = vadd.f32 %v2958_v22, %v2823_v51 }
 0x197   :  { %v2572_v44 = vadd.f32 %v6655_v52, %v2275_v25  ;;  %v3164_v45 = vpop.xlane.xlu0 %3163  ;;  %v4459_v46 = vpop.f32.mrb[88].mxu1  ;;  %v2961_v41 = vmul.f32 %v6679_v7, %v2698_v23  ;;  %v2827_v35 = vmul.f32 %v5046_v48, %v5045_v47  ;;  %v2828_v50 = vmul.f32 %v5048_v49, %v5047_v36 }
 0x198   :  { %3656 = vst.msk [vmem:[%s8095_s7 + $0x48] sm:$0xff] %vm3646_vm1, %v3527_v29  ;;  %v2571_v51 = vadd.f32 %v6655_v52, %v2270_v30  ;;  %3376 = vadd.xlane.f32.xlu1 %v3375_v37  ;;  %v3528_v33 = vadd.f32 %v6918_v53, %v3164_v45  ;;  %v4667_v34 = vpop.f32.mrb[88].mxu0  ;;  %v1190_v54 = vpop.f32.mrb[89].mxu1  ;;  %v3378_v56 = vsel %vm299_vm0, %v3086_v43, 0.0  ;;  %v2960_v57 = vmul.f32 %v6679_v7, %v2697_v42  ;;  %v5054_v42 = vld [vmem:[%s8091_s0 + $0x2d0] sm:$0xff]  ;;  %v5055_v30 = vld [vmem:[%s8090_s1 + $0x2d8] sm:$0xff] }
 0x199   :  { %v2700_v58 = vmax.f32 %v2572_v44, 0.0  ;;  %v3167_v59 = vpop.xlane.xlu1 %3166  ;;  %v2285_v60 = vadd.f32 %v4667_v34, %v4459_v46  ;;  %v2279_v61 = vpop.f32.mrb[89].mxu0  ;;  %v3381_v62 = vsel %vm299_vm0, %v3087_v38, 0.0  ;;  %v3089_v63 = vadd.f32 %v2961_v41, %v2826_v18  ;;  %v5053_v38 = vld [vmem:[%s8090_s1 + $0x2d0] sm:$0xff]  ;;  %v7168_v44 = vld [vmem:[%s8092_s4] ss:$0 sm:$0xff] }
 0x19a   :  { %v2699_v0 = vmax.f32 %v2571_v51, 0.0  ;;  %3657 = vst.msk [vmem:[%s8095_s7 + $0x50] sm:$0xff] %vm3646_vm1, %v3528_v33  ;;  %v3529_v1 = vadd.f32 %v6918_v53, %v3167_v59  ;;  %v2280_v2 = vadd.f32 %v2279_v61, %v1190_v54  ;;  %3379 = vadd.xlane.f32.xlu0 %v3378_v56  ;;  %v3088_v39 = vadd.f32 %v2960_v57, %v2825_v15  ;;  %v7184_v61 = vld [vmem:[%s8093_s5] ss:$0 sm:$0xff] }
 0x19b   :  { %v2574_v40 = vadd.f32 %v6655_v52, %v2285_v60  ;;  %v3170_v3 = vpop.xlane.xlu0 %3169  ;;  %v4462_v27 = vpop.f32.mrb[90].mxu1  ;;  %v2963_v55 = vmul.f32 %v6679_v7, %v2700_v58  ;;  %v2829_v5 = vmul.f32 %v5050_v4, %v5049_v28  ;;  %v2830_v9 = vmul.f32 %v5052_v8, %v5051_v6 }
 0x19c   :  { %3658 = vst.msk [vmem:[%s8095_s7 + $0x58] sm:$0xff] %vm3646_vm1, %v3529_v1  ;;  %v2573_v10 = vadd.f32 %v6655_v52, %v2280_v2  ;;  %3382 = vadd.xlane.f32.xlu1 %v3381_v62  ;;  %v3530_v11 = vadd.f32 %v6918_v53, %v3170_v3  ;;  %v4670_v12 = vpop.f32.mrb[90].mxu0  ;;  %v1200_v13 = vpop.f32.mrb[91].mxu1  ;;  %v3384_v14 = vsel %vm299_vm0, %v3088_v39, 0.0  ;;  %v2962_v15 = vmul.f32 %v6679_v7, %v2699_v0  ;;  %v5060_v0 = vld [vmem:[%s8091_s0 + $0x2e0] sm:$0xff]  ;;  %v5061_v2 = vld [vmem:[%s8090_s1 + $0x2e8] sm:$0xff] }
 0x19d   :  { %v2702_v16 = vmax.f32 %v2574_v40, 0.0  ;;  %v3173_v17 = vpop.xlane.xlu1 %3172  ;;  %v2295_v18 = vadd.f32 %v4670_v12, %v4462_v27  ;;  %v2289_v19 = vpop.f32.mrb[91].mxu0  ;;  %v3387_v20 = vsel %vm299_vm0, %v3089_v63, 0.0  ;;  %v3091_v31 = vadd.f32 %v2963_v55, %v2828_v50  ;;  %v5059_v63 = vld [vmem:[%s8090_s1 + $0x2e0] sm:$0xff]  ;;  %v5062_v39 = vld [vmem:[%s8091_s0 + $0x2e8] sm:$0xff] }
 0x19e   :  { %v2701_v32 = vmax.f32 %v2573_v10, 0.0  ;;  %3659 = vst.msk [vmem:[%s8095_s7 + $0x60] sm:$0xff] %vm3646_vm1, %v3530_v11  ;;  %v3531_v21 = vadd.f32 %v6918_v53, %v3173_v17  ;;  %v2290_v22 = vadd.f32 %v2289_v19, %v1200_v13  ;;  %3385 = vadd.xlane.f32.xlu0 %v3384_v14  ;;  %v3090_v23 = vadd.f32 %v2962_v15, %v2827_v35 }
 0x19f   :  { %v2576_v24 = vadd.f32 %v6655_v52, %v2295_v18  ;;  %v3176_v25 = vpop.xlane.xlu0 %3175  ;;  %v4465_v26 = vpop.f32.mrb[92].mxu1  ;;  %v2965_v37 = vmul.f32 %v6679_v7, %v2702_v16  ;;  %v2831_v29 = vmul.f32 %v5054_v42, %v5053_v38  ;;  %v5056_v52 = vld [vmem:[%s8091_s0 + $0x2d8] sm:$0xff]  ;;  %v3393_v33 = vsel %vm299_vm0, %v3091_v31, 0.0  ;;  %v5063_v31 = vld [vmem:[%s8090_s1 + $0x2f0] sm:$0xff] }
 0x1a0   :  { %v2832_v43 = vmul.f32 %v5056_v52, %v5055_v30  ;;  %3660 = vst.msk [vmem:[%s8095_s7 + $0x68] sm:$0xff] %vm3646_vm1, %v3531_v21  ;;  %v2575_v45 = vadd.f32 %v7168_v44, %v2290_v22  ;;  %3388 = vadd.xlane.f32.xlu1 %v3387_v20  ;;  %v3532_v46 = vadd.f32 %v6918_v53, %v3176_v25  ;;  %v4673_v41 = vpop.f32.mrb[92].mxu0  ;;  %v1210_v47 = vpop.f32.mrb[93].mxu1  ;;  %v3390_v48 = vsel %vm299_vm0, %v3090_v23, 0.0  ;;  %v5065_v22 = vld [vmem:[%s8090_s1 + $0x2f8] sm:$0xff] }
 0x1a1   :  { %v2964_v35 = vmul.f32 %v6679_v7, %v2701_v32  ;;  %v2704_v36 = vmax.f32 %v2576_v24, 0.0  ;;  %v3179_v49 = vpop.xlane.xlu1 %3178  ;;  %v2305_v50 = vadd.f32 %v4673_v41, %v4465_v26  ;;  %v2299_v51 = vpop.f32.mrb[93].mxu0  ;;  %v3093_v34 = vadd.f32 %v2965_v37, %v2830_v9  ;;  %v5064_v32 = vld [vmem:[%s8091_s0 + $0x2f0] sm:$0xff]  ;;  %v5066_v23 = vld [vmem:[%s8091_s0 + $0x2f8] sm:$0xff] }
 0x1a2   :  { %v2703_v54 = vmax.f32 %v2575_v45, 0.0  ;;  %3661 = vst.msk [vmem:[%s8095_s7 + $0x70] sm:$0xff] %vm3646_vm1, %v3532_v46  ;;  %v3533_v56 = vadd.f32 %v6918_v53, %v3179_v49  ;;  %v2300_v57 = vadd.f32 %v2299_v51, %v1210_v47  ;;  %3391 = vadd.xlane.f32.xlu0 %v3390_v48  ;;  %v2833_v1 = vmul.f32 %v5060_v0, %v5059_v63 }
 0x1a3   :  { %v3092_v58 = vadd.f32 %v2964_v35, %v2829_v5  ;;  %v2578_v7 = vadd.f32 %v7168_v44, %v2305_v50  ;;  %v3182_v59 = vpop.xlane.xlu0 %3181  ;;  %v4468_v60 = vpop.f32.mrb[94].mxu1  ;;  %v2967_v62 = vmul.f32 %v7184_v61, %v2704_v36  ;;  %v2834_v40 = vmul.f32 %v5062_v39, %v5061_v2 }
 0x1a4   :  { %3662 = vst.msk [vmem:[%s8095_s7 + $0x78] sm:$0xff] %vm3646_vm1, %v3533_v56  ;;  %v2577_v3 = vadd.f32 %v7168_v44, %v2300_v57  ;;  %3394 = vadd.xlane.f32.xlu1 %v3393_v33  ;;  %v3534_v27 = vadd.f32 %v6918_v53, %v3182_v59  ;;  %v4676_v55 = vpop.f32.mrb[94].mxu0  ;;  %v1220_v28 = vpop.f32.mrb[95].mxu1  ;;  %v2966_v5 = vmul.f32 %v7184_v61, %v2703_v54  ;;  %v3399_v11 = vsel %vm299_vm0, %v3093_v34, 0.0  ;;  %v5067_v34 = vld [vmem:[%s8090_s1 + $0x300] sm:$0xff]  ;;  %v5069_v57 = vld [vmem:[%s8090_s1 + $0x308] sm:$0xff] }
 0x1a5   :  { %v3396_v4 = vsel %vm299_vm0, %v3092_v58, 0.0  ;;  %v2706_v6 = vmax.f32 %v2578_v7, 0.0  ;;  %v3185_v8 = vpop.xlane.xlu1 %3184  ;;  %v2315_v9 = vadd.f32 %v4676_v55, %v4468_v60  ;;  %v2309_v10 = vpop.f32.mrb[95].mxu0  ;;  %v3095_v12 = vadd.f32 %v2967_v62, %v2832_v43  ;;  %v5068_v54 = vld [vmem:[%s8091_s0 + $0x300] sm:$0xff]  ;;  %v5070_v58 = vld [vmem:[%s8091_s0 + $0x308] sm:$0xff] }
 0x1a6   :  { %v2705_v13 = vmax.f32 %v2577_v3, 0.0  ;;  %3663 = vst.msk [vmem:[%s8095_s7 + $0x80] sm:$0xff] %vm3646_vm1, %v3534_v27  ;;  %v3535_v14 = vadd.f32 %v6918_v53, %v3185_v8  ;;  %v2310_v15 = vadd.f32 %v2309_v10, %v1220_v28  ;;  %3397 = vadd.xlane.f32.xlu0 %v3396_v4  ;;  %v3094_v16 = vadd.f32 %v2966_v5, %v2831_v29  ;;  %v5071_v8 = vld [vmem:[%s8090_s1 + $0x310] sm:$0xff] }
 0x1a7   :  { %v2580_v17 = vadd.f32 %v7168_v44, %v2315_v9  ;;  %v3188_v18 = vpop.xlane.xlu0 %3187  ;;  %v4471_v19 = vpop.f32.mrb[96].mxu1  ;;  %v2969_v20 = vmul.f32 %v7184_v61, %v2706_v6  ;;  %v2835_v21 = vmul.f32 %v5064_v32, %v5063_v31  ;;  %v2836_v24 = vmul.f32 %v5066_v23, %v5065_v22  ;;  %v5072_v9 = vld [vmem:[%s8091_s0 + $0x310] sm:$0xff] }
 0x1a8   :  { %3664 = vst.msk [vmem:[%s8095_s7 + $0x88] sm:$0xff] %vm3646_vm1, %v3535_v14  ;;  %v2579_v25 = vadd.f32 %v7168_v44, %v2310_v15  ;;  %3400 = vadd.xlane.f32.xlu1 %v3399_v11  ;;  %v3536_v26 = vadd.f32 %v6918_v53, %v3188_v18  ;;  %v4679_v37 = vpop.f32.mrb[96].mxu0  ;;  %v1230_v38 = vpop.f32.mrb[97].mxu1  ;;  %v3402_v42 = vsel %vm299_vm0, %v3094_v16, 0.0  ;;  %v2968_v29 = vmul.f32 %v7184_v61, %v2705_v13  ;;  %v5073_v11 = vld [vmem:[%s8090_s1 + $0x318] sm:$0xff] }
 0x1a9   :  { %v2708_v30 = vmax.f32 %v2580_v17, 0.0  ;;  %v3191_v52 = vpop.xlane.xlu1 %3190  ;;  %v2325_v43 = vadd.f32 %v4679_v37, %v4471_v19  ;;  %v2319_v45 = vpop.f32.mrb[97].mxu0  ;;  %v3405_v46 = vsel %vm299_vm0, %v3095_v12, 0.0  ;;  %v3097_v41 = vadd.f32 %v2969_v20, %v2834_v40  ;;  %v5074_v12 = vld [vmem:[%s8091_s0 + $0x318] sm:$0xff] }
 0x1aa   :  { %v2707_v47 = vmax.f32 %v2579_v25, 0.0  ;;  %3665 = vst.msk [vmem:[%s8095_s7 + $0x90] sm:$0xff] %vm3646_vm1, %v3536_v26  ;;  %v3537_v48 = vadd.f32 %v6918_v53, %v3191_v52  ;;  %v2320_v35 = vadd.f32 %v2319_v45, %v1230_v38  ;;  %3403 = vadd.xlane.f32.xlu0 %v3402_v42  ;;  %v3096_v36 = vadd.f32 %v2968_v29, %v2833_v1  ;;  %v5075_v52 = vld [vmem:[%s8090_s1 + $0x320] sm:$0xff] }
 0x1ab   :  { %v2582_v49 = vadd.f32 %v7168_v44, %v2325_v43  ;;  %v3194_v50 = vpop.xlane.xlu0 %3193  ;;  %v4474_v51 = vpop.f32.mrb[98].mxu1  ;;  %v2971_v33 = vmul.f32 %v7184_v61, %v2708_v30  ;;  %v2837_v56 = vmul.f32 %v5068_v54, %v5067_v34  ;;  %v2838_v7 = vmul.f32 %v5070_v58, %v5069_v57  ;;  %v5076_v43 = vld [vmem:[%s8091_s0 + $0x320] sm:$0xff] }
 0x1ac   :  { %3666 = vst.msk [vmem:[%s8095_s7 + $0x98] sm:$0xff] %vm3646_vm1, %v3537_v48  ;;  %v2581_v59 = vadd.f32 %v7168_v44, %v2320_v35  ;;  %3406 = vadd.xlane.f32.xlu1 %v3405_v46  ;;  %v3538_v60 = vadd.f32 %v6918_v53, %v3194_v50  ;;  %v4682_v62 = vpop.f32.mrb[98].mxu0  ;;  %v1240_v63 = vpop.f32.mrb[99].mxu1  ;;  %v3408_v0 = vsel %vm299_vm0, %v3096_v36, 0.0  ;;  %v2970_v1 = vmul.f32 %v7184_v61, %v2707_v47  ;;  %v5077_v46 = vld [vmem:[%s8090_s1 + $0x328] sm:$0xff] }
 0x1ad   :  { %v2710_v2 = vmax.f32 %v2582_v49, 0.0  ;;  %v3197_v39 = vpop.xlane.xlu1 %3196  ;;  %v2335_v40 = vadd.f32 %v4682_v62, %v4474_v51  ;;  %v2329_v3 = vpop.f32.mrb[99].mxu0  ;;  %v3411_v27 = vsel %vm299_vm0, %v3097_v41, 0.0  ;;  %v3099_v55 = vadd.f32 %v2971_v33, %v2836_v24  ;;  %v5078_v41 = vld [vmem:[%s8091_s0 + $0x328] sm:$0xff] }
 0x1ae   :  { %v2709_v28 = vmax.f32 %v2581_v59, 0.0  ;;  %3667 = vst.msk [vmem:[%s8095_s7 + $0xa0] sm:$0xff] %vm3646_vm1, %v3538_v60  ;;  %v3539_v4 = vadd.f32 %v6918_v53, %v3197_v39  ;;  %v2330_v5 = vadd.f32 %v2329_v3, %v1240_v63  ;;  %3409 = vadd.xlane.f32.xlu0 %v3408_v0  ;;  %v3098_v6 = vadd.f32 %v2970_v1, %v2835_v21  ;;  %v5079_v39 = vld [vmem:[%s8090_s1 + $0x330] sm:$0xff] }
 0x1af   :  { %v2839_v10 = vmul.f32 %v5072_v9, %v5071_v8  ;;  %v2840_v13 = vmul.f32 %v5074_v12, %v5073_v11  ;;  %v2584_v14 = vadd.f32 %v7168_v44, %v2335_v40  ;;  %v3200_v15 = vpop.xlane.xlu0 %3199  ;;  %v4477_v16 = vpop.f32.mrb[100].mxu1  ;;  %v2973_v17 = vmul.f32 %v7184_v61, %v2710_v2  ;;  %v5080_v40 = vld [vmem:[%s8091_s0 + $0x330] sm:$0xff] }
 0x1b0   :  { %3668 = vst.msk [vmem:[%s8095_s7 + $0xa8] sm:$0xff] %vm3646_vm1, %v3539_v4  ;;  %v2583_v18 = vadd.f32 %v7168_v44, %v2330_v5  ;;  %3412 = vadd.xlane.f32.xlu1 %v3411_v27  ;;  %v3540_v19 = vadd.f32 %v6918_v53, %v3200_v15  ;;  %v4685_v20 = vpop.f32.mrb[100].mxu0  ;;  %v1250_v31 = vpop.f32.mrb[101].mxu1  ;;  %v3414_v32 = vsel %vm299_vm0, %v3098_v6, 0.0  ;;  %v2972_v21 = vmul.f32 %v7184_v61, %v2709_v28  ;;  %v5081_v27 = vld [vmem:[%s8090_s1 + $0x338] sm:$0xff] }
 0x1b1   :  { %v2712_v22 = vmax.f32 %v2584_v14, 0.0  ;;  %v3203_v23 = vpop.xlane.xlu1 %3202  ;;  %v2345_v24 = vadd.f32 %v4685_v20, %v4477_v16  ;;  %v2339_v25 = vpop.f32.mrb[101].mxu0  ;;  %v3417_v26 = vsel %vm299_vm0, %v3099_v55, 0.0  ;;  %v3101_v37 = vadd.f32 %v2973_v17, %v2838_v7  ;;  %v5082_v55 = vld [vmem:[%s8091_s0 + $0x338] sm:$0xff] }
 0x1b2   :  { %v2711_v38 = vmax.f32 %v2583_v18, 0.0  ;;  %3669 = vst.msk [vmem:[%s8095_s7 + $0xb0] sm:$0xff] %vm3646_vm1, %v3540_v19  ;;  %v3541_v42 = vadd.f32 %v6918_v53, %v3203_v23  ;;  %v2340_v29 = vadd.f32 %v2339_v25, %v1250_v31  ;;  %3415 = vadd.xlane.f32.xlu0 %v3414_v32  ;;  %v3100_v30 = vadd.f32 %v2972_v21, %v2837_v56  ;;  %v5083_v23 = vld [vmem:[%s8090_s1 + $0x340] sm:$0xff] }
 0x1b3   :  { %v2841_v45 = vmul.f32 %v5076_v43, %v5075_v52  ;;  %v2842_v47 = vmul.f32 %v5078_v41, %v5077_v46  ;;  %v2975_v48 = vmul.f32 %v7184_v61, %v2712_v22  ;;  %v2586_v35 = vadd.f32 %v7168_v44, %v2345_v24  ;;  %v3206_v36 = vpop.xlane.xlu0 %3205  ;;  %v4480_v49 = vpop.f32.mrb[102].mxu1  ;;  %v5084_v24 = vld [vmem:[%s8091_s0 + $0x340] sm:$0xff] }
 0x1b4   :  { %v2974_v50 = vmul.f32 %v7184_v61, %v2711_v38  ;;  %3670 = vst.msk [vmem:[%s8095_s7 + $0xb8] sm:$0xff] %vm3646_vm1, %v3541_v42  ;;  %v2585_v51 = vadd.f32 %v7168_v44, %v2340_v29  ;;  %3418 = vadd.xlane.f32.xlu1 %v3417_v26  ;;  %v3542_v33 = vadd.f32 %v6918_v53, %v3206_v36  ;;  %v4688_v34 = vpop.f32.mrb[102].mxu0  ;;  %v1260_v54 = vpop.f32.mrb[103].mxu1  ;;  %v3420_v56 = vsel %vm299_vm0, %v3100_v30, 0.0  ;;  %v5085_v26 = vld [vmem:[%s8090_s1 + $0x348] sm:$0xff] }
 0x1b5   :  { %v2714_v57 = vmax.f32 %v2586_v35, 0.0  ;;  %v3209_v58 = vpop.xlane.xlu1 %3208  ;;  %v2355_v7 = vadd.f32 %v4688_v34, %v4480_v49  ;;  %v2349_v59 = vpop.f32.mrb[103].mxu0  ;;  %v3423_v60 = vsel %vm299_vm0, %v3101_v37, 0.0  ;;  %v3103_v62 = vadd.f32 %v2975_v48, %v2840_v13  ;;  %v5086_v37 = vld [vmem:[%s8091_s0 + $0x348] sm:$0xff] }
 0x1b6   :  { %v2713_v63 = vmax.f32 %v2585_v51, 0.0  ;;  %3671 = vst.msk [vmem:[%s8095_s7 + $0xc0] sm:$0xff] %vm3646_vm1, %v3542_v33  ;;  %v3543_v0 = vadd.f32 %v6918_v53, %v3209_v58  ;;  %v2350_v1 = vadd.f32 %v2349_v59, %v1260_v54  ;;  %3421 = vadd.xlane.f32.xlu0 %v3420_v56  ;;  %v3102_v2 = vadd.f32 %v2974_v50, %v2839_v10  ;;  %v5087_v58 = vld [vmem:[%s8090_s1 + $0x350] sm:$0xff] }
 0x1b7   :  { %v2843_v3 = vmul.f32 %v5080_v40, %v5079_v39  ;;  %v2844_v28 = vmul.f32 %v5082_v55, %v5081_v27  ;;  %v2977_v4 = vmul.f32 %v7184_v61, %v2714_v57  ;;  %v2588_v5 = vadd.f32 %v7168_v44, %v2355_v7  ;;  %v3212_v6 = vpop.xlane.xlu0 %3211  ;;  %v4483_v8 = vpop.f32.mrb[104].mxu1  ;;  %v5088_v7 = vld [vmem:[%s8091_s0 + $0x350] sm:$0xff] }
 0x1b8   :  { %v2976_v9 = vmul.f32 %v7184_v61, %v2713_v63  ;;  %3672 = vst.msk [vmem:[%s8095_s7 + $0xc8] sm:$0xff] %vm3646_vm1, %v3543_v0  ;;  %v2587_v10 = vadd.f32 %v7168_v44, %v2350_v1  ;;  %3424 = vadd.xlane.f32.xlu1 %v3423_v60  ;;  %v3544_v11 = vadd.f32 %v6918_v53, %v3212_v6  ;;  %v4691_v12 = vpop.f32.mrb[104].mxu0  ;;  %v1270_v13 = vpop.f32.mrb[105].mxu1  ;;  %v3426_v14 = vsel %vm299_vm0, %v3102_v2, 0.0  ;;  %v5089_v60 = vld [vmem:[%s8090_s1 + $0x358] sm:$0xff] }
 0x1b9   :  { %v2716_v15 = vmax.f32 %v2588_v5, 0.0  ;;  %v3215_v16 = vpop.xlane.xlu1 %3214  ;;  %v2365_v17 = vadd.f32 %v4691_v12, %v4483_v8  ;;  %v2359_v18 = vpop.f32.mrb[105].mxu0  ;;  %v3429_v19 = vsel %vm299_vm0, %v3103_v62, 0.0  ;;  %v3105_v20 = vadd.f32 %v2977_v4, %v2842_v47  ;;  %v5090_v62 = vld [vmem:[%s8091_s0 + $0x358] sm:$0xff] }
 0x1ba   :  { %v2715_v31 = vmax.f32 %v2587_v10, 0.0  ;;  %3673 = vst.msk [vmem:[%s8095_s7 + $0xd0] sm:$0xff] %vm3646_vm1, %v3544_v11  ;;  %v3545_v32 = vadd.f32 %v6918_v53, %v3215_v16  ;;  %v2360_v21 = vadd.f32 %v2359_v18, %v1270_v13  ;;  %3427 = vadd.xlane.f32.xlu0 %v3426_v14  ;;  %v3104_v22 = vadd.f32 %v2976_v9, %v2841_v45  ;;  %v5091_v16 = vld [vmem:[%s8090_s1 + $0x360] sm:$0xff] }
 0x1bb   :  { %v2845_v25 = vmul.f32 %v5084_v24, %v5083_v23  ;;  %v2846_v38 = vmul.f32 %v5086_v37, %v5085_v26  ;;  %v2979_v42 = vmul.f32 %v7184_v61, %v2716_v15  ;;  %v2590_v29 = vadd.f32 %v7168_v44, %v2365_v17  ;;  %v3218_v30 = vpop.xlane.xlu0 %3217  ;;  %v4486_v52 = vpop.f32.mrb[106].mxu1  ;;  %v5092_v17 = vld [vmem:[%s8091_s0 + $0x360] sm:$0xff] }
 0x1bc   :  { %v2978_v43 = vmul.f32 %v7184_v61, %v2715_v31  ;;  %3674 = vst.msk [vmem:[%s8095_s7 + $0xd8] sm:$0xff] %vm3646_vm1, %v3545_v32  ;;  %v2589_v45 = vadd.f32 %v7168_v44, %v2360_v21  ;;  %3430 = vadd.xlane.f32.xlu1 %v3429_v19  ;;  %v3546_v46 = vadd.f32 %v6918_v53, %v3218_v30  ;;  %v4694_v41 = vpop.f32.mrb[106].mxu0  ;;  %v1280_v47 = vpop.f32.mrb[107].mxu1  ;;  %v3432_v48 = vsel %vm299_vm0, %v3104_v22, 0.0  ;;  %v5093_v19 = vld [vmem:[%s8090_s1 + $0x368] sm:$0xff] }
 0x1bd   :  { %v2718_v35 = vmax.f32 %v2590_v29, 0.0  ;;  %v3221_v36 = vpop.xlane.xlu1 %3220  ;;  %v2375_v49 = vadd.f32 %v4694_v41, %v4486_v52  ;;  %v2369_v50 = vpop.f32.mrb[107].mxu0  ;;  %v3435_v51 = vsel %vm299_vm0, %v3105_v20, 0.0  ;;  %v3107_v33 = vadd.f32 %v2979_v42, %v2844_v28  ;;  %v5094_v20 = vld [vmem:[%s8091_s0 + $0x368] sm:$0xff] }
 0x1be   :  { %v2717_v34 = vmax.f32 %v2589_v45, 0.0  ;;  %3675 = vst.msk [vmem:[%s8095_s7 + $0xe0] sm:$0xff] %vm3646_vm1, %v3546_v46  ;;  %v3547_v54 = vadd.f32 %v6918_v53, %v3221_v36  ;;  %v2370_v56 = vadd.f32 %v2369_v50, %v1280_v47  ;;  %3433 = vadd.xlane.f32.xlu0 %v3432_v48  ;;  %v3106_v57 = vadd.f32 %v2978_v43, %v2843_v3  ;;  %v5095_v36 = vld [vmem:[%s8090_s1 + $0x370] sm:$0xff] }
 0x1bf   :  { %v2847_v59 = vmul.f32 %v5088_v7, %v5087_v58  ;;  %v2848_v63 = vmul.f32 %v5090_v62, %v5089_v60  ;;  %v2981_v0 = vmul.f32 %v7184_v61, %v2718_v35  ;;  %v2592_v1 = vadd.f32 %v7168_v44, %v2375_v49  ;;  %v3224_v2 = vpop.xlane.xlu0 %3223  ;;  %v4489_v39 = vpop.f32.mrb[108].mxu1  ;;  %v5096_v49 = vld [vmem:[%s8091_s0 + $0x370] sm:$0xff] }
 0x1c0   :  { %v2980_v40 = vmul.f32 %v7184_v61, %v2717_v34  ;;  %3676 = vst.msk [vmem:[%s8095_s7 + $0xe8] sm:$0xff] %vm3646_vm1, %v3547_v54  ;;  %v2591_v3 = vadd.f32 %v7168_v44, %v2370_v56  ;;  %3436 = vadd.xlane.f32.xlu1 %v3435_v51  ;;  %v3548_v27 = vadd.f32 %v6918_v53, %v3224_v2  ;;  %v4697_v55 = vpop.f32.mrb[108].mxu0  ;;  %v1290_v28 = vpop.f32.mrb[109].mxu1  ;;  %v3438_v4 = vsel %vm299_vm0, %v3106_v57, 0.0  ;;  %v5097_v51 = vld [vmem:[%s8090_s1 + $0x378] sm:$0xff] }
 0x1c1   :  { %v2720_v5 = vmax.f32 %v2592_v1, 0.0  ;;  %v3227_v6 = vpop.xlane.xlu1 %3226  ;;  %v2385_v8 = vadd.f32 %v4697_v55, %v4489_v39  ;;  %v2379_v9 = vpop.f32.mrb[109].mxu0  ;;  %v3441_v10 = vsel %vm299_vm0, %v3107_v33, 0.0  ;;  %v3109_v11 = vadd.f32 %v2981_v0, %v2846_v38  ;;  %v5098_v33 = vld [vmem:[%s8091_s0 + $0x378] sm:$0xff] }
 0x1c2   :  { %v2719_v12 = vmax.f32 %v2591_v3, 0.0  ;;  %3677 = vst.msk [vmem:[%s8095_s7 + $0xf0] sm:$0xff] %vm3646_vm1, %v3548_v27  ;;  %v3549_v13 = vadd.f32 %v6918_v53, %v3227_v6  ;;  %v2380_v14 = vadd.f32 %v2379_v9, %v1290_v28  ;;  %3439 = vadd.xlane.f32.xlu0 %v3438_v4  ;;  %v3108_v15 = vadd.f32 %v2980_v40, %v2845_v25  ;;  %v5099_v6 = vld [vmem:[%s8090_s1 + $0x388] sm:$0xff] }
 0x1c3   :  { %v2849_v18 = vmul.f32 %v5092_v17, %v5091_v16  ;;  %v2850_v31 = vmul.f32 %v5094_v20, %v5093_v19  ;;  %v2983_v32 = vmul.f32 %v7184_v61, %v2720_v5  ;;  %v2594_v21 = vadd.f32 %v7168_v44, %v2385_v8  ;;  %v3230_v22 = vpop.xlane.xlu0 %3229  ;;  %v4492_v23 = vpop.f32.mrb[110].mxu1  ;;  %v5100_v8 = vld [vmem:[%s8091_s0 + $0x388] sm:$0xff] }
 0x1c4   :  { %v2982_v24 = vmul.f32 %v7184_v61, %v2719_v12  ;;  %3678 = vst.msk [vmem:[%s8095_s7 + $0xf8] sm:$0xff] %vm3646_vm1, %v3549_v13  ;;  %v2593_v25 = vadd.f32 %v7168_v44, %v2380_v14  ;;  %3442 = vadd.xlane.f32.xlu1 %v3441_v10  ;;  %v3550_v26 = vadd.f32 %v6918_v53, %v3230_v22  ;;  %v4700_v37 = vpop.f32.mrb[110].mxu0  ;;  %v1300_v38 = vpop.f32.mrb[111].mxu1  ;;  %v3444_v42 = vsel %vm299_vm0, %v3108_v15, 0.0 }
 0x1c5   :  { %v2722_v29 = vmax.f32 %v2594_v21, 0.0  ;;  %v3233_v30 = vpop.xlane.xlu1 %3232  ;;  %v2395_v52 = vadd.f32 %v4700_v37, %v4492_v23  ;;  %v2389_v43 = vpop.f32.mrb[111].mxu0  ;;  %v3447_v45 = vsel %vm299_vm0, %v3109_v11, 0.0  ;;  %v3111_v46 = vadd.f32 %v2983_v32, %v2848_v63  ;;  %v5101_v23 = vld [vmem:[%s8090_s1 + $0x380] sm:$0xff] }
 0x1c6   :  { %v2721_v41 = vmax.f32 %v2593_v25, 0.0  ;;  %3679 = vst.msk [vmem:[%s8095_s7 + $0x100] sm:$0xff] %vm3646_vm1, %v3550_v26  ;;  %v3551_v47 = vadd.f32 %v6918_v53, %v3233_v30  ;;  %v2390_v48 = vadd.f32 %v2389_v43, %v1300_v38  ;;  %3445 = vadd.xlane.f32.xlu0 %v3444_v42  ;;  %v3110_v35 = vadd.f32 %v2982_v24, %v2847_v59  ;;  %v5102_v24 = vld [vmem:[%s8091_s0 + $0x380] sm:$0xff] }
 0x1c7   :  { %v2851_v50 = vmul.f32 %v5096_v49, %v5095_v36  ;;  %v2852_v34 = vmul.f32 %v5098_v33, %v5097_v51  ;;  %v2985_v54 = vmul.f32 %v7184_v61, %v2722_v29  ;;  %v2596_v56 = vadd.f32 %v7168_v44, %v2395_v52  ;;  %v3236_v57 = vpop.xlane.xlu0 %3235  ;;  %v4495_v58 = vpop.f32.mrb[112].mxu1 }
 0x1c8   :  { %v2984_v7 = vmul.f32 %v7184_v61, %v2721_v41  ;;  %3680 = vst.msk [vmem:[%s8095_s7 + $0x108] sm:$0xff] %vm3646_vm1, %v3551_v47  ;;  %v2595_v59 = vadd.f32 %v7168_v44, %v2390_v48  ;;  %3448 = vadd.xlane.f32.xlu1 %v3447_v45  ;;  %v3552_v60 = vadd.f32 %v6918_v53, %v3236_v57  ;;  %v4703_v62 = vpop.f32.mrb[112].mxu0  ;;  %v1310_v63 = vpop.f32.mrb[113].mxu1  ;;  %v3450_v0 = vsel %vm299_vm0, %v3110_v35, 0.0 }
 0x1c9   :  { %v2724_v1 = vmax.f32 %v2596_v56, 0.0  ;;  %v3239_v2 = vpop.xlane.xlu1 %3238  ;;  %v2405_v39 = vadd.f32 %v4703_v62, %v4495_v58  ;;  %v2399_v40 = vpop.f32.mrb[113].mxu0  ;;  %v3453_v3 = vsel %vm299_vm0, %v3111_v46, 0.0  ;;  %v3113_v27 = vadd.f32 %v2985_v54, %v2850_v31  ;;  %v5103_v54 = vld [vmem:[%s8090_s1 + $0x398] sm:$0xff] }
 0x1ca   :  { %v2723_v55 = vmax.f32 %v2595_v59, 0.0  ;;  %3681 = vst.msk [vmem:[%s8095_s7 + $0x110] sm:$0xff] %vm3646_vm1, %v3552_v60  ;;  %v3553_v28 = vadd.f32 %v6918_v53, %v3239_v2  ;;  %v2400_v4 = vadd.f32 %v2399_v40, %v1310_v63  ;;  %3451 = vadd.xlane.f32.xlu0 %v3450_v0  ;;  %v3112_v5 = vadd.f32 %v2984_v7, %v2849_v18  ;;  %v5104_v56 = vld [vmem:[%s8091_s0 + $0x398] sm:$0xff]  ;;  %v5105_v2 = vld [vmem:[%s8090_s1 + $0x390] sm:$0xff] }
 0x1cb   :  { %v2854_v9 = vmul.f32 %v5100_v8, %v5099_v6  ;;  %v2987_v10 = vmul.f32 %v7184_v61, %v2724_v1  ;;  %v2598_v11 = vadd.f32 %v7168_v44, %v2405_v39  ;;  %v3242_v12 = vpop.xlane.xlu0 %3241  ;;  %v3459_v21 = vsel %vm299_vm0, %v3113_v27, 0.0  ;;  %v5106_v39 = vld [vmem:[%s8091_s0 + $0x390] sm:$0xff] }
 0x1cc   :  { %v2986_v13 = vmul.f32 %v7184_v61, %v2723_v55  ;;  %3682 = vst.msk [vmem:[%s8095_s7 + $0x118] sm:$0xff] %vm3646_vm1, %v3553_v28  ;;  %v2597_v14 = vadd.f32 %v7168_v44, %v2400_v4  ;;  %3454 = vadd.xlane.f32.xlu1 %v3453_v3  ;;  %v3554_v15 = vadd.f32 %v6918_v53, %v3242_v12  ;;  %v4498_v16 = vpop.f32.mrb[114].mxu1  ;;  %v4706_v17 = vpop.f32.mrb[114].mxu0  ;;  %v3456_v18 = vsel %vm299_vm0, %v3112_v5, 0.0  ;;  %v5107_v12 = vld [vmem:[%s8090_s1 + $0x3a0] sm:$0xff] }
 0x1cd   :  { %v2726_v19 = vmax.f32 %v2598_v11, 0.0  ;;  %v3245_v20 = vpop.xlane.xlu1 %3244  ;;  %v2415_v31 = vadd.f32 %v4706_v17, %v4498_v16  ;;  %v1320_v32 = vpop.f32.mrb[115].mxu1  ;;  %v3115_v22 = vadd.f32 %v2987_v10, %v2852_v34  ;;  %v2853_v25 = vmul.f32 %v5102_v24, %v5101_v23  ;;  %v5110_v16 = vld [vmem:[%s8091_s0 + $0x3a8] sm:$0xff]  ;;  %v5111_v24 = vld [vmem:[%s8090_s1 + $0x3b0] sm:$0xff] }
 0x1ce   :  { %v2725_v26 = vmax.f32 %v2597_v14, 0.0  ;;  %3683 = vst.msk [vmem:[%s8095_s7 + $0x120] sm:$0xff] %vm3646_vm1, %v3554_v15  ;;  %v3555_v37 = vadd.f32 %v6918_v53, %v3245_v20  ;;  %v2409_v38 = vpop.f32.mrb[115].mxu0  ;;  %3457 = vadd.xlane.f32.xlu0 %v3456_v18  ;;  %v3114_v42 = vadd.f32 %v2986_v13, %v2851_v50  ;;  %v2856_v57 = vmul.f32 %v5104_v56, %v5103_v54  ;;  %v5108_v13 = vld [vmem:[%s8091_s0 + $0x3a0] sm:$0xff]  ;;  %v5109_v15 = vld [vmem:[%s8090_s1 + $0x3a8] sm:$0xff] }
 0x1cf   :  { %v2989_v29 = vmul.f32 %v7184_v61, %v2726_v19  ;;  %v2600_v30 = vadd.f32 %v7168_v44, %v2415_v31  ;;  %v2410_v52 = vadd.f32 %v2409_v38, %v1320_v32  ;;  %v3248_v43 = vpop.xlane.xlu0 %3247  ;;  %v3465_v35 = vsel %vm299_vm0, %v3115_v22, 0.0 }
 0x1d0   :  { %v2988_v45 = vmul.f32 %v7184_v61, %v2725_v26  ;;  %3684 = vst.msk [vmem:[%s8095_s7 + $0x128] sm:$0xff] %vm3646_vm1, %v3555_v37  ;;  %3460 = vadd.xlane.f32.xlu1 %v3459_v21  ;;  %v3556_v46 = vadd.f32 %v6918_v53, %v3248_v43  ;;  %v4501_v41 = vpop.f32.mrb[116].mxu1  ;;  %v4709_v47 = vpop.f32.mrb[116].mxu0  ;;  %v3462_v48 = vsel %vm299_vm0, %v3114_v42, 0.0  ;;  %v2855_v40 = vmul.f32 %v5106_v39, %v5105_v2 }
 0x1d1   :  { %v2728_v36 = vmax.f32 %v2600_v30, 0.0  ;;  %v2599_v49 = vadd.f32 %v7168_v44, %v2410_v52  ;;  %v3251_v50 = vpop.xlane.xlu1 %3250  ;;  %v2425_v51 = vadd.f32 %v4709_v47, %v4501_v41  ;;  %v1330_v33 = vpop.f32.mrb[117].mxu1  ;;  %v3117_v34 = vadd.f32 %v2989_v29, %v2854_v9 }
 0x1d2   :  { %3685 = vst.msk [vmem:[%s8095_s7 + $0x130] sm:$0xff] %vm3646_vm1, %v3556_v46  ;;  %v3557_v58 = vadd.f32 %v6918_v53, %v3251_v50  ;;  %v2419_v7 = vpop.f32.mrb[117].mxu0  ;;  %3463 = vadd.xlane.f32.xlu0 %v3462_v48  ;;  %v3116_v59 = vadd.f32 %v2988_v45, %v2853_v25  ;;  %v2857_v14 = vmul.f32 %v5108_v13, %v5107_v12  ;;  %v5112_v25 = vld [vmem:[%s8091_s0 + $0x3b0] sm:$0xff]  ;;  %v5113_v48 = vld [vmem:[%s8090_s1 + $0x3b8] sm:$0xff] }
 0x1d3   :  { %v2991_v60 = vmul.f32 %v7184_v61, %v2728_v36  ;;  %v2727_v62 = vmax.f32 %v2599_v49, 0.0  ;;  %v2602_v63 = vadd.f32 %v7168_v44, %v2425_v51  ;;  %v2420_v0 = vadd.f32 %v2419_v7, %v1330_v33  ;;  %v3254_v1 = vpop.xlane.xlu0 %3253  ;;  %v5115_v7 = vld [vmem:[%s8090_s1 + $0x3c0] sm:$0xff] }
 0x1d4   :  { %3686 = vst.msk [vmem:[%s8095_s7 + $0x138] sm:$0xff] %vm3646_vm1, %v3557_v58  ;;  %3466 = vadd.xlane.f32.xlu1 %v3465_v35  ;;  %v3558_v3 = vadd.f32 %v6918_v53, %v3254_v1  ;;  %v4504_v27 = vpop.f32.mrb[118].mxu1  ;;  %v4712_v55 = vpop.f32.mrb[118].mxu0  ;;  %v3468_v28 = vsel %vm299_vm0, %v3116_v59, 0.0  ;;  %v3471_v4 = vsel %vm299_vm0, %v3117_v34, 0.0  ;;  %v2858_v17 = vmul.f32 %v5110_v16, %v5109_v15  ;;  %v5114_v35 = vld [vmem:[%s8091_s0 + $0x3b8] sm:$0xff] }
 0x1d5   :  { %v2990_v5 = vmul.f32 %v7184_v61, %v2727_v62  ;;  %v2730_v6 = vmax.f32 %v2602_v63, 0.0  ;;  %v2601_v8 = vadd.f32 %v7168_v44, %v2420_v0  ;;  %v3257_v9 = vpop.xlane.xlu1 %3256  ;;  %v2435_v10 = vadd.f32 %v4712_v55, %v4504_v27  ;;  %v1340_v11 = vpop.f32.mrb[119].mxu1  ;;  %v5116_v59 = vld [vmem:[%s8091_s0 + $0x3c0] sm:$0xff] }
 0x1d6   :  { %3687 = vst.msk [vmem:[%s8095_s7 + $0x140] sm:$0xff] %vm3646_vm1, %v3558_v3  ;;  %v3559_v18 = vadd.f32 %v6918_v53, %v3257_v9  ;;  %v2429_v19 = vpop.f32.mrb[119].mxu0  ;;  %3469 = vadd.xlane.f32.xlu0 %v3468_v28  ;;  %v3119_v20 = vadd.f32 %v2991_v60, %v2856_v57  ;;  %v7557_v26 = vmul.f32 %v5112_v25, %v5111_v24 }
 0x1d7   :  { %v2993_v31 = vmul.f32 %v7184_v61, %v2730_v6  ;;  %v2729_v32 = vmax.f32 %v2601_v8, 0.0  ;;  %v2604_v21 = vadd.f32 %v7168_v44, %v2435_v10  ;;  %v2430_v22 = vadd.f32 %v2429_v19, %v1340_v11  ;;  %v3260_v23 = vpop.xlane.xlu0 %3259 }
 0x1d8   :  { %3688 = vst.msk [vmem:[%s8095_s7 + $0x148] sm:$0xff] %vm3646_vm1, %v3559_v18  ;;  %3472 = vadd.xlane.f32.xlu1 %v3471_v4  ;;  %v3560_v37 = vadd.f32 %v6918_v53, %v3260_v23  ;;  %v4507_v38 = vpop.f32.mrb[120].mxu1  ;;  %v4715_v42 = vpop.f32.mrb[120].mxu0  ;;  %v3118_v29 = vadd.f32 %v2990_v5, %v2855_v40  ;;  %v3477_v30 = vsel %vm299_vm0, %v3119_v20, 0.0  ;;  %v2860_v36 = vmul.f32 %v5114_v35, %v5113_v48  ;;  %v5117_v4 = vld [vmem:[%s8090_s1 + $0x3c8] sm:$0xff]  ;;  %v5120_v18 = vld [vmem:[%s8091_s0 + $0x3d0] sm:$0xff] }
 0x1d9   :  { %v2992_v52 = vmul.f32 %v7184_v61, %v2729_v32  ;;  %v2732_v43 = vmax.f32 %v2604_v21, 0.0  ;;  %v2603_v45 = vadd.f32 %v7168_v44, %v2430_v22  ;;  %v3263_v46 = vpop.xlane.xlu1 %3262  ;;  %v2445_v41 = vadd.f32 %v4715_v42, %v4507_v38  ;;  %v1350_v47 = vpop.f32.mrb[121].mxu1  ;;  %v5118_v5 = vld [vmem:[%s8091_s0 + $0x3c8] sm:$0xff] }
 0x1da   :  { %3689 = vst.msk [vmem:[%s8095_s7 + $0x150] sm:$0xff] %vm3646_vm1, %v3560_v37  ;;  %v3561_v49 = vadd.f32 %v6918_v53, %v3263_v46  ;;  %v2439_v50 = vpop.f32.mrb[121].mxu0  ;;  %v3474_v51 = vsel %vm299_vm0, %v3118_v29, 0.0  ;;  %v3121_v33 = vadd.f32 %v2993_v31, %v2858_v17  ;;  %v7587_v60 = vmul.f32 %v5116_v59, %v5115_v7  ;;  %v5119_v17 = vld [vmem:[%s8090_s1 + $0x3d0] sm:$0xff]  ;;  %v5121_v29 = vld [vmem:[%s8090_s1 + $0x3d8] sm:$0xff] }
 0x1db   :  { %v2995_v34 = vmul.f32 %v7184_v61, %v2732_v43  ;;  %v2731_v54 = vmax.f32 %v2603_v45, 0.0  ;;  %v2606_v56 = vadd.f32 %v7168_v44, %v2445_v41  ;;  %v2440_v57 = vadd.f32 %v2439_v50, %v1350_v47  ;;  %3475 = vadd.xlane.f32.xlu0 %v3474_v51  ;;  %v3266_v58 = vpop.xlane.xlu0 %3265  ;;  %v5124_v50 = vld [vmem:[%s8091_s0 + $0x3e8] sm:$0xff] }
 0x1dc   :  { %3690 = vst.msk [vmem:[%s8095_s7 + $0x158] sm:$0xff] %vm3646_vm1, %v3561_v49  ;;  %3478 = vadd.xlane.f32.xlu1 %v3477_v30  ;;  %v3562_v62 = vadd.f32 %v6918_v53, %v3266_v58  ;;  %v4510_v63 = vpop.f32.mrb[122].mxu1  ;;  %v4718_v0 = vpop.f32.mrb[122].mxu0  ;;  %v3120_v1 = vadd.f32 %v2992_v52, %v2857_v14  ;;  %v3483_v2 = vsel %vm299_vm0, %v3121_v33, 0.0  ;;  %v2862_v6 = vmul.f32 %v5118_v5, %v5117_v4  ;;  %v5122_v30 = vld [vmem:[%s8091_s0 + $0x3d8] sm:$0xff]  ;;  %v5123_v49 = vld [vmem:[%s8090_s1 + $0x3e8] sm:$0xff] }
 0x1dd   :  { %v2994_v39 = vmul.f32 %v7184_v61, %v2731_v54  ;;  %v2734_v40 = vmax.f32 %v2606_v56, 0.0  ;;  %v2605_v3 = vadd.f32 %v7168_v44, %v2440_v57  ;;  %v3269_v27 = vpop.xlane.xlu1 %3268  ;;  %v2455_v55 = vadd.f32 %v4718_v0, %v4510_v63  ;;  %v1360_v28 = vpop.f32.mrb[123].mxu1 }
 0x1de   :  { %3691 = vst.msk [vmem:[%s8095_s7 + $0x160] sm:$0xff] %vm3646_vm1, %v3562_v62  ;;  %v3563_v8 = vadd.f32 %v6918_v53, %v3269_v27  ;;  %v2449_v9 = vpop.f32.mrb[123].mxu0  ;;  %v3480_v10 = vsel %vm299_vm0, %v3120_v1, 0.0  ;;  %v3123_v11 = vadd.f32 %v2995_v34, %v2860_v36  ;;  %v7617_v19 = vmul.f32 %v5120_v18, %v5119_v17  ;;  %v5125_v1 = vld [vmem:[%s8090_s1 + $0x3e0] sm:$0xff] }
 0x1df   :  { %v2997_v12 = vmul.f32 %v7184_v61, %v2734_v40  ;;  %v2733_v13 = vmax.f32 %v2605_v3, 0.0  ;;  %v2608_v14 = vadd.f32 %v7168_v44, %v2455_v55  ;;  %v2450_v15 = vadd.f32 %v2449_v9, %v1360_v28  ;;  %3481 = vadd.xlane.f32.xlu0 %v3480_v10  ;;  %v3272_v16 = vpop.xlane.xlu0 %3271  ;;  %v5128_v9 = vld [vmem:[%s8091_s0 + $0x3f8] sm:$0xff] }
 0x1e0   :  { %3692 = vst.msk [vmem:[%s8095_s7 + $0x168] sm:$0xff] %vm3646_vm1, %v3563_v8  ;;  %3484 = vadd.xlane.f32.xlu1 %v3483_v2  ;;  %v3564_v20 = vadd.f32 %v6918_v53, %v3272_v16  ;;  %v4513_v31 = vpop.f32.mrb[124].mxu1  ;;  %v4721_v32 = vpop.f32.mrb[124].mxu0  ;;  %v3122_v21 = vadd.f32 %v2994_v39, %v7557_v26  ;;  %v3489_v22 = vsel %vm299_vm0, %v3123_v11, 0.0  ;;  %v2864_v52 = vmul.f32 %v5122_v30, %v5121_v29  ;;  %v5126_v2 = vld [vmem:[%s8091_s0 + $0x3e0] sm:$0xff]  ;;  %v5127_v8 = vld [vmem:[%s8090_s1 + $0x3f8] sm:$0xff] }
 0x1e1   :  { %v2996_v23 = vmul.f32 %v7184_v61, %v2733_v13  ;;  %v2736_v24 = vmax.f32 %v2608_v14, 0.0  ;;  %v2607_v25 = vadd.f32 %v7168_v44, %v2450_v15  ;;  %v3275_v37 = vpop.xlane.xlu1 %3274  ;;  %v2465_v38 = vadd.f32 %v4721_v32, %v4513_v31  ;;  %v1370_v42 = vpop.f32.mrb[125].mxu1  ;;  %v5130_v32 = vld [vmem:[%s8091_s0 + $0x3f0] sm:$0xff] }
 0x1e2   :  { %3693 = vst.msk [vmem:[%s8095_s7 + $0x170] sm:$0xff] %vm3646_vm1, %v3564_v20  ;;  %v3565_v26 = vadd.f32 %v6918_v53, %v3275_v37  ;;  %v2459_v43 = vpop.f32.mrb[125].mxu0  ;;  %v3486_v45 = vsel %vm299_vm0, %v3122_v21, 0.0  ;;  %v3125_v46 = vadd.f32 %v2997_v12, %v2862_v6  ;;  %v2866_v51 = vmul.f32 %v5124_v50, %v5123_v49 }
 0x1e3   :  { %v2999_v41 = vmul.f32 %v7184_v61, %v2736_v24  ;;  %v2735_v47 = vmax.f32 %v2607_v25, 0.0  ;;  %v2610_v48 = vadd.f32 %v7168_v44, %v2465_v38  ;;  %v2460_v35 = vadd.f32 %v2459_v43, %v1370_v42  ;;  %3487 = vadd.xlane.f32.xlu0 %v3486_v45  ;;  %v3278_v36 = vpop.xlane.xlu0 %3277 }
 0x1e4   :  { %3694 = vst.msk [vmem:[%s8095_s7 + $0x178] sm:$0xff] %vm3646_vm1, %v3565_v26  ;;  %3490 = vadd.xlane.f32.xlu1 %v3489_v22  ;;  %v3566_v33 = vadd.f32 %v6918_v53, %v3278_v36  ;;  %v4516_v34 = vpop.f32.mrb[126].mxu1  ;;  %v4724_v54 = vpop.f32.mrb[126].mxu0  ;;  %v3124_v56 = vadd.f32 %v2996_v23, %v7587_v60  ;;  %v3495_v57 = vsel %vm299_vm0, %v3125_v46, 0.0  ;;  %v2865_v39 = vmul.f32 %v5126_v2, %v5125_v1 }
 0x1e5   :  { %v2998_v58 = vmul.f32 %v7184_v61, %v2735_v47  ;;  %v2738_v7 = vmax.f32 %v2610_v48, 0.0  ;;  %v2609_v59 = vadd.f32 %v7168_v44, %v2460_v35  ;;  %v3281_v62 = vpop.xlane.xlu1 %3280  ;;  %v2475_v63 = vadd.f32 %v4724_v54, %v4516_v34  ;;  %v1380_v0 = vpop.f32.mrb[127].mxu1 }
 0x1e6   :  { %3695 = vst.msk [vmem:[%s8095_s7 + $0x180] sm:$0xff] %vm3646_vm1, %v3566_v33  ;;  %v3567_v60 = vadd.f32 %v6918_v53, %v3281_v62  ;;  %v2469_v40 = vpop.f32.mrb[127].mxu0  ;;  %v3492_v3 = vsel %vm299_vm0, %v3124_v56, 0.0  ;;  %v3127_v27 = vadd.f32 %v2999_v41, %v2864_v52  ;;  %v2868_v10 = vmul.f32 %v5128_v9, %v5127_v8 }
 0x1e7   :  { %v3001_v55 = vmul.f32 %v7184_v61, %v2738_v7  ;;  %v2737_v28 = vmax.f32 %v2609_v59, 0.0  ;;  %v2612_v4 = vadd.f32 %v7168_v44, %v2475_v63  ;;  %v2470_v5 = vadd.f32 %v2469_v40, %v1380_v0  ;;  %3493 = vadd.xlane.f32.xlu0 %v3492_v3  ;;  %v3284_v6 = vpop.xlane.xlu0 %3283 }
 0x1e8   :  { %3696 = vst.msk [vmem:[%s8095_s7 + $0x188] sm:$0xff] %vm3646_vm1, %v3567_v60  ;;  %3496 = vadd.xlane.f32.xlu1 %v3495_v57  ;;  %v3568_v11 = vadd.f32 %v6918_v53, %v3284_v6  ;;  %v3126_v12 = vadd.f32 %v2998_v58, %v7617_v19  ;;  %v3501_v13 = vsel %vm299_vm0, %v3127_v27, 0.0  ;;  %v5129_v19 = vld [vmem:[%s8090_s1 + $0x3f0] sm:$0xff] }
 0x1e9   :  { %v3000_v14 = vmul.f32 %v7184_v61, %v2737_v28  ;;  %v2740_v15 = vmax.f32 %v2612_v4, 0.0  ;;  %v2611_v16 = vadd.f32 %v7168_v44, %v2470_v5  ;;  %v3287_v17 = vpop.xlane.xlu1 %3286  ;;  %v3129_v18 = vadd.f32 %v3001_v55, %v2866_v51 }
 0x1ea   :  { %3697 = vst.msk [vmem:[%s8095_s7 + $0x190] sm:$0xff] %vm3646_vm1, %v3568_v11  ;;  %v3569_v20 = vadd.f32 %v6918_v53, %v3287_v17  ;;  %v3498_v31 = vsel %vm299_vm0, %v3126_v12, 0.0  ;;  %v2867_v44 = vmul.f32 %v5130_v32, %v5129_v19 }
 0x1eb   :  { %v3003_v21 = vmul.f32 %v7184_v61, %v2740_v15  ;;  %v2739_v22 = vmax.f32 %v2611_v16, 0.0  ;;  %3499 = vadd.xlane.f32.xlu0 %v3498_v31  ;;  %v3290_v23 = vpop.xlane.xlu0 %3289  ;;  %v3128_v24 = vadd.f32 %v3000_v14, %v2865_v39  ;;  %v3507_v29 = vsel %vm299_vm0, %v3129_v18, 0.0 }
 0x1ec   :  { %3698 = vst.msk [vmem:[%s8095_s7 + $0x198] sm:$0xff] %vm3646_vm1, %v3569_v20  ;;  %3502 = vadd.xlane.f32.xlu1 %v3501_v13  ;;  %v3570_v25 = vadd.f32 %v6918_v53, %v3290_v23 }
 0x1ed   :  { %v3002_v37 = vmul.f32 %v7184_v61, %v2739_v22  ;;  %v3293_v38 = vpop.xlane.xlu1 %3292  ;;  %v3504_v42 = vsel %vm299_vm0, %v3128_v24, 0.0  ;;  %v3131_v30 = vadd.f32 %v3003_v21, %v2868_v10 }
 0x1ee   :  { %3699 = vst.msk [vmem:[%s8095_s7 + $0x1a0] sm:$0xff] %vm3646_vm1, %v3570_v25  ;;  %v3571_v52 = vadd.f32 %v6918_v53, %v3293_v38 }
 0x1ef   :  { %3505 = vadd.xlane.f32.xlu0 %v3504_v42  ;;  %v3296_v26 = vpop.xlane.xlu0 %3295  ;;  %v3130_v43 = vadd.f32 %v3002_v37, %v2867_v44  ;;  %v3513_v41 = vsel %vm299_vm0, %v3131_v30, 0.0 }
 0x1f0   :  { %3700 = vst.msk [vmem:[%s8095_s7 + $0x1a8] sm:$0xff] %vm3646_vm1, %v3571_v52  ;;  %3508 = vadd.xlane.f32.xlu1 %v3507_v29  ;;  %v3572_v61 = vadd.f32 %v6918_v53, %v3296_v26 }
 0x1f1   :  { %v3299_v45 = vpop.xlane.xlu1 %3298  ;;  %v3510_v46 = vsel %vm299_vm0, %v3130_v43, 0.0 }
 0x1f2   :  { %3701 = vst.msk [vmem:[%s8095_s7 + $0x1b0] sm:$0xff] %vm3646_vm1, %v3572_v61  ;;  %v3573_v47 = vadd.f32 %v6918_v53, %v3299_v45 }
 0x1f3   :  { %3511 = vadd.xlane.f32.xlu0 %v3510_v46  ;;  %v3302_v48 = vpop.xlane.xlu0 %3301 }
 0x1f4   :  { %3702 = vst.msk [vmem:[%s8095_s7 + $0x1b8] sm:$0xff] %vm3646_vm1, %v3573_v47  ;;  %3514 = vadd.xlane.f32.xlu1 %v3513_v41  ;;  %v3574_v35 = vadd.f32 %v6918_v53, %v3302_v48 }
 0x1f5   :  { %v3305_v36 = vpop.xlane.xlu1 %3304 }
 0x1f6   :  { %3703 = vst.msk [vmem:[%s8095_s7 + $0x1c0] sm:$0xff] %vm3646_vm1, %v3574_v35  ;;  %v3575_v49 = vadd.f32 %v6918_v53, %v3305_v36 }
 0x1f7   :  { %v3308_v50 = vpop.xlane.xlu0 %3307 }
 0x1f8   :  { %3704 = vst.msk [vmem:[%s8095_s7 + $0x1c8] sm:$0xff] %vm3646_vm1, %v3575_v49  ;;  %v3576_v51 = vadd.f32 %v6918_v53, %v3308_v50 }
 0x1f9   :  { %v3311_v33 = vpop.xlane.xlu1 %3310 }
 0x1fa   :  { %3705 = vst.msk [vmem:[%s8095_s7 + $0x1d0] sm:$0xff] %vm3646_vm1, %v3576_v51  ;;  %v3577_v34 = vadd.f32 %v6918_v53, %v3311_v33 }
 0x1fb   :  { %v3314_v54 = vpop.xlane.xlu0 %3313 }
 0x1fc   :  { %3706 = vst.msk [vmem:[%s8095_s7 + $0x1d8] sm:$0xff] %vm3646_vm1, %v3577_v34  ;;  %v3578_v56 = vadd.f32 %v6918_v53, %v3314_v54 }
 0x1fd   :  { %v3317_v57 = vpop.xlane.xlu1 %3316 }
 0x1fe   :  { %3707 = vst.msk [vmem:[%s8095_s7 + $0x1e0] sm:$0xff] %vm3646_vm1, %v3578_v56  ;;  %v3579_v58 = vadd.f32 %v6918_v53, %v3317_v57 }
 0x1ff   :  { %v3320_v7 = vpop.xlane.xlu0 %3319 }
 0x200   :  { %3708 = vst.msk [vmem:[%s8095_s7 + $0x1e8] sm:$0xff] %vm3646_vm1, %v3579_v58  ;;  %v3580_v59 = vadd.f32 %v6918_v53, %v3320_v7 }
 0x201   :  { %v3323_v62 = vpop.xlane.xlu1 %3322 }
 0x202   :  { %3709 = vst.msk [vmem:[%s8095_s7 + $0x1f0] sm:$0xff] %vm3646_vm1, %v3580_v59  ;;  %v3581_v63 = vadd.f32 %v6918_v53, %v3323_v62 }
 0x203   :  { %v3326_v0 = vpop.xlane.xlu0 %3325 }
 0x204   :  { %3710 = vst.msk [vmem:[%s8095_s7 + $0x1f8] sm:$0xff] %vm3646_vm1, %v3581_v63  ;;  %v3582_v1 = vadd.f32 %v6918_v53, %v3326_v0 }
 0x205   :  { %v3329_v2 = vpop.xlane.xlu1 %3328 }
 0x206   :  { %3711 = vst.msk [vmem:[%s8095_s7 + $0x200] sm:$0xff] %vm3646_vm1, %v3582_v1  ;;  %v3583_v39 = vadd.f32 %v6918_v53, %v3329_v2 }
 0x207   :  { %v3332_v60 = vpop.xlane.xlu0 %3331 }
 0x208   :  { %3712 = vst.msk [vmem:[%s8095_s7 + $0x208] sm:$0xff] %vm3646_vm1, %v3583_v39  ;;  %v3584_v40 = vadd.f32 %v6918_v53, %v3332_v60 }
 0x209   :  { %v3335_v3 = vpop.xlane.xlu1 %3334 }
 0x20a   :  { %3713 = vst.msk [vmem:[%s8095_s7 + $0x210] sm:$0xff] %vm3646_vm1, %v3584_v40  ;;  %v3585_v27 = vadd.f32 %v6918_v53, %v3335_v3 }
 0x20b   :  { %v3338_v55 = vpop.xlane.xlu0 %3337 }
 0x20c   :  { %3714 = vst.msk [vmem:[%s8095_s7 + $0x218] sm:$0xff] %vm3646_vm1, %v3585_v27  ;;  %v3586_v28 = vadd.f32 %v6918_v53, %v3338_v55 }
 0x20d   :  { %v3341_v4 = vpop.xlane.xlu1 %3340 }
 0x20e   :  { %3715 = vst.msk [vmem:[%s8095_s7 + $0x220] sm:$0xff] %vm3646_vm1, %v3586_v28  ;;  %v3587_v5 = vadd.f32 %v6918_v53, %v3341_v4 }
 0x20f   :  { %v3344_v6 = vpop.xlane.xlu0 %3343 }
 0x210   :  { %3716 = vst.msk [vmem:[%s8095_s7 + $0x228] sm:$0xff] %vm3646_vm1, %v3587_v5  ;;  %v3588_v8 = vadd.f32 %v6918_v53, %v3344_v6 }
 0x211   :  { %v3347_v9 = vpop.xlane.xlu1 %3346 }
 0x212   :  { %3717 = vst.msk [vmem:[%s8095_s7 + $0x230] sm:$0xff] %vm3646_vm1, %v3588_v8  ;;  %v3589_v10 = vadd.f32 %v6918_v53, %v3347_v9 }
 0x213   :  { %v3350_v11 = vpop.xlane.xlu0 %3349 }
 0x214   :  { %3718 = vst.msk [vmem:[%s8095_s7 + $0x238] sm:$0xff] %vm3646_vm1, %v3589_v10  ;;  %v3590_v12 = vadd.f32 %v6918_v53, %v3350_v11 }
 0x215   :  { %v3353_v13 = vpop.xlane.xlu1 %3352 }
 0x216   :  { %3719 = vst.msk [vmem:[%s8095_s7 + $0x240] sm:$0xff] %vm3646_vm1, %v3590_v12  ;;  %v3591_v14 = vadd.f32 %v6918_v53, %v3353_v13 }
 0x217   :  { %v3356_v15 = vpop.xlane.xlu0 %3355 }
 0x218   :  { %3720 = vst.msk [vmem:[%s8095_s7 + $0x248] sm:$0xff] %vm3646_vm1, %v3591_v14  ;;  %v3592_v16 = vadd.f32 %v6918_v53, %v3356_v15 }
 0x219   :  { %v3359_v17 = vpop.xlane.xlu1 %3358 }
 0x21a   :  { %3721 = vst.msk [vmem:[%s8095_s7 + $0x250] sm:$0xff] %vm3646_vm1, %v3592_v16  ;;  %v3593_v18 = vadd.f32 %v6918_v53, %v3359_v17 }
 0x21b   :  { %v3362_v20 = vpop.xlane.xlu0 %3361 }
 0x21c   :  { %3722 = vst.msk [vmem:[%s8095_s7 + $0x258] sm:$0xff] %vm3646_vm1, %v3593_v18  ;;  %v3594_v31 = vadd.f32 %v6918_v53, %v3362_v20 }
 0x21d   :  { %v3365_v19 = vpop.xlane.xlu1 %3364 }
 0x21e   :  { %3723 = vst.msk [vmem:[%s8095_s7 + $0x260] sm:$0xff] %vm3646_vm1, %v3594_v31  ;;  %v3595_v32 = vadd.f32 %v6918_v53, %v3365_v19 }
 0x21f   :  { %v3368_v44 = vpop.xlane.xlu0 %3367 }
 0x220   :  { %3724 = vst.msk [vmem:[%s8095_s7 + $0x268] sm:$0xff] %vm3646_vm1, %v3595_v32  ;;  %v3596_v21 = vadd.f32 %v6918_v53, %v3368_v44 }
 0x221   :  { %v3371_v22 = vpop.xlane.xlu1 %3370 }
 0x222   :  { %3725 = vst.msk [vmem:[%s8095_s7 + $0x270] sm:$0xff] %vm3646_vm1, %v3596_v21  ;;  %v3597_v23 = vadd.f32 %v6918_v53, %v3371_v22 }
 0x223   :  { %v3374_v24 = vpop.xlane.xlu0 %3373 }
 0x224   :  { %3726 = vst.msk [vmem:[%s8095_s7 + $0x278] sm:$0xff] %vm3646_vm1, %v3597_v23  ;;  %v3598_v25 = vadd.f32 %v6918_v53, %v3374_v24 }
 0x225   :  { %v3377_v37 = vpop.xlane.xlu1 %3376 }
 0x226   :  { %3727 = vst.msk [vmem:[%s8095_s7 + $0x280] sm:$0xff] %vm3646_vm1, %v3598_v25  ;;  %v3599_v38 = vadd.f32 %v6918_v53, %v3377_v37 }
 0x227   :  { %v3380_v42 = vpop.xlane.xlu0 %3379 }
 0x228   :  { %3728 = vst.msk [vmem:[%s8095_s7 + $0x288] sm:$0xff] %vm3646_vm1, %v3599_v38  ;;  %v3600_v29 = vadd.f32 %v6918_v53, %v3380_v42 }
 0x229   :  { %v3383_v30 = vpop.xlane.xlu1 %3382 }
 0x22a   :  { %3729 = vst.msk [vmem:[%s8095_s7 + $0x290] sm:$0xff] %vm3646_vm1, %v3600_v29  ;;  %v3601_v52 = vadd.f32 %v6918_v53, %v3383_v30 }
 0x22b   :  { %v3386_v26 = vpop.xlane.xlu0 %3385 }
 0x22c   :  { %3730 = vst.msk [vmem:[%s8095_s7 + $0x298] sm:$0xff] %vm3646_vm1, %v3601_v52  ;;  %v3602_v43 = vadd.f32 %v6918_v53, %v3386_v26 }
 0x22d   :  { %v3389_v61 = vpop.xlane.xlu1 %3388 }
 0x22e   :  { %3731 = vst.msk [vmem:[%s8095_s7 + $0x2a0] sm:$0xff] %vm3646_vm1, %v3602_v43  ;;  %v3603_v45 = vadd.f32 %v6918_v53, %v3389_v61 }
 0x22f   :  { %v3392_v46 = vpop.xlane.xlu0 %3391 }
 0x230   :  { %3732 = vst.msk [vmem:[%s8095_s7 + $0x2a8] sm:$0xff] %vm3646_vm1, %v3603_v45  ;;  %v3604_v41 = vadd.f32 %v6918_v53, %v3392_v46 }
 0x231   :  { %v3395_v47 = vpop.xlane.xlu1 %3394 }
 0x232   :  { %3733 = vst.msk [vmem:[%s8095_s7 + $0x2b0] sm:$0xff] %vm3646_vm1, %v3604_v41  ;;  %v3605_v48 = vadd.f32 %v6918_v53, %v3395_v47 }
 0x233   :  { %v3398_v35 = vpop.xlane.xlu0 %3397 }
 0x234   :  { %3734 = vst.msk [vmem:[%s8095_s7 + $0x2b8] sm:$0xff] %vm3646_vm1, %v3605_v48  ;;  %v3606_v36 = vadd.f32 %v6918_v53, %v3398_v35 }
 0x235   :  { %v3401_v49 = vpop.xlane.xlu1 %3400 }
 0x236   :  { %3735 = vst.msk [vmem:[%s8095_s7 + $0x2c0] sm:$0xff] %vm3646_vm1, %v3606_v36  ;;  %v3607_v50 = vadd.f32 %v6918_v53, %v3401_v49 }
 0x237   :  { %v3404_v51 = vpop.xlane.xlu0 %3403 }
 0x238   :  { %3736 = vst.msk [vmem:[%s8095_s7 + $0x2c8] sm:$0xff] %vm3646_vm1, %v3607_v50  ;;  %v3608_v33 = vadd.f32 %v6918_v53, %v3404_v51 }
 0x239   :  { %v3407_v34 = vpop.xlane.xlu1 %3406 }
 0x23a   :  { %3737 = vst.msk [vmem:[%s8095_s7 + $0x2d0] sm:$0xff] %vm3646_vm1, %v3608_v33  ;;  %v3609_v54 = vadd.f32 %v6918_v53, %v3407_v34 }
 0x23b   :  { %v3410_v56 = vpop.xlane.xlu0 %3409 }
 0x23c   :  { %3738 = vst.msk [vmem:[%s8095_s7 + $0x2d8] sm:$0xff] %vm3646_vm1, %v3609_v54  ;;  %v3610_v57 = vadd.f32 %v6918_v53, %v3410_v56 }
 0x23d   :  { %v3413_v58 = vpop.xlane.xlu1 %3412 }
 0x23e   :  { %3739 = vst.msk [vmem:[%s8095_s7 + $0x2e0] sm:$0xff] %vm3646_vm1, %v3610_v57  ;;  %v3611_v7 = vadd.f32 %v6918_v53, %v3413_v58 }
 0x23f   :  { %v3416_v59 = vpop.xlane.xlu0 %3415 }
 0x240   :  { %3740 = vst.msk [vmem:[%s8095_s7 + $0x2e8] sm:$0xff] %vm3646_vm1, %v3611_v7  ;;  %v3612_v62 = vadd.f32 %v6918_v53, %v3416_v59 }
 0x241   :  { %v3419_v63 = vpop.xlane.xlu1 %3418 }
 0x242   :  { %3741 = vst.msk [vmem:[%s8095_s7 + $0x2f0] sm:$0xff] %vm3646_vm1, %v3612_v62  ;;  %v3613_v0 = vadd.f32 %v6918_v53, %v3419_v63 }
 0x243   :  { %v3422_v1 = vpop.xlane.xlu0 %3421 }
 0x244   :  { %3742 = vst.msk [vmem:[%s8095_s7 + $0x2f8] sm:$0xff] %vm3646_vm1, %v3613_v0  ;;  %v3614_v2 = vadd.f32 %v6918_v53, %v3422_v1 }
 0x245   :  { %v3425_v39 = vpop.xlane.xlu1 %3424 }
 0x246   :  { %3743 = vst.msk [vmem:[%s8095_s7 + $0x300] sm:$0xff] %vm3646_vm1, %v3614_v2  ;;  %v3615_v60 = vadd.f32 %v6918_v53, %v3425_v39 }
 0x247   :  { %v3428_v40 = vpop.xlane.xlu0 %3427 }
 0x248   :  { %3744 = vst.msk [vmem:[%s8095_s7 + $0x308] sm:$0xff] %vm3646_vm1, %v3615_v60  ;;  %v3616_v3 = vadd.f32 %v6918_v53, %v3428_v40 }
 0x249   :  { %v3431_v27 = vpop.xlane.xlu1 %3430 }
 0x24a   :  { %3745 = vst.msk [vmem:[%s8095_s7 + $0x310] sm:$0xff] %vm3646_vm1, %v3616_v3  ;;  %v3617_v55 = vadd.f32 %v6918_v53, %v3431_v27 }
 0x24b   :  { %v3434_v28 = vpop.xlane.xlu0 %3433 }
 0x24c   :  { %3746 = vst.msk [vmem:[%s8095_s7 + $0x318] sm:$0xff] %vm3646_vm1, %v3617_v55  ;;  %v3618_v4 = vadd.f32 %v6918_v53, %v3434_v28 }
 0x24d   :  { %v3437_v5 = vpop.xlane.xlu1 %3436 }
 0x24e   :  { %3747 = vst.msk [vmem:[%s8095_s7 + $0x320] sm:$0xff] %vm3646_vm1, %v3618_v4  ;;  %v3619_v6 = vadd.f32 %v6918_v53, %v3437_v5 }
 0x24f   :  { %v3440_v8 = vpop.xlane.xlu0 %3439 }
 0x250   :  { %3748 = vst.msk [vmem:[%s8095_s7 + $0x328] sm:$0xff] %vm3646_vm1, %v3619_v6  ;;  %v3620_v9 = vadd.f32 %v6918_v53, %v3440_v8 }
 0x251   :  { %v3443_v10 = vpop.xlane.xlu1 %3442 }
 0x252   :  { %3749 = vst.msk [vmem:[%s8095_s7 + $0x330] sm:$0xff] %vm3646_vm1, %v3620_v9  ;;  %v3621_v11 = vadd.f32 %v6918_v53, %v3443_v10 }
 0x253   :  { %v3446_v12 = vpop.xlane.xlu0 %3445 }
 0x254   :  { %3750 = vst.msk [vmem:[%s8095_s7 + $0x338] sm:$0xff] %vm3646_vm1, %v3621_v11  ;;  %v3622_v13 = vadd.f32 %v6918_v53, %v3446_v12 }
 0x255   :  { %v3449_v14 = vpop.xlane.xlu1 %3448 }
 0x256   :  { %3751 = vst.msk [vmem:[%s8095_s7 + $0x340] sm:$0xff] %vm3646_vm1, %v3622_v13  ;;  %v3623_v15 = vadd.f32 %v6918_v53, %v3449_v14 }
 0x257   :  { %v3452_v16 = vpop.xlane.xlu0 %3451 }
 0x258   :  { %3752 = vst.msk [vmem:[%s8095_s7 + $0x348] sm:$0xff] %vm3646_vm1, %v3623_v15  ;;  %v3624_v17 = vadd.f32 %v6918_v53, %v3452_v16 }
 0x259   :  { %v3455_v18 = vpop.xlane.xlu1 %3454 }
 0x25a   :  { %3753 = vst.msk [vmem:[%s8095_s7 + $0x350] sm:$0xff] %vm3646_vm1, %v3624_v17  ;;  %v3625_v20 = vadd.f32 %v6918_v53, %v3455_v18 }
 0x25b   :  { %v3458_v31 = vpop.xlane.xlu0 %3457 }
 0x25c   :  { %3754 = vst.msk [vmem:[%s8095_s7 + $0x358] sm:$0xff] %vm3646_vm1, %v3625_v20  ;;  %v3626_v19 = vadd.f32 %v6918_v53, %v3458_v31 }
 0x25d   :  { %v3461_v32 = vpop.xlane.xlu1 %3460 }
 0x25e   :  { %3755 = vst.msk [vmem:[%s8095_s7 + $0x360] sm:$0xff] %vm3646_vm1, %v3626_v19  ;;  %v3627_v44 = vadd.f32 %v6918_v53, %v3461_v32 }
 0x25f   :  { %v3464_v21 = vpop.xlane.xlu0 %3463 }
 0x260   :  { %3756 = vst.msk [vmem:[%s8095_s7 + $0x368] sm:$0xff] %vm3646_vm1, %v3627_v44  ;;  %v3628_v22 = vadd.f32 %v6918_v53, %v3464_v21 }
 0x261   :  { %v3467_v23 = vpop.xlane.xlu1 %3466 }
 0x262   :  { %3757 = vst.msk [vmem:[%s8095_s7 + $0x370] sm:$0xff] %vm3646_vm1, %v3628_v22  ;;  %v3629_v24 = vadd.f32 %v6918_v53, %v3467_v23 }
 0x263   :  { %v3470_v25 = vpop.xlane.xlu0 %3469 }
 0x264   :  { %3758 = vst.msk [vmem:[%s8095_s7 + $0x378] sm:$0xff] %vm3646_vm1, %v3629_v24  ;;  %v3630_v37 = vadd.f32 %v6918_v53, %v3470_v25 }
 0x265   :  { %v3473_v38 = vpop.xlane.xlu1 %3472 }
 0x266   :  { %3759 = vst.msk [vmem:[%s8095_s7 + $0x380] sm:$0xff] %vm3646_vm1, %v3630_v37  ;;  %v3631_v42 = vadd.f32 %v6918_v53, %v3473_v38 }
 0x268   :  { %3760 = vst.msk [vmem:[%s8095_s7 + $0x388] sm:$0xff] %vm3646_vm1, %v3631_v42  ;;  %v3476_v29 = vpop.xlane.xlu0 %3475 }
 0x269   :  { %v3632_v30 = vadd.f32 %v6918_v53, %v3476_v29  ;;  %v3479_v52 = vpop.xlane.xlu1 %3478 }
 0x26a   :  { %v3633_v26 = vadd.f32 %v6918_v53, %v3479_v52 }
 0x26b   :  { %3761 = vst.msk [vmem:[%s8095_s7 + $0x390] sm:$0xff] %vm3646_vm1, %v3632_v30 }
 0x26c   :  { %3762 = vst.msk [vmem:[%s8095_s7 + $0x398] sm:$0xff] %vm3646_vm1, %v3633_v26  ;;  %v3482_v43 = vpop.xlane.xlu0 %3481 }
 0x26d   :  { %v3634_v61 = vadd.f32 %v6918_v53, %v3482_v43  ;;  %v3485_v45 = vpop.xlane.xlu1 %3484 }
 0x26e   :  { %v3635_v46 = vadd.f32 %v6918_v53, %v3485_v45 }
 0x26f   :  { %3763 = vst.msk [vmem:[%s8095_s7 + $0x3a0] sm:$0xff] %vm3646_vm1, %v3634_v61 }
 0x270   :  { %3764 = vst.msk [vmem:[%s8095_s7 + $0x3a8] sm:$0xff] %vm3646_vm1, %v3635_v46  ;;  %v3488_v41 = vpop.xlane.xlu0 %3487 }
 0x271   :  { %v3636_v47 = vadd.f32 %v6918_v53, %v3488_v41  ;;  %v3491_v48 = vpop.xlane.xlu1 %3490 }
 0x272   :  { %v3637_v35 = vadd.f32 %v6918_v53, %v3491_v48 }
 0x273   :  { %3765 = vst.msk [vmem:[%s8095_s7 + $0x3b0] sm:$0xff] %vm3646_vm1, %v3636_v47 }
 0x274   :  { %3766 = vst.msk [vmem:[%s8095_s7 + $0x3b8] sm:$0xff] %vm3646_vm1, %v3637_v35  ;;  %v3494_v36 = vpop.xlane.xlu0 %3493 }
 0x275   :  { %v3638_v49 = vadd.f32 %v6918_v53, %v3494_v36  ;;  %v3497_v50 = vpop.xlane.xlu1 %3496 }
 0x276   :  { %v3639_v51 = vadd.f32 %v6918_v53, %v3497_v50 }
 0x277   :  { %3767 = vst.msk [vmem:[%s8095_s7 + $0x3c0] sm:$0xff] %vm3646_vm1, %v3638_v49 }
 0x278   :  { %3768 = vst.msk [vmem:[%s8095_s7 + $0x3c8] sm:$0xff] %vm3646_vm1, %v3639_v51  ;;  %v3500_v33 = vpop.xlane.xlu0 %3499 }
 0x279   :  { %v3640_v34 = vadd.f32 %v6918_v53, %v3500_v33  ;;  %v3503_v54 = vpop.xlane.xlu1 %3502 }
 0x27a   :  { %v3641_v56 = vadd.f32 %v6918_v53, %v3503_v54 }
 0x27b   :  { %3769 = vst.msk [vmem:[%s8095_s7 + $0x3d0] sm:$0xff] %vm3646_vm1, %v3640_v34 }
 0x27c   :  { %3770 = vst.msk [vmem:[%s8095_s7 + $0x3d8] sm:$0xff] %vm3646_vm1, %v3641_v56  ;;  %v3506_v57 = vpop.xlane.xlu0 %3505 }
 0x27d   :  { %v3642_v58 = vadd.f32 %v6918_v53, %v3506_v57  ;;  %v3509_v7 = vpop.xlane.xlu1 %3508 }
 0x27e   :  { %v3643_v59 = vadd.f32 %v6918_v53, %v3509_v7 }
 0x27f   :  { %3771 = vst.msk [vmem:[%s8095_s7 + $0x3e0] sm:$0xff] %vm3646_vm1, %v3642_v58 }
 0x280   :  { %3772 = vst.msk [vmem:[%s8095_s7 + $0x3e8] sm:$0xff] %vm3646_vm1, %v3643_v59  ;;  %v3512_v62 = vpop.xlane.xlu0 %3511 }
 0x281   :  { %v3644_v63 = vadd.f32 %v6918_v53, %v3512_v62  ;;  %v3515_v0 = vpop.xlane.xlu1 %3514 }
 0x282   :  { %v3645_v1 = vadd.f32 %v6918_v53, %v3515_v0 }
 0x283   :  { %3773 = vst.msk [vmem:[%s8095_s7 + $0x3f0] sm:$0xff] %vm3646_vm1, %v3644_v63 }
 0x284   :  { %3774 = vst.msk [vmem:[%s8095_s7 + $0x3f8] sm:$0xff] %vm3646_vm1, %v3645_v1 }

</bundles_post_ra>
